<compile_context>
chip_gen: v5e
topology: v5e:2x2
jax: 0.10.0
libtpu: 0.0.40
codegen_flags: <defaults>
</compile_context>

<pallas_src>
import functools

import jax
import jax.numpy as jnp
from jax.experimental import pallas as pl
from jax.experimental.pallas import tpu as pltpu

_LANE = 128


def _round_up(a: int, b: int) -> int:
    return (a + b - 1) // b * b


def _recip(d):
    """1/d via EUP approximate reciprocal + one Newton-Raphson refinement."""
    r = pl.reciprocal(d, approx=True)
    return r * (2.0 - d * r)


def _chip_budgets():
    """Per-generation (target input-block bytes, vmem_limit ceiling)."""
    try:
        cap = int(pltpu.get_tpu_info().vmem_capacity_bytes)
    except Exception:
        cap = 64 * 1024 * 1024  # conservative (v7x-like) fallback
    if cap >= 100 * 1024 * 1024:            # v5e / v6e: 128 MiB VMEM
        return 6 * 1024 * 1024, 64 * 1024 * 1024
    return 2 * 1024 * 1024, 36 * 1024 * 1024  # v7x: 64 MiB/TC, keep headroom


def _routing_kernel(x_ref, v_ref, *, n_iters: int):
    """One block of S*128 capsule slabs; batch on the last (lane) axis.

    x_ref : (n_caps, L, S, 128) VMEM tile (input dtype)
    v_ref : (L, S, 128)         VMEM tile (final vj for these slabs)
    """
    n_caps, L, S, LN = x_ref.shape
    f32 = jnp.float32

    def xi(i, l):
        # Per-slab load + upcast: live f32 working set stays at single slabs
        # instead of a full-tile f32 copy of x.
        return x_ref[i, l].astype(f32)

    def squash(sj):
        # sj: list of L (S, 128) slabs; |sj|^2 reduced by slab accumulation.
        sq = sj[0] * sj[0]
        for l in range(1, L):
            sq = sq + sj[l] * sj[l]
        scale = sq * _recip(sq + 1.0) * _recip(sq + 1e-8)
        return [scale * s for s in sj]

    # ---- pass 0: b == 0  =>  coupling is exactly uniform (c_i = 1/n_caps) ----
    sj = [xi(0, l) for l in range(L)]
    for i in range(1, n_caps):
        for l in range(L):
            sj[l] = sj[l] + xi(i, l)
    inv_n = 1.0 / n_caps
    sj = [s * inv_n for s in sj]
    vj = squash(sj)

    # ---- remaining passes (the final, unused b-update of the reference is skipped) ----
    b = [jnp.zeros((S, LN), f32) for _ in range(n_caps)]
    for _ in range(1, n_iters - 1):
        # b_i += <x_i, vj>     (accumulate over L; live temp = one (S,128) slab)
        for i in range(n_caps):
            acc = xi(i, 0) * vj[0]
            for l in range(1, L):
                acc = acc + xi(i, l) * vj[l]
            b[i] = b[i] + acc

        # softmax over capsules — capsule axis is unrolled, pure per-lane VPU ops
        m = b[0]
        for i in range(1, n_caps):
            m = jnp.maximum(m, b[i])
        e = [jnp.exp(bi - m) for bi in b]
        denom = e[0]
        for i in range(1, n_caps):
            denom = denom + e[i]
        inv_denom = _recip(denom)
        c = [ei * inv_denom for ei in e]

        # sj_l = sum_i c_i * x_{i,l}   (accumulate over n_caps; live = L slabs)
        sj = [c[0] * xi(0, l) for l in range(L)]
        for i in range(1, n_caps):
            for l in range(L):
                sj[l] = sj[l] + c[i] * xi(i, l)
        vj = squash(sj)

    for l in range(L):
        v_ref[l] = vj[l].astype(v_ref.dtype)


def routing(X: jax.Array, n_iters: int = 3) -> jax.Array:
    """Pallas equivalent of Routing.forward.

    X: (N, C, n_caps, L).  Returns vj.squeeze(-1):
       shape (N, C, 1, L) when L > 1, (N, C, 1) when L == 1.
    """
    if n_iters < 2:
        raise ValueError("Routing requires n_iters >= 2 (vj is produced inside the loop).")

    N, C, n_caps, L = X.shape
    NC = N * C
    itemsize = jnp.dtype(X.dtype).itemsize
    # dtype-aware sublane granule: f32 -> 8, bf16 -> 16, int8/fp8 -> 32
    sub = {4: 8, 2: 16, 1: 32}.get(itemsize, 8)

    target_block_bytes, vmem_cap = _chip_budgets()

    R = _round_up(NC, _LANE) // _LANE            # number of 128-wide batch groups
    bytes_per_s = n_caps * L * _LANE * itemsize  # input bytes per unit of S

    if R <= sub:
        S = R                                    # single block covers whole batch axis
    else:
        s_fit = max(sub, (target_block_bytes // bytes_per_s) // sub * sub)
        # Aim for >= 4 grid steps (2 per TensorCore on v7x) when the batch allows.
        s_split = max(sub, (_round_up(R, sub) // 4) // sub * sub)
        S = max(sub, min(s_fit, s_split))
        # TODO(synk): for very large n_caps*L (where even S == sub exceeds VMEM)
        # split the n_caps axis over a trailing "arbitrary" grid dim carrying
        # b/sj in VMEM scratch (accumulator pattern).

    Rp = _round_up(R, S)
    NCp = Rp * _LANE
    grid = Rp // S

    # Layout plumbing: batch on the lane axis, capsule/feature axes leading.
    # allow_input_fusion lets XLA fuse this transpose/pad into the pallas_call
    # operand instead of materializing a second full copy of X in HBM.
    Xt = jnp.transpose(X.reshape(NC, n_caps, L), (1, 2, 0))       # (n_caps, L, NC)
    if NCp != NC:
        Xt = jnp.pad(Xt, ((0, 0), (0, 0), (0, NCp - NC)))         # zero slabs -> vj = 0
    Xt = Xt.reshape(n_caps, L, Rp, _LANE)

    # dtype-aware VMEM estimate: input/output blocks in their own dtype,
    # intermediates (b, c, sj, vj) in f32.
    in_block = n_caps * L * S * _LANE * itemsize
    out_block = L * S * _LANE * itemsize
    f32_work = (2 * L + 2 * n_caps + 8) * S * _LANE * 4
    vmem_limit = int(min(vmem_cap,
                         max(16 * 1024 * 1024,
                             2 * in_block + 2 * out_block + f32_work + (4 << 20))))

    n_later = max(0, n_iters - 2)
    flops = int(NC * ((n_iters - 1) * (4 * n_caps * L + 6 * L + 10)
                      + n_later * (2 * n_caps * L + 5 * n_caps)))
    transcendentals = int(NC * (n_later * n_caps + 2 * (n_iters - 1)))
    bytes_accessed = int(X.size * itemsize + NC * L * itemsize)

    out = pl.pallas_call(
        functools.partial(_routing_kernel, n_iters=n_iters),
        out_shape=jax.ShapeDtypeStruct((L, Rp, _LANE), X.dtype),
        grid=(grid,),
        in_specs=[pl.BlockSpec((n_caps, L, S, _LANE), lambda i: (0, 0, i, 0))],
        out_specs=pl.BlockSpec((L, S, _LANE), lambda i: (0, i, 0)),
        compiler_params=pltpu.CompilerParams(
            dimension_semantics=("parallel",),
            vmem_limit_bytes=vmem_limit,
            allow_input_fusion=[True]),
        cost_estimate=pl.CostEstimate(
            flops=flops,
            transcendentals=transcendentals,
            bytes_accessed=bytes_accessed),
    )(Xt)

    out = out.reshape(L, NCp)[:, :NC]                              # (L, NC)
    out = jnp.transpose(out, (1, 0)).reshape(N, C, 1, L)
    if L == 1:  # match torch .squeeze(-1) semantics exactly
        out = out.reshape(N, C, 1)
    return out


def _routing_ref(X, n_iters=3):
    """Pure-JAX reference mirroring the PyTorch forward, for verification."""
    N, C, n_caps, L = X.shape
    b = jnp.zeros((N, C, n_caps, 1), X.dtype)
    vj = None
    for _ in range(n_iters - 1):
        c = jax.nn.softmax(b, axis=-2)
        sj = jnp.sum(c * X, axis=-2, keepdims=True)                # (N,C,1,L)
        sq = jnp.sum(sj ** 2, axis=-1, keepdims=True)              # (N,C,1,1)
        vj = sq / (sq + 1.0) * (sj / (sq + 1e-8))                  # (N,C,1,L)
        bj = jnp.einsum('abij,abkj->abik', X, vj)                  # (N,C,n_caps,1)
        b = b + bj
    return jnp.squeeze(vj, axis=-1) if L == 1 else vj


if __name__ == "__main__":
    key0, key1, key2 = jax.random.split(jax.random.PRNGKey(0), 3)

    # Main test: (N, C, n_caps, L) with L > 1 (single-block path).
    X = jax.random.normal(key0, (2, 4, 8, 16), dtype=jnp.float32)
    out = jax.block_until_ready(routing(X, n_iters=3))
    ref = _routing_ref(X, n_iters=3)
    assert out.shape == ref.shape, (out.shape, ref.shape)
    # Tolerance slightly looser than pure-f32: divides go through the EUP
    # approximate reciprocal (+ one Newton step), not an exact VALU divide.
    assert jnp.allclose(out, ref, atol=1e-3, rtol=1e-3), "mismatch vs reference (L=16)"

    # L == 1 exercises the torch `.squeeze(-1)` output path.
    X1 = jax.random.normal(key1, (2, 3, 8, 1), dtype=jnp.float32)
    out1 = jax.block_until_ready(routing(X1, n_iters=3))
    ref1 = _routing_ref(X1, n_iters=3)
    assert out1.shape == ref1.shape, (out1.shape, ref1.shape)
    assert jnp.allclose(out1, ref1, atol=1e-3, rtol=1e-3), "mismatch vs reference (L=1)"

    # Larger flattened batch exercises the multi-block (grid > 1) + padding path.
    X2 = jax.random.normal(key2, (2, 600, 8, 16), dtype=jnp.float32)
    out2 = jax.block_until_ready(routing(X2, n_iters=3))
    ref2 = _routing_ref(X2, n_iters=3)
    assert out2.shape == ref2.shape, (out2.shape, ref2.shape)
    assert jnp.allclose(out2, ref2, atol=1e-3, rtol=1e-3), "mismatch vs reference (grid>1)"

    print("KERNEL_OK")
</pallas_src>

<mosaic_0001>
module attributes {stable_mosaic.version = 11 : i64} {
  func.func @_routing_kernel(%arg0: i32, %arg1: memref<8x16x1x128xf32, #tpu.memory_space<vmem>>, %arg2: memref<16x1x128xf32, #tpu.memory_space<vmem>>) attributes {dimension_semantics = [#tpu.dimension_semantics<parallel>], iteration_bounds = array<i64: 1>, scalar_prefetch = 0 : i64, scratch_operands = 0 : i64, tpu.core_type = #tpu.core_type<tc>, window_params = [{transform_indices = @transform_0, window_bounds = array<i64: 8, 16, 1, 128>}, {transform_indices = @transform_1, window_bounds = array<i64: 16, 1, 128>}]} {
    %c0 = arith.constant 0 : index
    %c0_0 = arith.constant 0 : index
    %c0_1 = arith.constant 0 : index
    %c0_2 = arith.constant 0 : index
    %0 = vector.load %arg1[%c0, %c0_0, %c0_1, %c0_2] : memref<8x16x1x128xf32, #tpu.memory_space<vmem>>, vector<1x1x1x128xf32>
    %1 = vector.shape_cast %0 : vector<1x1x1x128xf32> to vector<1x128xf32>
    %c0_3 = arith.constant 0 : index
    %c1 = arith.constant 1 : index
    %c0_4 = arith.constant 0 : index
    %c0_5 = arith.constant 0 : index
    %2 = vector.load %arg1[%c0_3, %c1, %c0_4, %c0_5] : memref<8x16x1x128xf32, #tpu.memory_space<vmem>>, vector<1x1x1x128xf32>
    %3 = vector.shape_cast %2 : vector<1x1x1x128xf32> to vector<1x128xf32>
    %c0_6 = arith.constant 0 : index
    %c2 = arith.constant 2 : index
    %c0_7 = arith.constant 0 : index
    %c0_8 = arith.constant 0 : index
    %4 = vector.load %arg1[%c0_6, %c2, %c0_7, %c0_8] : memref<8x16x1x128xf32, #tpu.memory_space<vmem>>, vector<1x1x1x128xf32>
    %5 = vector.shape_cast %4 : vector<1x1x1x128xf32> to vector<1x128xf32>
    %c0_9 = arith.constant 0 : index
    %c3 = arith.constant 3 : index
    %c0_10 = arith.constant 0 : index
    %c0_11 = arith.constant 0 : index
    %6 = vector.load %arg1[%c0_9, %c3, %c0_10, %c0_11] : memref<8x16x1x128xf32, #tpu.memory_space<vmem>>, vector<1x1x1x128xf32>
    %7 = vector.shape_cast %6 : vector<1x1x1x128xf32> to vector<1x128xf32>
    %c0_12 = arith.constant 0 : index
    %c4 = arith.constant 4 : index
    %c0_13 = arith.constant 0 : index
    %c0_14 = arith.constant 0 : index
    %8 = vector.load %arg1[%c0_12, %c4, %c0_13, %c0_14] : memref<8x16x1x128xf32, #tpu.memory_space<vmem>>, vector<1x1x1x128xf32>
    %9 = vector.shape_cast %8 : vector<1x1x1x128xf32> to vector<1x128xf32>
    %c0_15 = arith.constant 0 : index
    %c5 = arith.constant 5 : index
    %c0_16 = arith.constant 0 : index
    %c0_17 = arith.constant 0 : index
    %10 = vector.load %arg1[%c0_15, %c5, %c0_16, %c0_17] : memref<8x16x1x128xf32, #tpu.memory_space<vmem>>, vector<1x1x1x128xf32>
    %11 = vector.shape_cast %10 : vector<1x1x1x128xf32> to vector<1x128xf32>
    %c0_18 = arith.constant 0 : index
    %c6 = arith.constant 6 : index
    %c0_19 = arith.constant 0 : index
    %c0_20 = arith.constant 0 : index
    %12 = vector.load %arg1[%c0_18, %c6, %c0_19, %c0_20] : memref<8x16x1x128xf32, #tpu.memory_space<vmem>>, vector<1x1x1x128xf32>
    %13 = vector.shape_cast %12 : vector<1x1x1x128xf32> to vector<1x128xf32>
    %c0_21 = arith.constant 0 : index
    %c7 = arith.constant 7 : index
    %c0_22 = arith.constant 0 : index
    %c0_23 = arith.constant 0 : index
    %14 = vector.load %arg1[%c0_21, %c7, %c0_22, %c0_23] : memref<8x16x1x128xf32, #tpu.memory_space<vmem>>, vector<1x1x1x128xf32>
    %15 = vector.shape_cast %14 : vector<1x1x1x128xf32> to vector<1x128xf32>
    %c0_24 = arith.constant 0 : index
    %c8 = arith.constant 8 : index
    %c0_25 = arith.constant 0 : index
    %c0_26 = arith.constant 0 : index
    %16 = vector.load %arg1[%c0_24, %c8, %c0_25, %c0_26] : memref<8x16x1x128xf32, #tpu.memory_space<vmem>>, vector<1x1x1x128xf32>
    %17 = vector.shape_cast %16 : vector<1x1x1x128xf32> to vector<1x128xf32>
    %c0_27 = arith.constant 0 : index
    %c9 = arith.constant 9 : index
    %c0_28 = arith.constant 0 : index
    %c0_29 = arith.constant 0 : index
    %18 = vector.load %arg1[%c0_27, %c9, %c0_28, %c0_29] : memref<8x16x1x128xf32, #tpu.memory_space<vmem>>, vector<1x1x1x128xf32>
    %19 = vector.shape_cast %18 : vector<1x1x1x128xf32> to vector<1x128xf32>
    %c0_30 = arith.constant 0 : index
    %c10 = arith.constant 10 : index
    %c0_31 = arith.constant 0 : index
    %c0_32 = arith.constant 0 : index
    %20 = vector.load %arg1[%c0_30, %c10, %c0_31, %c0_32] : memref<8x16x1x128xf32, #tpu.memory_space<vmem>>, vector<1x1x1x128xf32>
    %21 = vector.shape_cast %20 : vector<1x1x1x128xf32> to vector<1x128xf32>
    %c0_33 = arith.constant 0 : index
    %c11 = arith.constant 11 : index
    %c0_34 = arith.constant 0 : index
    %c0_35 = arith.constant 0 : index
    %22 = vector.load %arg1[%c0_33, %c11, %c0_34, %c0_35] : memref<8x16x1x128xf32, #tpu.memory_space<vmem>>, vector<1x1x1x128xf32>
    %23 = vector.shape_cast %22 : vector<1x1x1x128xf32> to vector<1x128xf32>
    %c0_36 = arith.constant 0 : index
    %c12 = arith.constant 12 : index
    %c0_37 = arith.constant 0 : index
    %c0_38 = arith.constant 0 : index
    %24 = vector.load %arg1[%c0_36, %c12, %c0_37, %c0_38] : memref<8x16x1x128xf32, #tpu.memory_space<vmem>>, vector<1x1x1x128xf32>
    %25 = vector.shape_cast %24 : vector<1x1x1x128xf32> to vector<1x128xf32>
    %c0_39 = arith.constant 0 : index
    %c13 = arith.constant 13 : index
    %c0_40 = arith.constant 0 : index
    %c0_41 = arith.constant 0 : index
    %26 = vector.load %arg1[%c0_39, %c13, %c0_40, %c0_41] : memref<8x16x1x128xf32, #tpu.memory_space<vmem>>, vector<1x1x1x128xf32>
    %27 = vector.shape_cast %26 : vector<1x1x1x128xf32> to vector<1x128xf32>
    %c0_42 = arith.constant 0 : index
    %c14 = arith.constant 14 : index
    %c0_43 = arith.constant 0 : index
    %c0_44 = arith.constant 0 : index
    %28 = vector.load %arg1[%c0_42, %c14, %c0_43, %c0_44] : memref<8x16x1x128xf32, #tpu.memory_space<vmem>>, vector<1x1x1x128xf32>
    %29 = vector.shape_cast %28 : vector<1x1x1x128xf32> to vector<1x128xf32>
    %c0_45 = arith.constant 0 : index
    %c15 = arith.constant 15 : index
    %c0_46 = arith.constant 0 : index
    %c0_47 = arith.constant 0 : index
    %30 = vector.load %arg1[%c0_45, %c15, %c0_46, %c0_47] : memref<8x16x1x128xf32, #tpu.memory_space<vmem>>, vector<1x1x1x128xf32>
    %31 = vector.shape_cast %30 : vector<1x1x1x128xf32> to vector<1x128xf32>
    %c1_48 = arith.constant 1 : index
    %c0_49 = arith.constant 0 : index
    %c0_50 = arith.constant 0 : index
    %c0_51 = arith.constant 0 : index
    %32 = vector.load %arg1[%c1_48, %c0_49, %c0_50, %c0_51] : memref<8x16x1x128xf32, #tpu.memory_space<vmem>>, vector<1x1x1x128xf32>
    %33 = vector.shape_cast %32 : vector<1x1x1x128xf32> to vector<1x128xf32>
    %34 = arith.addf %1, %33 : vector<1x128xf32>
    %c1_52 = arith.constant 1 : index
    %c1_53 = arith.constant 1 : index
    %c0_54 = arith.constant 0 : index
    %c0_55 = arith.constant 0 : index
    %35 = vector.load %arg1[%c1_52, %c1_53, %c0_54, %c0_55] : memref<8x16x1x128xf32, #tpu.memory_space<vmem>>, vector<1x1x1x128xf32>
    %36 = vector.shape_cast %35 : vector<1x1x1x128xf32> to vector<1x128xf32>
    %37 = arith.addf %3, %36 : vector<1x128xf32>
    %c1_56 = arith.constant 1 : index
    %c2_57 = arith.constant 2 : index
    %c0_58 = arith.constant 0 : index
    %c0_59 = arith.constant 0 : index
    %38 = vector.load %arg1[%c1_56, %c2_57, %c0_58, %c0_59] : memref<8x16x1x128xf32, #tpu.memory_space<vmem>>, vector<1x1x1x128xf32>
    %39 = vector.shape_cast %38 : vector<1x1x1x128xf32> to vector<1x128xf32>
    %40 = arith.addf %5, %39 : vector<1x128xf32>
    %c1_60 = arith.constant 1 : index
    %c3_61 = arith.constant 3 : index
    %c0_62 = arith.constant 0 : index
    %c0_63 = arith.constant 0 : index
    %41 = vector.load %arg1[%c1_60, %c3_61, %c0_62, %c0_63] : memref<8x16x1x128xf32, #tpu.memory_space<vmem>>, vector<1x1x1x128xf32>
    %42 = vector.shape_cast %41 : vector<1x1x1x128xf32> to vector<1x128xf32>
    %43 = arith.addf %7, %42 : vector<1x128xf32>
    %c1_64 = arith.constant 1 : index
    %c4_65 = arith.constant 4 : index
    %c0_66 = arith.constant 0 : index
    %c0_67 = arith.constant 0 : index
    %44 = vector.load %arg1[%c1_64, %c4_65, %c0_66, %c0_67] : memref<8x16x1x128xf32, #tpu.memory_space<vmem>>, vector<1x1x1x128xf32>
    %45 = vector.shape_cast %44 : vector<1x1x1x128xf32> to vector<1x128xf32>
    %46 = arith.addf %9, %45 : vector<1x128xf32>
    %c1_68 = arith.constant 1 : index
    %c5_69 = arith.constant 5 : index
    %c0_70 = arith.constant 0 : index
    %c0_71 = arith.constant 0 : index
    %47 = vector.load %arg1[%c1_68, %c5_69, %c0_70, %c0_71] : memref<8x16x1x128xf32, #tpu.memory_space<vmem>>, vector<1x1x1x128xf32>
    %48 = vector.shape_cast %47 : vector<1x1x1x128xf32> to vector<1x128xf32>
    %49 = arith.addf %11, %48 : vector<1x128xf32>
    %c1_72 = arith.constant 1 : index
    %c6_73 = arith.constant 6 : index
    %c0_74 = arith.constant 0 : index
    %c0_75 = arith.constant 0 : index
    %50 = vector.load %arg1[%c1_72, %c6_73, %c0_74, %c0_75] : memref<8x16x1x128xf32, #tpu.memory_space<vmem>>, vector<1x1x1x128xf32>
    %51 = vector.shape_cast %50 : vector<1x1x1x128xf32> to vector<1x128xf32>
    %52 = arith.addf %13, %51 : vector<1x128xf32>
    %c1_76 = arith.constant 1 : index
    %c7_77 = arith.constant 7 : index
    %c0_78 = arith.constant 0 : index
    %c0_79 = arith.constant 0 : index
    %53 = vector.load %arg1[%c1_76, %c7_77, %c0_78, %c0_79] : memref<8x16x1x128xf32, #tpu.memory_space<vmem>>, vector<1x1x1x128xf32>
    %54 = vector.shape_cast %53 : vector<1x1x1x128xf32> to vector<1x128xf32>
    %55 = arith.addf %15, %54 : vector<1x128xf32>
    %c1_80 = arith.constant 1 : index
    %c8_81 = arith.constant 8 : index
    %c0_82 = arith.constant 0 : index
    %c0_83 = arith.constant 0 : index
    %56 = vector.load %arg1[%c1_80, %c8_81, %c0_82, %c0_83] : memref<8x16x1x128xf32, #tpu.memory_space<vmem>>, vector<1x1x1x128xf32>
    %57 = vector.shape_cast %56 : vector<1x1x1x128xf32> to vector<1x128xf32>
    %58 = arith.addf %17, %57 : vector<1x128xf32>
    %c1_84 = arith.constant 1 : index
    %c9_85 = arith.constant 9 : index
    %c0_86 = arith.constant 0 : index
    %c0_87 = arith.constant 0 : index
    %59 = vector.load %arg1[%c1_84, %c9_85, %c0_86, %c0_87] : memref<8x16x1x128xf32, #tpu.memory_space<vmem>>, vector<1x1x1x128xf32>
    %60 = vector.shape_cast %59 : vector<1x1x1x128xf32> to vector<1x128xf32>
    %61 = arith.addf %19, %60 : vector<1x128xf32>
    %c1_88 = arith.constant 1 : index
    %c10_89 = arith.constant 10 : index
    %c0_90 = arith.constant 0 : index
    %c0_91 = arith.constant 0 : index
    %62 = vector.load %arg1[%c1_88, %c10_89, %c0_90, %c0_91] : memref<8x16x1x128xf32, #tpu.memory_space<vmem>>, vector<1x1x1x128xf32>
    %63 = vector.shape_cast %62 : vector<1x1x1x128xf32> to vector<1x128xf32>
    %64 = arith.addf %21, %63 : vector<1x128xf32>
    %c1_92 = arith.constant 1 : index
    %c11_93 = arith.constant 11 : index
    %c0_94 = arith.constant 0 : index
    %c0_95 = arith.constant 0 : index
    %65 = vector.load %arg1[%c1_92, %c11_93, %c0_94, %c0_95] : memref<8x16x1x128xf32, #tpu.memory_space<vmem>>, vector<1x1x1x128xf32>
    %66 = vector.shape_cast %65 : vector<1x1x1x128xf32> to vector<1x128xf32>
    %67 = arith.addf %23, %66 : vector<1x128xf32>
    %c1_96 = arith.constant 1 : index
    %c12_97 = arith.constant 12 : index
    %c0_98 = arith.constant 0 : index
    %c0_99 = arith.constant 0 : index
    %68 = vector.load %arg1[%c1_96, %c12_97, %c0_98, %c0_99] : memref<8x16x1x128xf32, #tpu.memory_space<vmem>>, vector<1x1x1x128xf32>
    %69 = vector.shape_cast %68 : vector<1x1x1x128xf32> to vector<1x128xf32>
    %70 = arith.addf %25, %69 : vector<1x128xf32>
    %c1_100 = arith.constant 1 : index
    %c13_101 = arith.constant 13 : index
    %c0_102 = arith.constant 0 : index
    %c0_103 = arith.constant 0 : index
    %71 = vector.load %arg1[%c1_100, %c13_101, %c0_102, %c0_103] : memref<8x16x1x128xf32, #tpu.memory_space<vmem>>, vector<1x1x1x128xf32>
    %72 = vector.shape_cast %71 : vector<1x1x1x128xf32> to vector<1x128xf32>
    %73 = arith.addf %27, %72 : vector<1x128xf32>
    %c1_104 = arith.constant 1 : index
    %c14_105 = arith.constant 14 : index
    %c0_106 = arith.constant 0 : index
    %c0_107 = arith.constant 0 : index
    %74 = vector.load %arg1[%c1_104, %c14_105, %c0_106, %c0_107] : memref<8x16x1x128xf32, #tpu.memory_space<vmem>>, vector<1x1x1x128xf32>
    %75 = vector.shape_cast %74 : vector<1x1x1x128xf32> to vector<1x128xf32>
    %76 = arith.addf %29, %75 : vector<1x128xf32>
    %c1_108 = arith.constant 1 : index
    %c15_109 = arith.constant 15 : index
    %c0_110 = arith.constant 0 : index
    %c0_111 = arith.constant 0 : index
    %77 = vector.load %arg1[%c1_108, %c15_109, %c0_110, %c0_111] : memref<8x16x1x128xf32, #tpu.memory_space<vmem>>, vector<1x1x1x128xf32>
    %78 = vector.shape_cast %77 : vector<1x1x1x128xf32> to vector<1x128xf32>
    %79 = arith.addf %31, %78 : vector<1x128xf32>
    %c2_112 = arith.constant 2 : index
    %c0_113 = arith.constant 0 : index
    %c0_114 = arith.constant 0 : index
    %c0_115 = arith.constant 0 : index
    %80 = vector.load %arg1[%c2_112, %c0_113, %c0_114, %c0_115] : memref<8x16x1x128xf32, #tpu.memory_space<vmem>>, vector<1x1x1x128xf32>
    %81 = vector.shape_cast %80 : vector<1x1x1x128xf32> to vector<1x128xf32>
    %82 = arith.addf %34, %81 : vector<1x128xf32>
    %c2_116 = arith.constant 2 : index
    %c1_117 = arith.constant 1 : index
    %c0_118 = arith.constant 0 : index
    %c0_119 = arith.constant 0 : index
    %83 = vector.load %arg1[%c2_116, %c1_117, %c0_118, %c0_119] : memref<8x16x1x128xf32, #tpu.memory_space<vmem>>, vector<1x1x1x128xf32>
    %84 = vector.shape_cast %83 : vector<1x1x1x128xf32> to vector<1x128xf32>
    %85 = arith.addf %37, %84 : vector<1x128xf32>
    %c2_120 = arith.constant 2 : index
    %c2_121 = arith.constant 2 : index
    %c0_122 = arith.constant 0 : index
    %c0_123 = arith.constant 0 : index
    %86 = vector.load %arg1[%c2_120, %c2_121, %c0_122, %c0_123] : memref<8x16x1x128xf32, #tpu.memory_space<vmem>>, vector<1x1x1x128xf32>
    %87 = vector.shape_cast %86 : vector<1x1x1x128xf32> to vector<1x128xf32>
    %88 = arith.addf %40, %87 : vector<1x128xf32>
    %c2_124 = arith.constant 2 : index
    %c3_125 = arith.constant 3 : index
    %c0_126 = arith.constant 0 : index
    %c0_127 = arith.constant 0 : index
    %89 = vector.load %arg1[%c2_124, %c3_125, %c0_126, %c0_127] : memref<8x16x1x128xf32, #tpu.memory_space<vmem>>, vector<1x1x1x128xf32>
    %90 = vector.shape_cast %89 : vector<1x1x1x128xf32> to vector<1x128xf32>
    %91 = arith.addf %43, %90 : vector<1x128xf32>
    %c2_128 = arith.constant 2 : index
    %c4_129 = arith.constant 4 : index
    %c0_130 = arith.constant 0 : index
    %c0_131 = arith.constant 0 : index
    %92 = vector.load %arg1[%c2_128, %c4_129, %c0_130, %c0_131] : memref<8x16x1x128xf32, #tpu.memory_space<vmem>>, vector<1x1x1x128xf32>
    %93 = vector.shape_cast %92 : vector<1x1x1x128xf32> to vector<1x128xf32>
    %94 = arith.addf %46, %93 : vector<1x128xf32>
    %c2_132 = arith.constant 2 : index
    %c5_133 = arith.constant 5 : index
    %c0_134 = arith.constant 0 : index
    %c0_135 = arith.constant 0 : index
    %95 = vector.load %arg1[%c2_132, %c5_133, %c0_134, %c0_135] : memref<8x16x1x128xf32, #tpu.memory_space<vmem>>, vector<1x1x1x128xf32>
    %96 = vector.shape_cast %95 : vector<1x1x1x128xf32> to vector<1x128xf32>
    %97 = arith.addf %49, %96 : vector<1x128xf32>
    %c2_136 = arith.constant 2 : index
    %c6_137 = arith.constant 6 : index
    %c0_138 = arith.constant 0 : index
    %c0_139 = arith.constant 0 : index
    %98 = vector.load %arg1[%c2_136, %c6_137, %c0_138, %c0_139] : memref<8x16x1x128xf32, #tpu.memory_space<vmem>>, vector<1x1x1x128xf32>
    %99 = vector.shape_cast %98 : vector<1x1x1x128xf32> to vector<1x128xf32>
    %100 = arith.addf %52, %99 : vector<1x128xf32>
    %c2_140 = arith.constant 2 : index
    %c7_141 = arith.constant 7 : index
    %c0_142 = arith.constant 0 : index
    %c0_143 = arith.constant 0 : index
    %101 = vector.load %arg1[%c2_140, %c7_141, %c0_142, %c0_143] : memref<8x16x1x128xf32, #tpu.memory_space<vmem>>, vector<1x1x1x128xf32>
    %102 = vector.shape_cast %101 : vector<1x1x1x128xf32> to vector<1x128xf32>
    %103 = arith.addf %55, %102 : vector<1x128xf32>
    %c2_144 = arith.constant 2 : index
    %c8_145 = arith.constant 8 : index
    %c0_146 = arith.constant 0 : index
    %c0_147 = arith.constant 0 : index
    %104 = vector.load %arg1[%c2_144, %c8_145, %c0_146, %c0_147] : memref<8x16x1x128xf32, #tpu.memory_space<vmem>>, vector<1x1x1x128xf32>
    %105 = vector.shape_cast %104 : vector<1x1x1x128xf32> to vector<1x128xf32>
    %106 = arith.addf %58, %105 : vector<1x128xf32>
    %c2_148 = arith.constant 2 : index
    %c9_149 = arith.constant 9 : index
    %c0_150 = arith.constant 0 : index
    %c0_151 = arith.constant 0 : index
    %107 = vector.load %arg1[%c2_148, %c9_149, %c0_150, %c0_151] : memref<8x16x1x128xf32, #tpu.memory_space<vmem>>, vector<1x1x1x128xf32>
    %108 = vector.shape_cast %107 : vector<1x1x1x128xf32> to vector<1x128xf32>
    %109 = arith.addf %61, %108 : vector<1x128xf32>
    %c2_152 = arith.constant 2 : index
    %c10_153 = arith.constant 10 : index
    %c0_154 = arith.constant 0 : index
    %c0_155 = arith.constant 0 : index
    %110 = vector.load %arg1[%c2_152, %c10_153, %c0_154, %c0_155] : memref<8x16x1x128xf32, #tpu.memory_space<vmem>>, vector<1x1x1x128xf32>
    %111 = vector.shape_cast %110 : vector<1x1x1x128xf32> to vector<1x128xf32>
    %112 = arith.addf %64, %111 : vector<1x128xf32>
    %c2_156 = arith.constant 2 : index
    %c11_157 = arith.constant 11 : index
    %c0_158 = arith.constant 0 : index
    %c0_159 = arith.constant 0 : index
    %113 = vector.load %arg1[%c2_156, %c11_157, %c0_158, %c0_159] : memref<8x16x1x128xf32, #tpu.memory_space<vmem>>, vector<1x1x1x128xf32>
    %114 = vector.shape_cast %113 : vector<1x1x1x128xf32> to vector<1x128xf32>
    %115 = arith.addf %67, %114 : vector<1x128xf32>
    %c2_160 = arith.constant 2 : index
    %c12_161 = arith.constant 12 : index
    %c0_162 = arith.constant 0 : index
    %c0_163 = arith.constant 0 : index
    %116 = vector.load %arg1[%c2_160, %c12_161, %c0_162, %c0_163] : memref<8x16x1x128xf32, #tpu.memory_space<vmem>>, vector<1x1x1x128xf32>
    %117 = vector.shape_cast %116 : vector<1x1x1x128xf32> to vector<1x128xf32>
    %118 = arith.addf %70, %117 : vector<1x128xf32>
    %c2_164 = arith.constant 2 : index
    %c13_165 = arith.constant 13 : index
    %c0_166 = arith.constant 0 : index
    %c0_167 = arith.constant 0 : index
    %119 = vector.load %arg1[%c2_164, %c13_165, %c0_166, %c0_167] : memref<8x16x1x128xf32, #tpu.memory_space<vmem>>, vector<1x1x1x128xf32>
    %120 = vector.shape_cast %119 : vector<1x1x1x128xf32> to vector<1x128xf32>
    %121 = arith.addf %73, %120 : vector<1x128xf32>
    %c2_168 = arith.constant 2 : index
    %c14_169 = arith.constant 14 : index
    %c0_170 = arith.constant 0 : index
    %c0_171 = arith.constant 0 : index
    %122 = vector.load %arg1[%c2_168, %c14_169, %c0_170, %c0_171] : memref<8x16x1x128xf32, #tpu.memory_space<vmem>>, vector<1x1x1x128xf32>
    %123 = vector.shape_cast %122 : vector<1x1x1x128xf32> to vector<1x128xf32>
    %124 = arith.addf %76, %123 : vector<1x128xf32>
    %c2_172 = arith.constant 2 : index
    %c15_173 = arith.constant 15 : index
    %c0_174 = arith.constant 0 : index
    %c0_175 = arith.constant 0 : index
    %125 = vector.load %arg1[%c2_172, %c15_173, %c0_174, %c0_175] : memref<8x16x1x128xf32, #tpu.memory_space<vmem>>, vector<1x1x1x128xf32>
    %126 = vector.shape_cast %125 : vector<1x1x1x128xf32> to vector<1x128xf32>
    %127 = arith.addf %79, %126 : vector<1x128xf32>
    %c3_176 = arith.constant 3 : index
    %c0_177 = arith.constant 0 : index
    %c0_178 = arith.constant 0 : index
    %c0_179 = arith.constant 0 : index
    %128 = vector.load %arg1[%c3_176, %c0_177, %c0_178, %c0_179] : memref<8x16x1x128xf32, #tpu.memory_space<vmem>>, vector<1x1x1x128xf32>
    %129 = vector.shape_cast %128 : vector<1x1x1x128xf32> to vector<1x128xf32>
    %130 = arith.addf %82, %129 : vector<1x128xf32>
    %c3_180 = arith.constant 3 : index
    %c1_181 = arith.constant 1 : index
    %c0_182 = arith.constant 0 : index
    %c0_183 = arith.constant 0 : index
    %131 = vector.load %arg1[%c3_180, %c1_181, %c0_182, %c0_183] : memref<8x16x1x128xf32, #tpu.memory_space<vmem>>, vector<1x1x1x128xf32>
    %132 = vector.shape_cast %131 : vector<1x1x1x128xf32> to vector<1x128xf32>
    %133 = arith.addf %85, %132 : vector<1x128xf32>
    %c3_184 = arith.constant 3 : index
    %c2_185 = arith.constant 2 : index
    %c0_186 = arith.constant 0 : index
    %c0_187 = arith.constant 0 : index
    %134 = vector.load %arg1[%c3_184, %c2_185, %c0_186, %c0_187] : memref<8x16x1x128xf32, #tpu.memory_space<vmem>>, vector<1x1x1x128xf32>
    %135 = vector.shape_cast %134 : vector<1x1x1x128xf32> to vector<1x128xf32>
    %136 = arith.addf %88, %135 : vector<1x128xf32>
    %c3_188 = arith.constant 3 : index
    %c3_189 = arith.constant 3 : index
    %c0_190 = arith.constant 0 : index
    %c0_191 = arith.constant 0 : index
    %137 = vector.load %arg1[%c3_188, %c3_189, %c0_190, %c0_191] : memref<8x16x1x128xf32, #tpu.memory_space<vmem>>, vector<1x1x1x128xf32>
    %138 = vector.shape_cast %137 : vector<1x1x1x128xf32> to vector<1x128xf32>
    %139 = arith.addf %91, %138 : vector<1x128xf32>
    %c3_192 = arith.constant 3 : index
    %c4_193 = arith.constant 4 : index
    %c0_194 = arith.constant 0 : index
    %c0_195 = arith.constant 0 : index
    %140 = vector.load %arg1[%c3_192, %c4_193, %c0_194, %c0_195] : memref<8x16x1x128xf32, #tpu.memory_space<vmem>>, vector<1x1x1x128xf32>
    %141 = vector.shape_cast %140 : vector<1x1x1x128xf32> to vector<1x128xf32>
    %142 = arith.addf %94, %141 : vector<1x128xf32>
    %c3_196 = arith.constant 3 : index
    %c5_197 = arith.constant 5 : index
    %c0_198 = arith.constant 0 : index
    %c0_199 = arith.constant 0 : index
    %143 = vector.load %arg1[%c3_196, %c5_197, %c0_198, %c0_199] : memref<8x16x1x128xf32, #tpu.memory_space<vmem>>, vector<1x1x1x128xf32>
    %144 = vector.shape_cast %143 : vector<1x1x1x128xf32> to vector<1x128xf32>
    %145 = arith.addf %97, %144 : vector<1x128xf32>
    %c3_200 = arith.constant 3 : index
    %c6_201 = arith.constant 6 : index
    %c0_202 = arith.constant 0 : index
    %c0_203 = arith.constant 0 : index
    %146 = vector.load %arg1[%c3_200, %c6_201, %c0_202, %c0_203] : memref<8x16x1x128xf32, #tpu.memory_space<vmem>>, vector<1x1x1x128xf32>
    %147 = vector.shape_cast %146 : vector<1x1x1x128xf32> to vector<1x128xf32>
    %148 = arith.addf %100, %147 : vector<1x128xf32>
    %c3_204 = arith.constant 3 : index
    %c7_205 = arith.constant 7 : index
    %c0_206 = arith.constant 0 : index
    %c0_207 = arith.constant 0 : index
    %149 = vector.load %arg1[%c3_204, %c7_205, %c0_206, %c0_207] : memref<8x16x1x128xf32, #tpu.memory_space<vmem>>, vector<1x1x1x128xf32>
    %150 = vector.shape_cast %149 : vector<1x1x1x128xf32> to vector<1x128xf32>
    %151 = arith.addf %103, %150 : vector<1x128xf32>
    %c3_208 = arith.constant 3 : index
    %c8_209 = arith.constant 8 : index
    %c0_210 = arith.constant 0 : index
    %c0_211 = arith.constant 0 : index
    %152 = vector.load %arg1[%c3_208, %c8_209, %c0_210, %c0_211] : memref<8x16x1x128xf32, #tpu.memory_space<vmem>>, vector<1x1x1x128xf32>
    %153 = vector.shape_cast %152 : vector<1x1x1x128xf32> to vector<1x128xf32>
    %154 = arith.addf %106, %153 : vector<1x128xf32>
    %c3_212 = arith.constant 3 : index
    %c9_213 = arith.constant 9 : index
    %c0_214 = arith.constant 0 : index
    %c0_215 = arith.constant 0 : index
    %155 = vector.load %arg1[%c3_212, %c9_213, %c0_214, %c0_215] : memref<8x16x1x128xf32, #tpu.memory_space<vmem>>, vector<1x1x1x128xf32>
    %156 = vector.shape_cast %155 : vector<1x1x1x128xf32> to vector<1x128xf32>
    %157 = arith.addf %109, %156 : vector<1x128xf32>
    %c3_216 = arith.constant 3 : index
    %c10_217 = arith.constant 10 : index
    %c0_218 = arith.constant 0 : index
    %c0_219 = arith.constant 0 : index
    %158 = vector.load %arg1[%c3_216, %c10_217, %c0_218, %c0_219] : memref<8x16x1x128xf32, #tpu.memory_space<vmem>>, vector<1x1x1x128xf32>
    %159 = vector.shape_cast %158 : vector<1x1x1x128xf32> to vector<1x128xf32>
    %160 = arith.addf %112, %159 : vector<1x128xf32>
    %c3_220 = arith.constant 3 : index
    %c11_221 = arith.constant 11 : index
    %c0_222 = arith.constant 0 : index
    %c0_223 = arith.constant 0 : index
    %161 = vector.load %arg1[%c3_220, %c11_221, %c0_222, %c0_223] : memref<8x16x1x128xf32, #tpu.memory_space<vmem>>, vector<1x1x1x128xf32>
    %162 = vector.shape_cast %161 : vector<1x1x1x128xf32> to vector<1x128xf32>
    %163 = arith.addf %115, %162 : vector<1x128xf32>
    %c3_224 = arith.constant 3 : index
    %c12_225 = arith.constant 12 : index
    %c0_226 = arith.constant 0 : index
    %c0_227 = arith.constant 0 : index
    %164 = vector.load %arg1[%c3_224, %c12_225, %c0_226, %c0_227] : memref<8x16x1x128xf32, #tpu.memory_space<vmem>>, vector<1x1x1x128xf32>
    %165 = vector.shape_cast %164 : vector<1x1x1x128xf32> to vector<1x128xf32>
    %166 = arith.addf %118, %165 : vector<1x128xf32>
    %c3_228 = arith.constant 3 : index
    %c13_229 = arith.constant 13 : index
    %c0_230 = arith.constant 0 : index
    %c0_231 = arith.constant 0 : index
    %167 = vector.load %arg1[%c3_228, %c13_229, %c0_230, %c0_231] : memref<8x16x1x128xf32, #tpu.memory_space<vmem>>, vector<1x1x1x128xf32>
    %168 = vector.shape_cast %167 : vector<1x1x1x128xf32> to vector<1x128xf32>
    %169 = arith.addf %121, %168 : vector<1x128xf32>
    %c3_232 = arith.constant 3 : index
    %c14_233 = arith.constant 14 : index
    %c0_234 = arith.constant 0 : index
    %c0_235 = arith.constant 0 : index
    %170 = vector.load %arg1[%c3_232, %c14_233, %c0_234, %c0_235] : memref<8x16x1x128xf32, #tpu.memory_space<vmem>>, vector<1x1x1x128xf32>
    %171 = vector.shape_cast %170 : vector<1x1x1x128xf32> to vector<1x128xf32>
    %172 = arith.addf %124, %171 : vector<1x128xf32>
    %c3_236 = arith.constant 3 : index
    %c15_237 = arith.constant 15 : index
    %c0_238 = arith.constant 0 : index
    %c0_239 = arith.constant 0 : index
    %173 = vector.load %arg1[%c3_236, %c15_237, %c0_238, %c0_239] : memref<8x16x1x128xf32, #tpu.memory_space<vmem>>, vector<1x1x1x128xf32>
    %174 = vector.shape_cast %173 : vector<1x1x1x128xf32> to vector<1x128xf32>
    %175 = arith.addf %127, %174 : vector<1x128xf32>
    %c4_240 = arith.constant 4 : index
    %c0_241 = arith.constant 0 : index
    %c0_242 = arith.constant 0 : index
    %c0_243 = arith.constant 0 : index
    %176 = vector.load %arg1[%c4_240, %c0_241, %c0_242, %c0_243] : memref<8x16x1x128xf32, #tpu.memory_space<vmem>>, vector<1x1x1x128xf32>
    %177 = vector.shape_cast %176 : vector<1x1x1x128xf32> to vector<1x128xf32>
    %178 = arith.addf %130, %177 : vector<1x128xf32>
    %c4_244 = arith.constant 4 : index
    %c1_245 = arith.constant 1 : index
    %c0_246 = arith.constant 0 : index
    %c0_247 = arith.constant 0 : index
    %179 = vector.load %arg1[%c4_244, %c1_245, %c0_246, %c0_247] : memref<8x16x1x128xf32, #tpu.memory_space<vmem>>, vector<1x1x1x128xf32>
    %180 = vector.shape_cast %179 : vector<1x1x1x128xf32> to vector<1x128xf32>
    %181 = arith.addf %133, %180 : vector<1x128xf32>
    %c4_248 = arith.constant 4 : index
    %c2_249 = arith.constant 2 : index
    %c0_250 = arith.constant 0 : index
    %c0_251 = arith.constant 0 : index
    %182 = vector.load %arg1[%c4_248, %c2_249, %c0_250, %c0_251] : memref<8x16x1x128xf32, #tpu.memory_space<vmem>>, vector<1x1x1x128xf32>
    %183 = vector.shape_cast %182 : vector<1x1x1x128xf32> to vector<1x128xf32>
    %184 = arith.addf %136, %183 : vector<1x128xf32>
    %c4_252 = arith.constant 4 : index
    %c3_253 = arith.constant 3 : index
    %c0_254 = arith.constant 0 : index
    %c0_255 = arith.constant 0 : index
    %185 = vector.load %arg1[%c4_252, %c3_253, %c0_254, %c0_255] : memref<8x16x1x128xf32, #tpu.memory_space<vmem>>, vector<1x1x1x128xf32>
    %186 = vector.shape_cast %185 : vector<1x1x1x128xf32> to vector<1x128xf32>
    %187 = arith.addf %139, %186 : vector<1x128xf32>
    %c4_256 = arith.constant 4 : index
    %c4_257 = arith.constant 4 : index
    %c0_258 = arith.constant 0 : index
    %c0_259 = arith.constant 0 : index
    %188 = vector.load %arg1[%c4_256, %c4_257, %c0_258, %c0_259] : memref<8x16x1x128xf32, #tpu.memory_space<vmem>>, vector<1x1x1x128xf32>
    %189 = vector.shape_cast %188 : vector<1x1x1x128xf32> to vector<1x128xf32>
    %190 = arith.addf %142, %189 : vector<1x128xf32>
    %c4_260 = arith.constant 4 : index
    %c5_261 = arith.constant 5 : index
    %c0_262 = arith.constant 0 : index
    %c0_263 = arith.constant 0 : index
    %191 = vector.load %arg1[%c4_260, %c5_261, %c0_262, %c0_263] : memref<8x16x1x128xf32, #tpu.memory_space<vmem>>, vector<1x1x1x128xf32>
    %192 = vector.shape_cast %191 : vector<1x1x1x128xf32> to vector<1x128xf32>
    %193 = arith.addf %145, %192 : vector<1x128xf32>
    %c4_264 = arith.constant 4 : index
    %c6_265 = arith.constant 6 : index
    %c0_266 = arith.constant 0 : index
    %c0_267 = arith.constant 0 : index
    %194 = vector.load %arg1[%c4_264, %c6_265, %c0_266, %c0_267] : memref<8x16x1x128xf32, #tpu.memory_space<vmem>>, vector<1x1x1x128xf32>
    %195 = vector.shape_cast %194 : vector<1x1x1x128xf32> to vector<1x128xf32>
    %196 = arith.addf %148, %195 : vector<1x128xf32>
    %c4_268 = arith.constant 4 : index
    %c7_269 = arith.constant 7 : index
    %c0_270 = arith.constant 0 : index
    %c0_271 = arith.constant 0 : index
    %197 = vector.load %arg1[%c4_268, %c7_269, %c0_270, %c0_271] : memref<8x16x1x128xf32, #tpu.memory_space<vmem>>, vector<1x1x1x128xf32>
    %198 = vector.shape_cast %197 : vector<1x1x1x128xf32> to vector<1x128xf32>
    %199 = arith.addf %151, %198 : vector<1x128xf32>
    %c4_272 = arith.constant 4 : index
    %c8_273 = arith.constant 8 : index
    %c0_274 = arith.constant 0 : index
    %c0_275 = arith.constant 0 : index
    %200 = vector.load %arg1[%c4_272, %c8_273, %c0_274, %c0_275] : memref<8x16x1x128xf32, #tpu.memory_space<vmem>>, vector<1x1x1x128xf32>
    %201 = vector.shape_cast %200 : vector<1x1x1x128xf32> to vector<1x128xf32>
    %202 = arith.addf %154, %201 : vector<1x128xf32>
    %c4_276 = arith.constant 4 : index
    %c9_277 = arith.constant 9 : index
    %c0_278 = arith.constant 0 : index
    %c0_279 = arith.constant 0 : index
    %203 = vector.load %arg1[%c4_276, %c9_277, %c0_278, %c0_279] : memref<8x16x1x128xf32, #tpu.memory_space<vmem>>, vector<1x1x1x128xf32>
    %204 = vector.shape_cast %203 : vector<1x1x1x128xf32> to vector<1x128xf32>
    %205 = arith.addf %157, %204 : vector<1x128xf32>
    %c4_280 = arith.constant 4 : index
    %c10_281 = arith.constant 10 : index
    %c0_282 = arith.constant 0 : index
    %c0_283 = arith.constant 0 : index
    %206 = vector.load %arg1[%c4_280, %c10_281, %c0_282, %c0_283] : memref<8x16x1x128xf32, #tpu.memory_space<vmem>>, vector<1x1x1x128xf32>
    %207 = vector.shape_cast %206 : vector<1x1x1x128xf32> to vector<1x128xf32>
    %208 = arith.addf %160, %207 : vector<1x128xf32>
    %c4_284 = arith.constant 4 : index
    %c11_285 = arith.constant 11 : index
    %c0_286 = arith.constant 0 : index
    %c0_287 = arith.constant 0 : index
    %209 = vector.load %arg1[%c4_284, %c11_285, %c0_286, %c0_287] : memref<8x16x1x128xf32, #tpu.memory_space<vmem>>, vector<1x1x1x128xf32>
    %210 = vector.shape_cast %209 : vector<1x1x1x128xf32> to vector<1x128xf32>
    %211 = arith.addf %163, %210 : vector<1x128xf32>
    %c4_288 = arith.constant 4 : index
    %c12_289 = arith.constant 12 : index
    %c0_290 = arith.constant 0 : index
    %c0_291 = arith.constant 0 : index
    %212 = vector.load %arg1[%c4_288, %c12_289, %c0_290, %c0_291] : memref<8x16x1x128xf32, #tpu.memory_space<vmem>>, vector<1x1x1x128xf32>
    %213 = vector.shape_cast %212 : vector<1x1x1x128xf32> to vector<1x128xf32>
    %214 = arith.addf %166, %213 : vector<1x128xf32>
    %c4_292 = arith.constant 4 : index
    %c13_293 = arith.constant 13 : index
    %c0_294 = arith.constant 0 : index
    %c0_295 = arith.constant 0 : index
    %215 = vector.load %arg1[%c4_292, %c13_293, %c0_294, %c0_295] : memref<8x16x1x128xf32, #tpu.memory_space<vmem>>, vector<1x1x1x128xf32>
    %216 = vector.shape_cast %215 : vector<1x1x1x128xf32> to vector<1x128xf32>
    %217 = arith.addf %169, %216 : vector<1x128xf32>
    %c4_296 = arith.constant 4 : index
    %c14_297 = arith.constant 14 : index
    %c0_298 = arith.constant 0 : index
    %c0_299 = arith.constant 0 : index
    %218 = vector.load %arg1[%c4_296, %c14_297, %c0_298, %c0_299] : memref<8x16x1x128xf32, #tpu.memory_space<vmem>>, vector<1x1x1x128xf32>
    %219 = vector.shape_cast %218 : vector<1x1x1x128xf32> to vector<1x128xf32>
    %220 = arith.addf %172, %219 : vector<1x128xf32>
    %c4_300 = arith.constant 4 : index
    %c15_301 = arith.constant 15 : index
    %c0_302 = arith.constant 0 : index
    %c0_303 = arith.constant 0 : index
    %221 = vector.load %arg1[%c4_300, %c15_301, %c0_302, %c0_303] : memref<8x16x1x128xf32, #tpu.memory_space<vmem>>, vector<1x1x1x128xf32>
    %222 = vector.shape_cast %221 : vector<1x1x1x128xf32> to vector<1x128xf32>
    %223 = arith.addf %175, %222 : vector<1x128xf32>
    %c5_304 = arith.constant 5 : index
    %c0_305 = arith.constant 0 : index
    %c0_306 = arith.constant 0 : index
    %c0_307 = arith.constant 0 : index
    %224 = vector.load %arg1[%c5_304, %c0_305, %c0_306, %c0_307] : memref<8x16x1x128xf32, #tpu.memory_space<vmem>>, vector<1x1x1x128xf32>
    %225 = vector.shape_cast %224 : vector<1x1x1x128xf32> to vector<1x128xf32>
    %226 = arith.addf %178, %225 : vector<1x128xf32>
    %c5_308 = arith.constant 5 : index
    %c1_309 = arith.constant 1 : index
    %c0_310 = arith.constant 0 : index
    %c0_311 = arith.constant 0 : index
    %227 = vector.load %arg1[%c5_308, %c1_309, %c0_310, %c0_311] : memref<8x16x1x128xf32, #tpu.memory_space<vmem>>, vector<1x1x1x128xf32>
    %228 = vector.shape_cast %227 : vector<1x1x1x128xf32> to vector<1x128xf32>
    %229 = arith.addf %181, %228 : vector<1x128xf32>
    %c5_312 = arith.constant 5 : index
    %c2_313 = arith.constant 2 : index
    %c0_314 = arith.constant 0 : index
    %c0_315 = arith.constant 0 : index
    %230 = vector.load %arg1[%c5_312, %c2_313, %c0_314, %c0_315] : memref<8x16x1x128xf32, #tpu.memory_space<vmem>>, vector<1x1x1x128xf32>
    %231 = vector.shape_cast %230 : vector<1x1x1x128xf32> to vector<1x128xf32>
    %232 = arith.addf %184, %231 : vector<1x128xf32>
    %c5_316 = arith.constant 5 : index
    %c3_317 = arith.constant 3 : index
    %c0_318 = arith.constant 0 : index
    %c0_319 = arith.constant 0 : index
    %233 = vector.load %arg1[%c5_316, %c3_317, %c0_318, %c0_319] : memref<8x16x1x128xf32, #tpu.memory_space<vmem>>, vector<1x1x1x128xf32>
    %234 = vector.shape_cast %233 : vector<1x1x1x128xf32> to vector<1x128xf32>
    %235 = arith.addf %187, %234 : vector<1x128xf32>
    %c5_320 = arith.constant 5 : index
    %c4_321 = arith.constant 4 : index
    %c0_322 = arith.constant 0 : index
    %c0_323 = arith.constant 0 : index
    %236 = vector.load %arg1[%c5_320, %c4_321, %c0_322, %c0_323] : memref<8x16x1x128xf32, #tpu.memory_space<vmem>>, vector<1x1x1x128xf32>
    %237 = vector.shape_cast %236 : vector<1x1x1x128xf32> to vector<1x128xf32>
    %238 = arith.addf %190, %237 : vector<1x128xf32>
    %c5_324 = arith.constant 5 : index
    %c5_325 = arith.constant 5 : index
    %c0_326 = arith.constant 0 : index
    %c0_327 = arith.constant 0 : index
    %239 = vector.load %arg1[%c5_324, %c5_325, %c0_326, %c0_327] : memref<8x16x1x128xf32, #tpu.memory_space<vmem>>, vector<1x1x1x128xf32>
    %240 = vector.shape_cast %239 : vector<1x1x1x128xf32> to vector<1x128xf32>
    %241 = arith.addf %193, %240 : vector<1x128xf32>
    %c5_328 = arith.constant 5 : index
    %c6_329 = arith.constant 6 : index
    %c0_330 = arith.constant 0 : index
    %c0_331 = arith.constant 0 : index
    %242 = vector.load %arg1[%c5_328, %c6_329, %c0_330, %c0_331] : memref<8x16x1x128xf32, #tpu.memory_space<vmem>>, vector<1x1x1x128xf32>
    %243 = vector.shape_cast %242 : vector<1x1x1x128xf32> to vector<1x128xf32>
    %244 = arith.addf %196, %243 : vector<1x128xf32>
    %c5_332 = arith.constant 5 : index
    %c7_333 = arith.constant 7 : index
    %c0_334 = arith.constant 0 : index
    %c0_335 = arith.constant 0 : index
    %245 = vector.load %arg1[%c5_332, %c7_333, %c0_334, %c0_335] : memref<8x16x1x128xf32, #tpu.memory_space<vmem>>, vector<1x1x1x128xf32>
    %246 = vector.shape_cast %245 : vector<1x1x1x128xf32> to vector<1x128xf32>
    %247 = arith.addf %199, %246 : vector<1x128xf32>
    %c5_336 = arith.constant 5 : index
    %c8_337 = arith.constant 8 : index
    %c0_338 = arith.constant 0 : index
    %c0_339 = arith.constant 0 : index
    %248 = vector.load %arg1[%c5_336, %c8_337, %c0_338, %c0_339] : memref<8x16x1x128xf32, #tpu.memory_space<vmem>>, vector<1x1x1x128xf32>
    %249 = vector.shape_cast %248 : vector<1x1x1x128xf32> to vector<1x128xf32>
    %250 = arith.addf %202, %249 : vector<1x128xf32>
    %c5_340 = arith.constant 5 : index
    %c9_341 = arith.constant 9 : index
    %c0_342 = arith.constant 0 : index
    %c0_343 = arith.constant 0 : index
    %251 = vector.load %arg1[%c5_340, %c9_341, %c0_342, %c0_343] : memref<8x16x1x128xf32, #tpu.memory_space<vmem>>, vector<1x1x1x128xf32>
    %252 = vector.shape_cast %251 : vector<1x1x1x128xf32> to vector<1x128xf32>
    %253 = arith.addf %205, %252 : vector<1x128xf32>
    %c5_344 = arith.constant 5 : index
    %c10_345 = arith.constant 10 : index
    %c0_346 = arith.constant 0 : index
    %c0_347 = arith.constant 0 : index
    %254 = vector.load %arg1[%c5_344, %c10_345, %c0_346, %c0_347] : memref<8x16x1x128xf32, #tpu.memory_space<vmem>>, vector<1x1x1x128xf32>
    %255 = vector.shape_cast %254 : vector<1x1x1x128xf32> to vector<1x128xf32>
    %256 = arith.addf %208, %255 : vector<1x128xf32>
    %c5_348 = arith.constant 5 : index
    %c11_349 = arith.constant 11 : index
    %c0_350 = arith.constant 0 : index
    %c0_351 = arith.constant 0 : index
    %257 = vector.load %arg1[%c5_348, %c11_349, %c0_350, %c0_351] : memref<8x16x1x128xf32, #tpu.memory_space<vmem>>, vector<1x1x1x128xf32>
    %258 = vector.shape_cast %257 : vector<1x1x1x128xf32> to vector<1x128xf32>
    %259 = arith.addf %211, %258 : vector<1x128xf32>
    %c5_352 = arith.constant 5 : index
    %c12_353 = arith.constant 12 : index
    %c0_354 = arith.constant 0 : index
    %c0_355 = arith.constant 0 : index
    %260 = vector.load %arg1[%c5_352, %c12_353, %c0_354, %c0_355] : memref<8x16x1x128xf32, #tpu.memory_space<vmem>>, vector<1x1x1x128xf32>
    %261 = vector.shape_cast %260 : vector<1x1x1x128xf32> to vector<1x128xf32>
    %262 = arith.addf %214, %261 : vector<1x128xf32>
    %c5_356 = arith.constant 5 : index
    %c13_357 = arith.constant 13 : index
    %c0_358 = arith.constant 0 : index
    %c0_359 = arith.constant 0 : index
    %263 = vector.load %arg1[%c5_356, %c13_357, %c0_358, %c0_359] : memref<8x16x1x128xf32, #tpu.memory_space<vmem>>, vector<1x1x1x128xf32>
    %264 = vector.shape_cast %263 : vector<1x1x1x128xf32> to vector<1x128xf32>
    %265 = arith.addf %217, %264 : vector<1x128xf32>
    %c5_360 = arith.constant 5 : index
    %c14_361 = arith.constant 14 : index
    %c0_362 = arith.constant 0 : index
    %c0_363 = arith.constant 0 : index
    %266 = vector.load %arg1[%c5_360, %c14_361, %c0_362, %c0_363] : memref<8x16x1x128xf32, #tpu.memory_space<vmem>>, vector<1x1x1x128xf32>
    %267 = vector.shape_cast %266 : vector<1x1x1x128xf32> to vector<1x128xf32>
    %268 = arith.addf %220, %267 : vector<1x128xf32>
    %c5_364 = arith.constant 5 : index
    %c15_365 = arith.constant 15 : index
    %c0_366 = arith.constant 0 : index
    %c0_367 = arith.constant 0 : index
    %269 = vector.load %arg1[%c5_364, %c15_365, %c0_366, %c0_367] : memref<8x16x1x128xf32, #tpu.memory_space<vmem>>, vector<1x1x1x128xf32>
    %270 = vector.shape_cast %269 : vector<1x1x1x128xf32> to vector<1x128xf32>
    %271 = arith.addf %223, %270 : vector<1x128xf32>
    %c6_368 = arith.constant 6 : index
    %c0_369 = arith.constant 0 : index
    %c0_370 = arith.constant 0 : index
    %c0_371 = arith.constant 0 : index
    %272 = vector.load %arg1[%c6_368, %c0_369, %c0_370, %c0_371] : memref<8x16x1x128xf32, #tpu.memory_space<vmem>>, vector<1x1x1x128xf32>
    %273 = vector.shape_cast %272 : vector<1x1x1x128xf32> to vector<1x128xf32>
    %274 = arith.addf %226, %273 : vector<1x128xf32>
    %c6_372 = arith.constant 6 : index
    %c1_373 = arith.constant 1 : index
    %c0_374 = arith.constant 0 : index
    %c0_375 = arith.constant 0 : index
    %275 = vector.load %arg1[%c6_372, %c1_373, %c0_374, %c0_375] : memref<8x16x1x128xf32, #tpu.memory_space<vmem>>, vector<1x1x1x128xf32>
    %276 = vector.shape_cast %275 : vector<1x1x1x128xf32> to vector<1x128xf32>
    %277 = arith.addf %229, %276 : vector<1x128xf32>
    %c6_376 = arith.constant 6 : index
    %c2_377 = arith.constant 2 : index
    %c0_378 = arith.constant 0 : index
    %c0_379 = arith.constant 0 : index
    %278 = vector.load %arg1[%c6_376, %c2_377, %c0_378, %c0_379] : memref<8x16x1x128xf32, #tpu.memory_space<vmem>>, vector<1x1x1x128xf32>
    %279 = vector.shape_cast %278 : vector<1x1x1x128xf32> to vector<1x128xf32>
    %280 = arith.addf %232, %279 : vector<1x128xf32>
    %c6_380 = arith.constant 6 : index
    %c3_381 = arith.constant 3 : index
    %c0_382 = arith.constant 0 : index
    %c0_383 = arith.constant 0 : index
    %281 = vector.load %arg1[%c6_380, %c3_381, %c0_382, %c0_383] : memref<8x16x1x128xf32, #tpu.memory_space<vmem>>, vector<1x1x1x128xf32>
    %282 = vector.shape_cast %281 : vector<1x1x1x128xf32> to vector<1x128xf32>
    %283 = arith.addf %235, %282 : vector<1x128xf32>
    %c6_384 = arith.constant 6 : index
    %c4_385 = arith.constant 4 : index
    %c0_386 = arith.constant 0 : index
    %c0_387 = arith.constant 0 : index
    %284 = vector.load %arg1[%c6_384, %c4_385, %c0_386, %c0_387] : memref<8x16x1x128xf32, #tpu.memory_space<vmem>>, vector<1x1x1x128xf32>
    %285 = vector.shape_cast %284 : vector<1x1x1x128xf32> to vector<1x128xf32>
    %286 = arith.addf %238, %285 : vector<1x128xf32>
    %c6_388 = arith.constant 6 : index
    %c5_389 = arith.constant 5 : index
    %c0_390 = arith.constant 0 : index
    %c0_391 = arith.constant 0 : index
    %287 = vector.load %arg1[%c6_388, %c5_389, %c0_390, %c0_391] : memref<8x16x1x128xf32, #tpu.memory_space<vmem>>, vector<1x1x1x128xf32>
    %288 = vector.shape_cast %287 : vector<1x1x1x128xf32> to vector<1x128xf32>
    %289 = arith.addf %241, %288 : vector<1x128xf32>
    %c6_392 = arith.constant 6 : index
    %c6_393 = arith.constant 6 : index
    %c0_394 = arith.constant 0 : index
    %c0_395 = arith.constant 0 : index
    %290 = vector.load %arg1[%c6_392, %c6_393, %c0_394, %c0_395] : memref<8x16x1x128xf32, #tpu.memory_space<vmem>>, vector<1x1x1x128xf32>
    %291 = vector.shape_cast %290 : vector<1x1x1x128xf32> to vector<1x128xf32>
    %292 = arith.addf %244, %291 : vector<1x128xf32>
    %c6_396 = arith.constant 6 : index
    %c7_397 = arith.constant 7 : index
    %c0_398 = arith.constant 0 : index
    %c0_399 = arith.constant 0 : index
    %293 = vector.load %arg1[%c6_396, %c7_397, %c0_398, %c0_399] : memref<8x16x1x128xf32, #tpu.memory_space<vmem>>, vector<1x1x1x128xf32>
    %294 = vector.shape_cast %293 : vector<1x1x1x128xf32> to vector<1x128xf32>
    %295 = arith.addf %247, %294 : vector<1x128xf32>
    %c6_400 = arith.constant 6 : index
    %c8_401 = arith.constant 8 : index
    %c0_402 = arith.constant 0 : index
    %c0_403 = arith.constant 0 : index
    %296 = vector.load %arg1[%c6_400, %c8_401, %c0_402, %c0_403] : memref<8x16x1x128xf32, #tpu.memory_space<vmem>>, vector<1x1x1x128xf32>
    %297 = vector.shape_cast %296 : vector<1x1x1x128xf32> to vector<1x128xf32>
    %298 = arith.addf %250, %297 : vector<1x128xf32>
    %c6_404 = arith.constant 6 : index
    %c9_405 = arith.constant 9 : index
    %c0_406 = arith.constant 0 : index
    %c0_407 = arith.constant 0 : index
    %299 = vector.load %arg1[%c6_404, %c9_405, %c0_406, %c0_407] : memref<8x16x1x128xf32, #tpu.memory_space<vmem>>, vector<1x1x1x128xf32>
    %300 = vector.shape_cast %299 : vector<1x1x1x128xf32> to vector<1x128xf32>
    %301 = arith.addf %253, %300 : vector<1x128xf32>
    %c6_408 = arith.constant 6 : index
    %c10_409 = arith.constant 10 : index
    %c0_410 = arith.constant 0 : index
    %c0_411 = arith.constant 0 : index
    %302 = vector.load %arg1[%c6_408, %c10_409, %c0_410, %c0_411] : memref<8x16x1x128xf32, #tpu.memory_space<vmem>>, vector<1x1x1x128xf32>
    %303 = vector.shape_cast %302 : vector<1x1x1x128xf32> to vector<1x128xf32>
    %304 = arith.addf %256, %303 : vector<1x128xf32>
    %c6_412 = arith.constant 6 : index
    %c11_413 = arith.constant 11 : index
    %c0_414 = arith.constant 0 : index
    %c0_415 = arith.constant 0 : index
    %305 = vector.load %arg1[%c6_412, %c11_413, %c0_414, %c0_415] : memref<8x16x1x128xf32, #tpu.memory_space<vmem>>, vector<1x1x1x128xf32>
    %306 = vector.shape_cast %305 : vector<1x1x1x128xf32> to vector<1x128xf32>
    %307 = arith.addf %259, %306 : vector<1x128xf32>
    %c6_416 = arith.constant 6 : index
    %c12_417 = arith.constant 12 : index
    %c0_418 = arith.constant 0 : index
    %c0_419 = arith.constant 0 : index
    %308 = vector.load %arg1[%c6_416, %c12_417, %c0_418, %c0_419] : memref<8x16x1x128xf32, #tpu.memory_space<vmem>>, vector<1x1x1x128xf32>
    %309 = vector.shape_cast %308 : vector<1x1x1x128xf32> to vector<1x128xf32>
    %310 = arith.addf %262, %309 : vector<1x128xf32>
    %c6_420 = arith.constant 6 : index
    %c13_421 = arith.constant 13 : index
    %c0_422 = arith.constant 0 : index
    %c0_423 = arith.constant 0 : index
    %311 = vector.load %arg1[%c6_420, %c13_421, %c0_422, %c0_423] : memref<8x16x1x128xf32, #tpu.memory_space<vmem>>, vector<1x1x1x128xf32>
    %312 = vector.shape_cast %311 : vector<1x1x1x128xf32> to vector<1x128xf32>
    %313 = arith.addf %265, %312 : vector<1x128xf32>
    %c6_424 = arith.constant 6 : index
    %c14_425 = arith.constant 14 : index
    %c0_426 = arith.constant 0 : index
    %c0_427 = arith.constant 0 : index
    %314 = vector.load %arg1[%c6_424, %c14_425, %c0_426, %c0_427] : memref<8x16x1x128xf32, #tpu.memory_space<vmem>>, vector<1x1x1x128xf32>
    %315 = vector.shape_cast %314 : vector<1x1x1x128xf32> to vector<1x128xf32>
    %316 = arith.addf %268, %315 : vector<1x128xf32>
    %c6_428 = arith.constant 6 : index
    %c15_429 = arith.constant 15 : index
    %c0_430 = arith.constant 0 : index
    %c0_431 = arith.constant 0 : index
    %317 = vector.load %arg1[%c6_428, %c15_429, %c0_430, %c0_431] : memref<8x16x1x128xf32, #tpu.memory_space<vmem>>, vector<1x1x1x128xf32>
    %318 = vector.shape_cast %317 : vector<1x1x1x128xf32> to vector<1x128xf32>
    %319 = arith.addf %271, %318 : vector<1x128xf32>
    %c7_432 = arith.constant 7 : index
    %c0_433 = arith.constant 0 : index
    %c0_434 = arith.constant 0 : index
    %c0_435 = arith.constant 0 : index
    %320 = vector.load %arg1[%c7_432, %c0_433, %c0_434, %c0_435] : memref<8x16x1x128xf32, #tpu.memory_space<vmem>>, vector<1x1x1x128xf32>
    %321 = vector.shape_cast %320 : vector<1x1x1x128xf32> to vector<1x128xf32>
    %322 = arith.addf %274, %321 : vector<1x128xf32>
    %c7_436 = arith.constant 7 : index
    %c1_437 = arith.constant 1 : index
    %c0_438 = arith.constant 0 : index
    %c0_439 = arith.constant 0 : index
    %323 = vector.load %arg1[%c7_436, %c1_437, %c0_438, %c0_439] : memref<8x16x1x128xf32, #tpu.memory_space<vmem>>, vector<1x1x1x128xf32>
    %324 = vector.shape_cast %323 : vector<1x1x1x128xf32> to vector<1x128xf32>
    %325 = arith.addf %277, %324 : vector<1x128xf32>
    %c7_440 = arith.constant 7 : index
    %c2_441 = arith.constant 2 : index
    %c0_442 = arith.constant 0 : index
    %c0_443 = arith.constant 0 : index
    %326 = vector.load %arg1[%c7_440, %c2_441, %c0_442, %c0_443] : memref<8x16x1x128xf32, #tpu.memory_space<vmem>>, vector<1x1x1x128xf32>
    %327 = vector.shape_cast %326 : vector<1x1x1x128xf32> to vector<1x128xf32>
    %328 = arith.addf %280, %327 : vector<1x128xf32>
    %c7_444 = arith.constant 7 : index
    %c3_445 = arith.constant 3 : index
    %c0_446 = arith.constant 0 : index
    %c0_447 = arith.constant 0 : index
    %329 = vector.load %arg1[%c7_444, %c3_445, %c0_446, %c0_447] : memref<8x16x1x128xf32, #tpu.memory_space<vmem>>, vector<1x1x1x128xf32>
    %330 = vector.shape_cast %329 : vector<1x1x1x128xf32> to vector<1x128xf32>
    %331 = arith.addf %283, %330 : vector<1x128xf32>
    %c7_448 = arith.constant 7 : index
    %c4_449 = arith.constant 4 : index
    %c0_450 = arith.constant 0 : index
    %c0_451 = arith.constant 0 : index
    %332 = vector.load %arg1[%c7_448, %c4_449, %c0_450, %c0_451] : memref<8x16x1x128xf32, #tpu.memory_space<vmem>>, vector<1x1x1x128xf32>
    %333 = vector.shape_cast %332 : vector<1x1x1x128xf32> to vector<1x128xf32>
    %334 = arith.addf %286, %333 : vector<1x128xf32>
    %c7_452 = arith.constant 7 : index
    %c5_453 = arith.constant 5 : index
    %c0_454 = arith.constant 0 : index
    %c0_455 = arith.constant 0 : index
    %335 = vector.load %arg1[%c7_452, %c5_453, %c0_454, %c0_455] : memref<8x16x1x128xf32, #tpu.memory_space<vmem>>, vector<1x1x1x128xf32>
    %336 = vector.shape_cast %335 : vector<1x1x1x128xf32> to vector<1x128xf32>
    %337 = arith.addf %289, %336 : vector<1x128xf32>
    %c7_456 = arith.constant 7 : index
    %c6_457 = arith.constant 6 : index
    %c0_458 = arith.constant 0 : index
    %c0_459 = arith.constant 0 : index
    %338 = vector.load %arg1[%c7_456, %c6_457, %c0_458, %c0_459] : memref<8x16x1x128xf32, #tpu.memory_space<vmem>>, vector<1x1x1x128xf32>
    %339 = vector.shape_cast %338 : vector<1x1x1x128xf32> to vector<1x128xf32>
    %340 = arith.addf %292, %339 : vector<1x128xf32>
    %c7_460 = arith.constant 7 : index
    %c7_461 = arith.constant 7 : index
    %c0_462 = arith.constant 0 : index
    %c0_463 = arith.constant 0 : index
    %341 = vector.load %arg1[%c7_460, %c7_461, %c0_462, %c0_463] : memref<8x16x1x128xf32, #tpu.memory_space<vmem>>, vector<1x1x1x128xf32>
    %342 = vector.shape_cast %341 : vector<1x1x1x128xf32> to vector<1x128xf32>
    %343 = arith.addf %295, %342 : vector<1x128xf32>
    %c7_464 = arith.constant 7 : index
    %c8_465 = arith.constant 8 : index
    %c0_466 = arith.constant 0 : index
    %c0_467 = arith.constant 0 : index
    %344 = vector.load %arg1[%c7_464, %c8_465, %c0_466, %c0_467] : memref<8x16x1x128xf32, #tpu.memory_space<vmem>>, vector<1x1x1x128xf32>
    %345 = vector.shape_cast %344 : vector<1x1x1x128xf32> to vector<1x128xf32>
    %346 = arith.addf %298, %345 : vector<1x128xf32>
    %c7_468 = arith.constant 7 : index
    %c9_469 = arith.constant 9 : index
    %c0_470 = arith.constant 0 : index
    %c0_471 = arith.constant 0 : index
    %347 = vector.load %arg1[%c7_468, %c9_469, %c0_470, %c0_471] : memref<8x16x1x128xf32, #tpu.memory_space<vmem>>, vector<1x1x1x128xf32>
    %348 = vector.shape_cast %347 : vector<1x1x1x128xf32> to vector<1x128xf32>
    %349 = arith.addf %301, %348 : vector<1x128xf32>
    %c7_472 = arith.constant 7 : index
    %c10_473 = arith.constant 10 : index
    %c0_474 = arith.constant 0 : index
    %c0_475 = arith.constant 0 : index
    %350 = vector.load %arg1[%c7_472, %c10_473, %c0_474, %c0_475] : memref<8x16x1x128xf32, #tpu.memory_space<vmem>>, vector<1x1x1x128xf32>
    %351 = vector.shape_cast %350 : vector<1x1x1x128xf32> to vector<1x128xf32>
    %352 = arith.addf %304, %351 : vector<1x128xf32>
    %c7_476 = arith.constant 7 : index
    %c11_477 = arith.constant 11 : index
    %c0_478 = arith.constant 0 : index
    %c0_479 = arith.constant 0 : index
    %353 = vector.load %arg1[%c7_476, %c11_477, %c0_478, %c0_479] : memref<8x16x1x128xf32, #tpu.memory_space<vmem>>, vector<1x1x1x128xf32>
    %354 = vector.shape_cast %353 : vector<1x1x1x128xf32> to vector<1x128xf32>
    %355 = arith.addf %307, %354 : vector<1x128xf32>
    %c7_480 = arith.constant 7 : index
    %c12_481 = arith.constant 12 : index
    %c0_482 = arith.constant 0 : index
    %c0_483 = arith.constant 0 : index
    %356 = vector.load %arg1[%c7_480, %c12_481, %c0_482, %c0_483] : memref<8x16x1x128xf32, #tpu.memory_space<vmem>>, vector<1x1x1x128xf32>
    %357 = vector.shape_cast %356 : vector<1x1x1x128xf32> to vector<1x128xf32>
    %358 = arith.addf %310, %357 : vector<1x128xf32>
    %c7_484 = arith.constant 7 : index
    %c13_485 = arith.constant 13 : index
    %c0_486 = arith.constant 0 : index
    %c0_487 = arith.constant 0 : index
    %359 = vector.load %arg1[%c7_484, %c13_485, %c0_486, %c0_487] : memref<8x16x1x128xf32, #tpu.memory_space<vmem>>, vector<1x1x1x128xf32>
    %360 = vector.shape_cast %359 : vector<1x1x1x128xf32> to vector<1x128xf32>
    %361 = arith.addf %313, %360 : vector<1x128xf32>
    %c7_488 = arith.constant 7 : index
    %c14_489 = arith.constant 14 : index
    %c0_490 = arith.constant 0 : index
    %c0_491 = arith.constant 0 : index
    %362 = vector.load %arg1[%c7_488, %c14_489, %c0_490, %c0_491] : memref<8x16x1x128xf32, #tpu.memory_space<vmem>>, vector<1x1x1x128xf32>
    %363 = vector.shape_cast %362 : vector<1x1x1x128xf32> to vector<1x128xf32>
    %364 = arith.addf %316, %363 : vector<1x128xf32>
    %c7_492 = arith.constant 7 : index
    %c15_493 = arith.constant 15 : index
    %c0_494 = arith.constant 0 : index
    %c0_495 = arith.constant 0 : index
    %365 = vector.load %arg1[%c7_492, %c15_493, %c0_494, %c0_495] : memref<8x16x1x128xf32, #tpu.memory_space<vmem>>, vector<1x1x1x128xf32>
    %366 = vector.shape_cast %365 : vector<1x1x1x128xf32> to vector<1x128xf32>
    %367 = arith.addf %319, %366 : vector<1x128xf32>
    %cst = arith.constant 1.250000e-01 : f32
    %368 = vector.broadcast %cst : f32 to vector<1x128xf32>
    %369 = arith.mulf %322, %368 : vector<1x128xf32>
    %cst_496 = arith.constant 1.250000e-01 : f32
    %370 = vector.broadcast %cst_496 : f32 to vector<1x128xf32>
    %371 = arith.mulf %325, %370 : vector<1x128xf32>
    %cst_497 = arith.constant 1.250000e-01 : f32
    %372 = vector.broadcast %cst_497 : f32 to vector<1x128xf32>
    %373 = arith.mulf %328, %372 : vector<1x128xf32>
    %cst_498 = arith.constant 1.250000e-01 : f32
    %374 = vector.broadcast %cst_498 : f32 to vector<1x128xf32>
    %375 = arith.mulf %331, %374 : vector<1x128xf32>
    %cst_499 = arith.constant 1.250000e-01 : f32
    %376 = vector.broadcast %cst_499 : f32 to vector<1x128xf32>
    %377 = arith.mulf %334, %376 : vector<1x128xf32>
    %cst_500 = arith.constant 1.250000e-01 : f32
    %378 = vector.broadcast %cst_500 : f32 to vector<1x128xf32>
    %379 = arith.mulf %337, %378 : vector<1x128xf32>
    %cst_501 = arith.constant 1.250000e-01 : f32
    %380 = vector.broadcast %cst_501 : f32 to vector<1x128xf32>
    %381 = arith.mulf %340, %380 : vector<1x128xf32>
    %cst_502 = arith.constant 1.250000e-01 : f32
    %382 = vector.broadcast %cst_502 : f32 to vector<1x128xf32>
    %383 = arith.mulf %343, %382 : vector<1x128xf32>
    %cst_503 = arith.constant 1.250000e-01 : f32
    %384 = vector.broadcast %cst_503 : f32 to vector<1x128xf32>
    %385 = arith.mulf %346, %384 : vector<1x128xf32>
    %cst_504 = arith.constant 1.250000e-01 : f32
    %386 = vector.broadcast %cst_504 : f32 to vector<1x128xf32>
    %387 = arith.mulf %349, %386 : vector<1x128xf32>
    %cst_505 = arith.constant 1.250000e-01 : f32
    %388 = vector.broadcast %cst_505 : f32 to vector<1x128xf32>
    %389 = arith.mulf %352, %388 : vector<1x128xf32>
    %cst_506 = arith.constant 1.250000e-01 : f32
    %390 = vector.broadcast %cst_506 : f32 to vector<1x128xf32>
    %391 = arith.mulf %355, %390 : vector<1x128xf32>
    %cst_507 = arith.constant 1.250000e-01 : f32
    %392 = vector.broadcast %cst_507 : f32 to vector<1x128xf32>
    %393 = arith.mulf %358, %392 : vector<1x128xf32>
    %cst_508 = arith.constant 1.250000e-01 : f32
    %394 = vector.broadcast %cst_508 : f32 to vector<1x128xf32>
    %395 = arith.mulf %361, %394 : vector<1x128xf32>
    %cst_509 = arith.constant 1.250000e-01 : f32
    %396 = vector.broadcast %cst_509 : f32 to vector<1x128xf32>
    %397 = arith.mulf %364, %396 : vector<1x128xf32>
    %cst_510 = arith.constant 1.250000e-01 : f32
    %398 = vector.broadcast %cst_510 : f32 to vector<1x128xf32>
    %399 = arith.mulf %367, %398 : vector<1x128xf32>
    %400 = arith.mulf %369, %369 : vector<1x128xf32>
    %401 = arith.mulf %371, %371 : vector<1x128xf32>
    %402 = arith.addf %400, %401 : vector<1x128xf32>
    %403 = arith.mulf %373, %373 : vector<1x128xf32>
    %404 = arith.addf %402, %403 : vector<1x128xf32>
    %405 = arith.mulf %375, %375 : vector<1x128xf32>
    %406 = arith.addf %404, %405 : vector<1x128xf32>
    %407 = arith.mulf %377, %377 : vector<1x128xf32>
    %408 = arith.addf %406, %407 : vector<1x128xf32>
    %409 = arith.mulf %379, %379 : vector<1x128xf32>
    %410 = arith.addf %408, %409 : vector<1x128xf32>
    %411 = arith.mulf %381, %381 : vector<1x128xf32>
    %412 = arith.addf %410, %411 : vector<1x128xf32>
    %413 = arith.mulf %383, %383 : vector<1x128xf32>
    %414 = arith.addf %412, %413 : vector<1x128xf32>
    %415 = arith.mulf %385, %385 : vector<1x128xf32>
    %416 = arith.addf %414, %415 : vector<1x128xf32>
    %417 = arith.mulf %387, %387 : vector<1x128xf32>
    %418 = arith.addf %416, %417 : vector<1x128xf32>
    %419 = arith.mulf %389, %389 : vector<1x128xf32>
    %420 = arith.addf %418, %419 : vector<1x128xf32>
    %421 = arith.mulf %391, %391 : vector<1x128xf32>
    %422 = arith.addf %420, %421 : vector<1x128xf32>
    %423 = arith.mulf %393, %393 : vector<1x128xf32>
    %424 = arith.addf %422, %423 : vector<1x128xf32>
    %425 = arith.mulf %395, %395 : vector<1x128xf32>
    %426 = arith.addf %424, %425 : vector<1x128xf32>
    %427 = arith.mulf %397, %397 : vector<1x128xf32>
    %428 = arith.addf %426, %427 : vector<1x128xf32>
    %429 = arith.mulf %399, %399 : vector<1x128xf32>
    %430 = arith.addf %428, %429 : vector<1x128xf32>
    %cst_511 = arith.constant 1.000000e+00 : f32
    %431 = vector.broadcast %cst_511 : f32 to vector<1x128xf32>
    %432 = arith.addf %430, %431 : vector<1x128xf32>
    %433 = tpu.reciprocal %432 {approx = true} : vector<1x128xf32> -> vector<1x128xf32>
    %434 = arith.mulf %432, %433 : vector<1x128xf32>
    %cst_512 = arith.constant 2.000000e+00 : f32
    %435 = vector.broadcast %cst_512 : f32 to vector<1x128xf32>
    %436 = arith.subf %435, %434 : vector<1x128xf32>
    %437 = arith.mulf %433, %436 : vector<1x128xf32>
    %438 = arith.mulf %430, %437 : vector<1x128xf32>
    %cst_513 = arith.constant 9.99999993E-9 : f32
    %439 = vector.broadcast %cst_513 : f32 to vector<1x128xf32>
    %440 = arith.addf %430, %439 : vector<1x128xf32>
    %441 = tpu.reciprocal %440 {approx = true} : vector<1x128xf32> -> vector<1x128xf32>
    %442 = arith.mulf %440, %441 : vector<1x128xf32>
    %cst_514 = arith.constant 2.000000e+00 : f32
    %443 = vector.broadcast %cst_514 : f32 to vector<1x128xf32>
    %444 = arith.subf %443, %442 : vector<1x128xf32>
    %445 = arith.mulf %441, %444 : vector<1x128xf32>
    %446 = arith.mulf %438, %445 : vector<1x128xf32>
    %447 = arith.mulf %446, %369 : vector<1x128xf32>
    %448 = arith.mulf %446, %371 : vector<1x128xf32>
    %449 = arith.mulf %446, %373 : vector<1x128xf32>
    %450 = arith.mulf %446, %375 : vector<1x128xf32>
    %451 = arith.mulf %446, %377 : vector<1x128xf32>
    %452 = arith.mulf %446, %379 : vector<1x128xf32>
    %453 = arith.mulf %446, %381 : vector<1x128xf32>
    %454 = arith.mulf %446, %383 : vector<1x128xf32>
    %455 = arith.mulf %446, %385 : vector<1x128xf32>
    %456 = arith.mulf %446, %387 : vector<1x128xf32>
    %457 = arith.mulf %446, %389 : vector<1x128xf32>
    %458 = arith.mulf %446, %391 : vector<1x128xf32>
    %459 = arith.mulf %446, %393 : vector<1x128xf32>
    %460 = arith.mulf %446, %395 : vector<1x128xf32>
    %461 = arith.mulf %446, %397 : vector<1x128xf32>
    %462 = arith.mulf %446, %399 : vector<1x128xf32>
    %cst_515 = arith.constant 0.000000e+00 : f32
    %463 = vector.broadcast %cst_515 : f32 to vector<1x128xf32>
    %cst_516 = arith.constant 0.000000e+00 : f32
    %464 = vector.broadcast %cst_516 : f32 to vector<1x128xf32>
    %cst_517 = arith.constant 0.000000e+00 : f32
    %465 = vector.broadcast %cst_517 : f32 to vector<1x128xf32>
    %cst_518 = arith.constant 0.000000e+00 : f32
    %466 = vector.broadcast %cst_518 : f32 to vector<1x128xf32>
    %cst_519 = arith.constant 0.000000e+00 : f32
    %467 = vector.broadcast %cst_519 : f32 to vector<1x128xf32>
    %cst_520 = arith.constant 0.000000e+00 : f32
    %468 = vector.broadcast %cst_520 : f32 to vector<1x128xf32>
    %cst_521 = arith.constant 0.000000e+00 : f32
    %469 = vector.broadcast %cst_521 : f32 to vector<1x128xf32>
    %cst_522 = arith.constant 0.000000e+00 : f32
    %470 = vector.broadcast %cst_522 : f32 to vector<1x128xf32>
    %c0_523 = arith.constant 0 : index
    %c0_524 = arith.constant 0 : index
    %c0_525 = arith.constant 0 : index
    %c0_526 = arith.constant 0 : index
    %471 = vector.load %arg1[%c0_523, %c0_524, %c0_525, %c0_526] : memref<8x16x1x128xf32, #tpu.memory_space<vmem>>, vector<1x1x1x128xf32>
    %472 = vector.shape_cast %471 : vector<1x1x1x128xf32> to vector<1x128xf32>
    %473 = arith.mulf %472, %447 : vector<1x128xf32>
    %c0_527 = arith.constant 0 : index
    %c1_528 = arith.constant 1 : index
    %c0_529 = arith.constant 0 : index
    %c0_530 = arith.constant 0 : index
    %474 = vector.load %arg1[%c0_527, %c1_528, %c0_529, %c0_530] : memref<8x16x1x128xf32, #tpu.memory_space<vmem>>, vector<1x1x1x128xf32>
    %475 = vector.shape_cast %474 : vector<1x1x1x128xf32> to vector<1x128xf32>
    %476 = arith.mulf %475, %448 : vector<1x128xf32>
    %477 = arith.addf %473, %476 : vector<1x128xf32>
    %c0_531 = arith.constant 0 : index
    %c2_532 = arith.constant 2 : index
    %c0_533 = arith.constant 0 : index
    %c0_534 = arith.constant 0 : index
    %478 = vector.load %arg1[%c0_531, %c2_532, %c0_533, %c0_534] : memref<8x16x1x128xf32, #tpu.memory_space<vmem>>, vector<1x1x1x128xf32>
    %479 = vector.shape_cast %478 : vector<1x1x1x128xf32> to vector<1x128xf32>
    %480 = arith.mulf %479, %449 : vector<1x128xf32>
    %481 = arith.addf %477, %480 : vector<1x128xf32>
    %c0_535 = arith.constant 0 : index
    %c3_536 = arith.constant 3 : index
    %c0_537 = arith.constant 0 : index
    %c0_538 = arith.constant 0 : index
    %482 = vector.load %arg1[%c0_535, %c3_536, %c0_537, %c0_538] : memref<8x16x1x128xf32, #tpu.memory_space<vmem>>, vector<1x1x1x128xf32>
    %483 = vector.shape_cast %482 : vector<1x1x1x128xf32> to vector<1x128xf32>
    %484 = arith.mulf %483, %450 : vector<1x128xf32>
    %485 = arith.addf %481, %484 : vector<1x128xf32>
    %c0_539 = arith.constant 0 : index
    %c4_540 = arith.constant 4 : index
    %c0_541 = arith.constant 0 : index
    %c0_542 = arith.constant 0 : index
    %486 = vector.load %arg1[%c0_539, %c4_540, %c0_541, %c0_542] : memref<8x16x1x128xf32, #tpu.memory_space<vmem>>, vector<1x1x1x128xf32>
    %487 = vector.shape_cast %486 : vector<1x1x1x128xf32> to vector<1x128xf32>
    %488 = arith.mulf %487, %451 : vector<1x128xf32>
    %489 = arith.addf %485, %488 : vector<1x128xf32>
    %c0_543 = arith.constant 0 : index
    %c5_544 = arith.constant 5 : index
    %c0_545 = arith.constant 0 : index
    %c0_546 = arith.constant 0 : index
    %490 = vector.load %arg1[%c0_543, %c5_544, %c0_545, %c0_546] : memref<8x16x1x128xf32, #tpu.memory_space<vmem>>, vector<1x1x1x128xf32>
    %491 = vector.shape_cast %490 : vector<1x1x1x128xf32> to vector<1x128xf32>
    %492 = arith.mulf %491, %452 : vector<1x128xf32>
    %493 = arith.addf %489, %492 : vector<1x128xf32>
    %c0_547 = arith.constant 0 : index
    %c6_548 = arith.constant 6 : index
    %c0_549 = arith.constant 0 : index
    %c0_550 = arith.constant 0 : index
    %494 = vector.load %arg1[%c0_547, %c6_548, %c0_549, %c0_550] : memref<8x16x1x128xf32, #tpu.memory_space<vmem>>, vector<1x1x1x128xf32>
    %495 = vector.shape_cast %494 : vector<1x1x1x128xf32> to vector<1x128xf32>
    %496 = arith.mulf %495, %453 : vector<1x128xf32>
    %497 = arith.addf %493, %496 : vector<1x128xf32>
    %c0_551 = arith.constant 0 : index
    %c7_552 = arith.constant 7 : index
    %c0_553 = arith.constant 0 : index
    %c0_554 = arith.constant 0 : index
    %498 = vector.load %arg1[%c0_551, %c7_552, %c0_553, %c0_554] : memref<8x16x1x128xf32, #tpu.memory_space<vmem>>, vector<1x1x1x128xf32>
    %499 = vector.shape_cast %498 : vector<1x1x1x128xf32> to vector<1x128xf32>
    %500 = arith.mulf %499, %454 : vector<1x128xf32>
    %501 = arith.addf %497, %500 : vector<1x128xf32>
    %c0_555 = arith.constant 0 : index
    %c8_556 = arith.constant 8 : index
    %c0_557 = arith.constant 0 : index
    %c0_558 = arith.constant 0 : index
    %502 = vector.load %arg1[%c0_555, %c8_556, %c0_557, %c0_558] : memref<8x16x1x128xf32, #tpu.memory_space<vmem>>, vector<1x1x1x128xf32>
    %503 = vector.shape_cast %502 : vector<1x1x1x128xf32> to vector<1x128xf32>
    %504 = arith.mulf %503, %455 : vector<1x128xf32>
    %505 = arith.addf %501, %504 : vector<1x128xf32>
    %c0_559 = arith.constant 0 : index
    %c9_560 = arith.constant 9 : index
    %c0_561 = arith.constant 0 : index
    %c0_562 = arith.constant 0 : index
    %506 = vector.load %arg1[%c0_559, %c9_560, %c0_561, %c0_562] : memref<8x16x1x128xf32, #tpu.memory_space<vmem>>, vector<1x1x1x128xf32>
    %507 = vector.shape_cast %506 : vector<1x1x1x128xf32> to vector<1x128xf32>
    %508 = arith.mulf %507, %456 : vector<1x128xf32>
    %509 = arith.addf %505, %508 : vector<1x128xf32>
    %c0_563 = arith.constant 0 : index
    %c10_564 = arith.constant 10 : index
    %c0_565 = arith.constant 0 : index
    %c0_566 = arith.constant 0 : index
    %510 = vector.load %arg1[%c0_563, %c10_564, %c0_565, %c0_566] : memref<8x16x1x128xf32, #tpu.memory_space<vmem>>, vector<1x1x1x128xf32>
    %511 = vector.shape_cast %510 : vector<1x1x1x128xf32> to vector<1x128xf32>
    %512 = arith.mulf %511, %457 : vector<1x128xf32>
    %513 = arith.addf %509, %512 : vector<1x128xf32>
    %c0_567 = arith.constant 0 : index
    %c11_568 = arith.constant 11 : index
    %c0_569 = arith.constant 0 : index
    %c0_570 = arith.constant 0 : index
    %514 = vector.load %arg1[%c0_567, %c11_568, %c0_569, %c0_570] : memref<8x16x1x128xf32, #tpu.memory_space<vmem>>, vector<1x1x1x128xf32>
    %515 = vector.shape_cast %514 : vector<1x1x1x128xf32> to vector<1x128xf32>
    %516 = arith.mulf %515, %458 : vector<1x128xf32>
    %517 = arith.addf %513, %516 : vector<1x128xf32>
    %c0_571 = arith.constant 0 : index
    %c12_572 = arith.constant 12 : index
    %c0_573 = arith.constant 0 : index
    %c0_574 = arith.constant 0 : index
    %518 = vector.load %arg1[%c0_571, %c12_572, %c0_573, %c0_574] : memref<8x16x1x128xf32, #tpu.memory_space<vmem>>, vector<1x1x1x128xf32>
    %519 = vector.shape_cast %518 : vector<1x1x1x128xf32> to vector<1x128xf32>
    %520 = arith.mulf %519, %459 : vector<1x128xf32>
    %521 = arith.addf %517, %520 : vector<1x128xf32>
    %c0_575 = arith.constant 0 : index
    %c13_576 = arith.constant 13 : index
    %c0_577 = arith.constant 0 : index
    %c0_578 = arith.constant 0 : index
    %522 = vector.load %arg1[%c0_575, %c13_576, %c0_577, %c0_578] : memref<8x16x1x128xf32, #tpu.memory_space<vmem>>, vector<1x1x1x128xf32>
    %523 = vector.shape_cast %522 : vector<1x1x1x128xf32> to vector<1x128xf32>
    %524 = arith.mulf %523, %460 : vector<1x128xf32>
    %525 = arith.addf %521, %524 : vector<1x128xf32>
    %c0_579 = arith.constant 0 : index
    %c14_580 = arith.constant 14 : index
    %c0_581 = arith.constant 0 : index
    %c0_582 = arith.constant 0 : index
    %526 = vector.load %arg1[%c0_579, %c14_580, %c0_581, %c0_582] : memref<8x16x1x128xf32, #tpu.memory_space<vmem>>, vector<1x1x1x128xf32>
    %527 = vector.shape_cast %526 : vector<1x1x1x128xf32> to vector<1x128xf32>
    %528 = arith.mulf %527, %461 : vector<1x128xf32>
    %529 = arith.addf %525, %528 : vector<1x128xf32>
    %c0_583 = arith.constant 0 : index
    %c15_584 = arith.constant 15 : index
    %c0_585 = arith.constant 0 : index
    %c0_586 = arith.constant 0 : index
    %530 = vector.load %arg1[%c0_583, %c15_584, %c0_585, %c0_586] : memref<8x16x1x128xf32, #tpu.memory_space<vmem>>, vector<1x1x1x128xf32>
    %531 = vector.shape_cast %530 : vector<1x1x1x128xf32> to vector<1x128xf32>
    %532 = arith.mulf %531, %462 : vector<1x128xf32>
    %533 = arith.addf %529, %532 : vector<1x128xf32>
    %534 = arith.addf %463, %533 : vector<1x128xf32>
    %c1_587 = arith.constant 1 : index
    %c0_588 = arith.constant 0 : index
    %c0_589 = arith.constant 0 : index
    %c0_590 = arith.constant 0 : index
    %535 = vector.load %arg1[%c1_587, %c0_588, %c0_589, %c0_590] : memref<8x16x1x128xf32, #tpu.memory_space<vmem>>, vector<1x1x1x128xf32>
    %536 = vector.shape_cast %535 : vector<1x1x1x128xf32> to vector<1x128xf32>
    %537 = arith.mulf %536, %447 : vector<1x128xf32>
    %c1_591 = arith.constant 1 : index
    %c1_592 = arith.constant 1 : index
    %c0_593 = arith.constant 0 : index
    %c0_594 = arith.constant 0 : index
    %538 = vector.load %arg1[%c1_591, %c1_592, %c0_593, %c0_594] : memref<8x16x1x128xf32, #tpu.memory_space<vmem>>, vector<1x1x1x128xf32>
    %539 = vector.shape_cast %538 : vector<1x1x1x128xf32> to vector<1x128xf32>
    %540 = arith.mulf %539, %448 : vector<1x128xf32>
    %541 = arith.addf %537, %540 : vector<1x128xf32>
    %c1_595 = arith.constant 1 : index
    %c2_596 = arith.constant 2 : index
    %c0_597 = arith.constant 0 : index
    %c0_598 = arith.constant 0 : index
    %542 = vector.load %arg1[%c1_595, %c2_596, %c0_597, %c0_598] : memref<8x16x1x128xf32, #tpu.memory_space<vmem>>, vector<1x1x1x128xf32>
    %543 = vector.shape_cast %542 : vector<1x1x1x128xf32> to vector<1x128xf32>
    %544 = arith.mulf %543, %449 : vector<1x128xf32>
    %545 = arith.addf %541, %544 : vector<1x128xf32>
    %c1_599 = arith.constant 1 : index
    %c3_600 = arith.constant 3 : index
    %c0_601 = arith.constant 0 : index
    %c0_602 = arith.constant 0 : index
    %546 = vector.load %arg1[%c1_599, %c3_600, %c0_601, %c0_602] : memref<8x16x1x128xf32, #tpu.memory_space<vmem>>, vector<1x1x1x128xf32>
    %547 = vector.shape_cast %546 : vector<1x1x1x128xf32> to vector<1x128xf32>
    %548 = arith.mulf %547, %450 : vector<1x128xf32>
    %549 = arith.addf %545, %548 : vector<1x128xf32>
    %c1_603 = arith.constant 1 : index
    %c4_604 = arith.constant 4 : index
    %c0_605 = arith.constant 0 : index
    %c0_606 = arith.constant 0 : index
    %550 = vector.load %arg1[%c1_603, %c4_604, %c0_605, %c0_606] : memref<8x16x1x128xf32, #tpu.memory_space<vmem>>, vector<1x1x1x128xf32>
    %551 = vector.shape_cast %550 : vector<1x1x1x128xf32> to vector<1x128xf32>
    %552 = arith.mulf %551, %451 : vector<1x128xf32>
    %553 = arith.addf %549, %552 : vector<1x128xf32>
    %c1_607 = arith.constant 1 : index
    %c5_608 = arith.constant 5 : index
    %c0_609 = arith.constant 0 : index
    %c0_610 = arith.constant 0 : index
    %554 = vector.load %arg1[%c1_607, %c5_608, %c0_609, %c0_610] : memref<8x16x1x128xf32, #tpu.memory_space<vmem>>, vector<1x1x1x128xf32>
    %555 = vector.shape_cast %554 : vector<1x1x1x128xf32> to vector<1x128xf32>
    %556 = arith.mulf %555, %452 : vector<1x128xf32>
    %557 = arith.addf %553, %556 : vector<1x128xf32>
    %c1_611 = arith.constant 1 : index
    %c6_612 = arith.constant 6 : index
    %c0_613 = arith.constant 0 : index
    %c0_614 = arith.constant 0 : index
    %558 = vector.load %arg1[%c1_611, %c6_612, %c0_613, %c0_614] : memref<8x16x1x128xf32, #tpu.memory_space<vmem>>, vector<1x1x1x128xf32>
    %559 = vector.shape_cast %558 : vector<1x1x1x128xf32> to vector<1x128xf32>
    %560 = arith.mulf %559, %453 : vector<1x128xf32>
    %561 = arith.addf %557, %560 : vector<1x128xf32>
    %c1_615 = arith.constant 1 : index
    %c7_616 = arith.constant 7 : index
    %c0_617 = arith.constant 0 : index
    %c0_618 = arith.constant 0 : index
    %562 = vector.load %arg1[%c1_615, %c7_616, %c0_617, %c0_618] : memref<8x16x1x128xf32, #tpu.memory_space<vmem>>, vector<1x1x1x128xf32>
    %563 = vector.shape_cast %562 : vector<1x1x1x128xf32> to vector<1x128xf32>
    %564 = arith.mulf %563, %454 : vector<1x128xf32>
    %565 = arith.addf %561, %564 : vector<1x128xf32>
    %c1_619 = arith.constant 1 : index
    %c8_620 = arith.constant 8 : index
    %c0_621 = arith.constant 0 : index
    %c0_622 = arith.constant 0 : index
    %566 = vector.load %arg1[%c1_619, %c8_620, %c0_621, %c0_622] : memref<8x16x1x128xf32, #tpu.memory_space<vmem>>, vector<1x1x1x128xf32>
    %567 = vector.shape_cast %566 : vector<1x1x1x128xf32> to vector<1x128xf32>
    %568 = arith.mulf %567, %455 : vector<1x128xf32>
    %569 = arith.addf %565, %568 : vector<1x128xf32>
    %c1_623 = arith.constant 1 : index
    %c9_624 = arith.constant 9 : index
    %c0_625 = arith.constant 0 : index
    %c0_626 = arith.constant 0 : index
    %570 = vector.load %arg1[%c1_623, %c9_624, %c0_625, %c0_626] : memref<8x16x1x128xf32, #tpu.memory_space<vmem>>, vector<1x1x1x128xf32>
    %571 = vector.shape_cast %570 : vector<1x1x1x128xf32> to vector<1x128xf32>
    %572 = arith.mulf %571, %456 : vector<1x128xf32>
    %573 = arith.addf %569, %572 : vector<1x128xf32>
    %c1_627 = arith.constant 1 : index
    %c10_628 = arith.constant 10 : index
    %c0_629 = arith.constant 0 : index
    %c0_630 = arith.constant 0 : index
    %574 = vector.load %arg1[%c1_627, %c10_628, %c0_629, %c0_630] : memref<8x16x1x128xf32, #tpu.memory_space<vmem>>, vector<1x1x1x128xf32>
    %575 = vector.shape_cast %574 : vector<1x1x1x128xf32> to vector<1x128xf32>
    %576 = arith.mulf %575, %457 : vector<1x128xf32>
    %577 = arith.addf %573, %576 : vector<1x128xf32>
    %c1_631 = arith.constant 1 : index
    %c11_632 = arith.constant 11 : index
    %c0_633 = arith.constant 0 : index
    %c0_634 = arith.constant 0 : index
    %578 = vector.load %arg1[%c1_631, %c11_632, %c0_633, %c0_634] : memref<8x16x1x128xf32, #tpu.memory_space<vmem>>, vector<1x1x1x128xf32>
    %579 = vector.shape_cast %578 : vector<1x1x1x128xf32> to vector<1x128xf32>
    %580 = arith.mulf %579, %458 : vector<1x128xf32>
    %581 = arith.addf %577, %580 : vector<1x128xf32>
    %c1_635 = arith.constant 1 : index
    %c12_636 = arith.constant 12 : index
    %c0_637 = arith.constant 0 : index
    %c0_638 = arith.constant 0 : index
    %582 = vector.load %arg1[%c1_635, %c12_636, %c0_637, %c0_638] : memref<8x16x1x128xf32, #tpu.memory_space<vmem>>, vector<1x1x1x128xf32>
    %583 = vector.shape_cast %582 : vector<1x1x1x128xf32> to vector<1x128xf32>
    %584 = arith.mulf %583, %459 : vector<1x128xf32>
    %585 = arith.addf %581, %584 : vector<1x128xf32>
    %c1_639 = arith.constant 1 : index
    %c13_640 = arith.constant 13 : index
    %c0_641 = arith.constant 0 : index
    %c0_642 = arith.constant 0 : index
    %586 = vector.load %arg1[%c1_639, %c13_640, %c0_641, %c0_642] : memref<8x16x1x128xf32, #tpu.memory_space<vmem>>, vector<1x1x1x128xf32>
    %587 = vector.shape_cast %586 : vector<1x1x1x128xf32> to vector<1x128xf32>
    %588 = arith.mulf %587, %460 : vector<1x128xf32>
    %589 = arith.addf %585, %588 : vector<1x128xf32>
    %c1_643 = arith.constant 1 : index
    %c14_644 = arith.constant 14 : index
    %c0_645 = arith.constant 0 : index
    %c0_646 = arith.constant 0 : index
    %590 = vector.load %arg1[%c1_643, %c14_644, %c0_645, %c0_646] : memref<8x16x1x128xf32, #tpu.memory_space<vmem>>, vector<1x1x1x128xf32>
    %591 = vector.shape_cast %590 : vector<1x1x1x128xf32> to vector<1x128xf32>
    %592 = arith.mulf %591, %461 : vector<1x128xf32>
    %593 = arith.addf %589, %592 : vector<1x128xf32>
    %c1_647 = arith.constant 1 : index
    %c15_648 = arith.constant 15 : index
    %c0_649 = arith.constant 0 : index
    %c0_650 = arith.constant 0 : index
    %594 = vector.load %arg1[%c1_647, %c15_648, %c0_649, %c0_650] : memref<8x16x1x128xf32, #tpu.memory_space<vmem>>, vector<1x1x1x128xf32>
    %595 = vector.shape_cast %594 : vector<1x1x1x128xf32> to vector<1x128xf32>
    %596 = arith.mulf %595, %462 : vector<1x128xf32>
    %597 = arith.addf %593, %596 : vector<1x128xf32>
    %598 = arith.addf %464, %597 : vector<1x128xf32>
    %c2_651 = arith.constant 2 : index
    %c0_652 = arith.constant 0 : index
    %c0_653 = arith.constant 0 : index
    %c0_654 = arith.constant 0 : index
    %599 = vector.load %arg1[%c2_651, %c0_652, %c0_653, %c0_654] : memref<8x16x1x128xf32, #tpu.memory_space<vmem>>, vector<1x1x1x128xf32>
    %600 = vector.shape_cast %599 : vector<1x1x1x128xf32> to vector<1x128xf32>
    %601 = arith.mulf %600, %447 : vector<1x128xf32>
    %c2_655 = arith.constant 2 : index
    %c1_656 = arith.constant 1 : index
    %c0_657 = arith.constant 0 : index
    %c0_658 = arith.constant 0 : index
    %602 = vector.load %arg1[%c2_655, %c1_656, %c0_657, %c0_658] : memref<8x16x1x128xf32, #tpu.memory_space<vmem>>, vector<1x1x1x128xf32>
    %603 = vector.shape_cast %602 : vector<1x1x1x128xf32> to vector<1x128xf32>
    %604 = arith.mulf %603, %448 : vector<1x128xf32>
    %605 = arith.addf %601, %604 : vector<1x128xf32>
    %c2_659 = arith.constant 2 : index
    %c2_660 = arith.constant 2 : index
    %c0_661 = arith.constant 0 : index
    %c0_662 = arith.constant 0 : index
    %606 = vector.load %arg1[%c2_659, %c2_660, %c0_661, %c0_662] : memref<8x16x1x128xf32, #tpu.memory_space<vmem>>, vector<1x1x1x128xf32>
    %607 = vector.shape_cast %606 : vector<1x1x1x128xf32> to vector<1x128xf32>
    %608 = arith.mulf %607, %449 : vector<1x128xf32>
    %609 = arith.addf %605, %608 : vector<1x128xf32>
    %c2_663 = arith.constant 2 : index
    %c3_664 = arith.constant 3 : index
    %c0_665 = arith.constant 0 : index
    %c0_666 = arith.constant 0 : index
    %610 = vector.load %arg1[%c2_663, %c3_664, %c0_665, %c0_666] : memref<8x16x1x128xf32, #tpu.memory_space<vmem>>, vector<1x1x1x128xf32>
    %611 = vector.shape_cast %610 : vector<1x1x1x128xf32> to vector<1x128xf32>
    %612 = arith.mulf %611, %450 : vector<1x128xf32>
    %613 = arith.addf %609, %612 : vector<1x128xf32>
    %c2_667 = arith.constant 2 : index
    %c4_668 = arith.constant 4 : index
    %c0_669 = arith.constant 0 : index
    %c0_670 = arith.constant 0 : index
    %614 = vector.load %arg1[%c2_667, %c4_668, %c0_669, %c0_670] : memref<8x16x1x128xf32, #tpu.memory_space<vmem>>, vector<1x1x1x128xf32>
    %615 = vector.shape_cast %614 : vector<1x1x1x128xf32> to vector<1x128xf32>
    %616 = arith.mulf %615, %451 : vector<1x128xf32>
    %617 = arith.addf %613, %616 : vector<1x128xf32>
    %c2_671 = arith.constant 2 : index
    %c5_672 = arith.constant 5 : index
    %c0_673 = arith.constant 0 : index
    %c0_674 = arith.constant 0 : index
    %618 = vector.load %arg1[%c2_671, %c5_672, %c0_673, %c0_674] : memref<8x16x1x128xf32, #tpu.memory_space<vmem>>, vector<1x1x1x128xf32>
    %619 = vector.shape_cast %618 : vector<1x1x1x128xf32> to vector<1x128xf32>
    %620 = arith.mulf %619, %452 : vector<1x128xf32>
    %621 = arith.addf %617, %620 : vector<1x128xf32>
    %c2_675 = arith.constant 2 : index
    %c6_676 = arith.constant 6 : index
    %c0_677 = arith.constant 0 : index
    %c0_678 = arith.constant 0 : index
    %622 = vector.load %arg1[%c2_675, %c6_676, %c0_677, %c0_678] : memref<8x16x1x128xf32, #tpu.memory_space<vmem>>, vector<1x1x1x128xf32>
    %623 = vector.shape_cast %622 : vector<1x1x1x128xf32> to vector<1x128xf32>
    %624 = arith.mulf %623, %453 : vector<1x128xf32>
    %625 = arith.addf %621, %624 : vector<1x128xf32>
    %c2_679 = arith.constant 2 : index
    %c7_680 = arith.constant 7 : index
    %c0_681 = arith.constant 0 : index
    %c0_682 = arith.constant 0 : index
    %626 = vector.load %arg1[%c2_679, %c7_680, %c0_681, %c0_682] : memref<8x16x1x128xf32, #tpu.memory_space<vmem>>, vector<1x1x1x128xf32>
    %627 = vector.shape_cast %626 : vector<1x1x1x128xf32> to vector<1x128xf32>
    %628 = arith.mulf %627, %454 : vector<1x128xf32>
    %629 = arith.addf %625, %628 : vector<1x128xf32>
    %c2_683 = arith.constant 2 : index
    %c8_684 = arith.constant 8 : index
    %c0_685 = arith.constant 0 : index
    %c0_686 = arith.constant 0 : index
    %630 = vector.load %arg1[%c2_683, %c8_684, %c0_685, %c0_686] : memref<8x16x1x128xf32, #tpu.memory_space<vmem>>, vector<1x1x1x128xf32>
    %631 = vector.shape_cast %630 : vector<1x1x1x128xf32> to vector<1x128xf32>
    %632 = arith.mulf %631, %455 : vector<1x128xf32>
    %633 = arith.addf %629, %632 : vector<1x128xf32>
    %c2_687 = arith.constant 2 : index
    %c9_688 = arith.constant 9 : index
    %c0_689 = arith.constant 0 : index
    %c0_690 = arith.constant 0 : index
    %634 = vector.load %arg1[%c2_687, %c9_688, %c0_689, %c0_690] : memref<8x16x1x128xf32, #tpu.memory_space<vmem>>, vector<1x1x1x128xf32>
    %635 = vector.shape_cast %634 : vector<1x1x1x128xf32> to vector<1x128xf32>
    %636 = arith.mulf %635, %456 : vector<1x128xf32>
    %637 = arith.addf %633, %636 : vector<1x128xf32>
    %c2_691 = arith.constant 2 : index
    %c10_692 = arith.constant 10 : index
    %c0_693 = arith.constant 0 : index
    %c0_694 = arith.constant 0 : index
    %638 = vector.load %arg1[%c2_691, %c10_692, %c0_693, %c0_694] : memref<8x16x1x128xf32, #tpu.memory_space<vmem>>, vector<1x1x1x128xf32>
    %639 = vector.shape_cast %638 : vector<1x1x1x128xf32> to vector<1x128xf32>
    %640 = arith.mulf %639, %457 : vector<1x128xf32>
    %641 = arith.addf %637, %640 : vector<1x128xf32>
    %c2_695 = arith.constant 2 : index
    %c11_696 = arith.constant 11 : index
    %c0_697 = arith.constant 0 : index
    %c0_698 = arith.constant 0 : index
    %642 = vector.load %arg1[%c2_695, %c11_696, %c0_697, %c0_698] : memref<8x16x1x128xf32, #tpu.memory_space<vmem>>, vector<1x1x1x128xf32>
    %643 = vector.shape_cast %642 : vector<1x1x1x128xf32> to vector<1x128xf32>
    %644 = arith.mulf %643, %458 : vector<1x128xf32>
    %645 = arith.addf %641, %644 : vector<1x128xf32>
    %c2_699 = arith.constant 2 : index
    %c12_700 = arith.constant 12 : index
    %c0_701 = arith.constant 0 : index
    %c0_702 = arith.constant 0 : index
    %646 = vector.load %arg1[%c2_699, %c12_700, %c0_701, %c0_702] : memref<8x16x1x128xf32, #tpu.memory_space<vmem>>, vector<1x1x1x128xf32>
    %647 = vector.shape_cast %646 : vector<1x1x1x128xf32> to vector<1x128xf32>
    %648 = arith.mulf %647, %459 : vector<1x128xf32>
    %649 = arith.addf %645, %648 : vector<1x128xf32>
    %c2_703 = arith.constant 2 : index
    %c13_704 = arith.constant 13 : index
    %c0_705 = arith.constant 0 : index
    %c0_706 = arith.constant 0 : index
    %650 = vector.load %arg1[%c2_703, %c13_704, %c0_705, %c0_706] : memref<8x16x1x128xf32, #tpu.memory_space<vmem>>, vector<1x1x1x128xf32>
    %651 = vector.shape_cast %650 : vector<1x1x1x128xf32> to vector<1x128xf32>
    %652 = arith.mulf %651, %460 : vector<1x128xf32>
    %653 = arith.addf %649, %652 : vector<1x128xf32>
    %c2_707 = arith.constant 2 : index
    %c14_708 = arith.constant 14 : index
    %c0_709 = arith.constant 0 : index
    %c0_710 = arith.constant 0 : index
    %654 = vector.load %arg1[%c2_707, %c14_708, %c0_709, %c0_710] : memref<8x16x1x128xf32, #tpu.memory_space<vmem>>, vector<1x1x1x128xf32>
    %655 = vector.shape_cast %654 : vector<1x1x1x128xf32> to vector<1x128xf32>
    %656 = arith.mulf %655, %461 : vector<1x128xf32>
    %657 = arith.addf %653, %656 : vector<1x128xf32>
    %c2_711 = arith.constant 2 : index
    %c15_712 = arith.constant 15 : index
    %c0_713 = arith.constant 0 : index
    %c0_714 = arith.constant 0 : index
    %658 = vector.load %arg1[%c2_711, %c15_712, %c0_713, %c0_714] : memref<8x16x1x128xf32, #tpu.memory_space<vmem>>, vector<1x1x1x128xf32>
    %659 = vector.shape_cast %658 : vector<1x1x1x128xf32> to vector<1x128xf32>
    %660 = arith.mulf %659, %462 : vector<1x128xf32>
    %661 = arith.addf %657, %660 : vector<1x128xf32>
    %662 = arith.addf %465, %661 : vector<1x128xf32>
    %c3_715 = arith.constant 3 : index
    %c0_716 = arith.constant 0 : index
    %c0_717 = arith.constant 0 : index
    %c0_718 = arith.constant 0 : index
    %663 = vector.load %arg1[%c3_715, %c0_716, %c0_717, %c0_718] : memref<8x16x1x128xf32, #tpu.memory_space<vmem>>, vector<1x1x1x128xf32>
    %664 = vector.shape_cast %663 : vector<1x1x1x128xf32> to vector<1x128xf32>
    %665 = arith.mulf %664, %447 : vector<1x128xf32>
    %c3_719 = arith.constant 3 : index
    %c1_720 = arith.constant 1 : index
    %c0_721 = arith.constant 0 : index
    %c0_722 = arith.constant 0 : index
    %666 = vector.load %arg1[%c3_719, %c1_720, %c0_721, %c0_722] : memref<8x16x1x128xf32, #tpu.memory_space<vmem>>, vector<1x1x1x128xf32>
    %667 = vector.shape_cast %666 : vector<1x1x1x128xf32> to vector<1x128xf32>
    %668 = arith.mulf %667, %448 : vector<1x128xf32>
    %669 = arith.addf %665, %668 : vector<1x128xf32>
    %c3_723 = arith.constant 3 : index
    %c2_724 = arith.constant 2 : index
    %c0_725 = arith.constant 0 : index
    %c0_726 = arith.constant 0 : index
    %670 = vector.load %arg1[%c3_723, %c2_724, %c0_725, %c0_726] : memref<8x16x1x128xf32, #tpu.memory_space<vmem>>, vector<1x1x1x128xf32>
    %671 = vector.shape_cast %670 : vector<1x1x1x128xf32> to vector<1x128xf32>
    %672 = arith.mulf %671, %449 : vector<1x128xf32>
    %673 = arith.addf %669, %672 : vector<1x128xf32>
    %c3_727 = arith.constant 3 : index
    %c3_728 = arith.constant 3 : index
    %c0_729 = arith.constant 0 : index
    %c0_730 = arith.constant 0 : index
    %674 = vector.load %arg1[%c3_727, %c3_728, %c0_729, %c0_730] : memref<8x16x1x128xf32, #tpu.memory_space<vmem>>, vector<1x1x1x128xf32>
    %675 = vector.shape_cast %674 : vector<1x1x1x128xf32> to vector<1x128xf32>
    %676 = arith.mulf %675, %450 : vector<1x128xf32>
    %677 = arith.addf %673, %676 : vector<1x128xf32>
    %c3_731 = arith.constant 3 : index
    %c4_732 = arith.constant 4 : index
    %c0_733 = arith.constant 0 : index
    %c0_734 = arith.constant 0 : index
    %678 = vector.load %arg1[%c3_731, %c4_732, %c0_733, %c0_734] : memref<8x16x1x128xf32, #tpu.memory_space<vmem>>, vector<1x1x1x128xf32>
    %679 = vector.shape_cast %678 : vector<1x1x1x128xf32> to vector<1x128xf32>
    %680 = arith.mulf %679, %451 : vector<1x128xf32>
    %681 = arith.addf %677, %680 : vector<1x128xf32>
    %c3_735 = arith.constant 3 : index
    %c5_736 = arith.constant 5 : index
    %c0_737 = arith.constant 0 : index
    %c0_738 = arith.constant 0 : index
    %682 = vector.load %arg1[%c3_735, %c5_736, %c0_737, %c0_738] : memref<8x16x1x128xf32, #tpu.memory_space<vmem>>, vector<1x1x1x128xf32>
    %683 = vector.shape_cast %682 : vector<1x1x1x128xf32> to vector<1x128xf32>
    %684 = arith.mulf %683, %452 : vector<1x128xf32>
    %685 = arith.addf %681, %684 : vector<1x128xf32>
    %c3_739 = arith.constant 3 : index
    %c6_740 = arith.constant 6 : index
    %c0_741 = arith.constant 0 : index
    %c0_742 = arith.constant 0 : index
    %686 = vector.load %arg1[%c3_739, %c6_740, %c0_741, %c0_742] : memref<8x16x1x128xf32, #tpu.memory_space<vmem>>, vector<1x1x1x128xf32>
    %687 = vector.shape_cast %686 : vector<1x1x1x128xf32> to vector<1x128xf32>
    %688 = arith.mulf %687, %453 : vector<1x128xf32>
    %689 = arith.addf %685, %688 : vector<1x128xf32>
    %c3_743 = arith.constant 3 : index
    %c7_744 = arith.constant 7 : index
    %c0_745 = arith.constant 0 : index
    %c0_746 = arith.constant 0 : index
    %690 = vector.load %arg1[%c3_743, %c7_744, %c0_745, %c0_746] : memref<8x16x1x128xf32, #tpu.memory_space<vmem>>, vector<1x1x1x128xf32>
    %691 = vector.shape_cast %690 : vector<1x1x1x128xf32> to vector<1x128xf32>
    %692 = arith.mulf %691, %454 : vector<1x128xf32>
    %693 = arith.addf %689, %692 : vector<1x128xf32>
    %c3_747 = arith.constant 3 : index
    %c8_748 = arith.constant 8 : index
    %c0_749 = arith.constant 0 : index
    %c0_750 = arith.constant 0 : index
    %694 = vector.load %arg1[%c3_747, %c8_748, %c0_749, %c0_750] : memref<8x16x1x128xf32, #tpu.memory_space<vmem>>, vector<1x1x1x128xf32>
    %695 = vector.shape_cast %694 : vector<1x1x1x128xf32> to vector<1x128xf32>
    %696 = arith.mulf %695, %455 : vector<1x128xf32>
    %697 = arith.addf %693, %696 : vector<1x128xf32>
    %c3_751 = arith.constant 3 : index
    %c9_752 = arith.constant 9 : index
    %c0_753 = arith.constant 0 : index
    %c0_754 = arith.constant 0 : index
    %698 = vector.load %arg1[%c3_751, %c9_752, %c0_753, %c0_754] : memref<8x16x1x128xf32, #tpu.memory_space<vmem>>, vector<1x1x1x128xf32>
    %699 = vector.shape_cast %698 : vector<1x1x1x128xf32> to vector<1x128xf32>
    %700 = arith.mulf %699, %456 : vector<1x128xf32>
    %701 = arith.addf %697, %700 : vector<1x128xf32>
    %c3_755 = arith.constant 3 : index
    %c10_756 = arith.constant 10 : index
    %c0_757 = arith.constant 0 : index
    %c0_758 = arith.constant 0 : index
    %702 = vector.load %arg1[%c3_755, %c10_756, %c0_757, %c0_758] : memref<8x16x1x128xf32, #tpu.memory_space<vmem>>, vector<1x1x1x128xf32>
    %703 = vector.shape_cast %702 : vector<1x1x1x128xf32> to vector<1x128xf32>
    %704 = arith.mulf %703, %457 : vector<1x128xf32>
    %705 = arith.addf %701, %704 : vector<1x128xf32>
    %c3_759 = arith.constant 3 : index
    %c11_760 = arith.constant 11 : index
    %c0_761 = arith.constant 0 : index
    %c0_762 = arith.constant 0 : index
    %706 = vector.load %arg1[%c3_759, %c11_760, %c0_761, %c0_762] : memref<8x16x1x128xf32, #tpu.memory_space<vmem>>, vector<1x1x1x128xf32>
    %707 = vector.shape_cast %706 : vector<1x1x1x128xf32> to vector<1x128xf32>
    %708 = arith.mulf %707, %458 : vector<1x128xf32>
    %709 = arith.addf %705, %708 : vector<1x128xf32>
    %c3_763 = arith.constant 3 : index
    %c12_764 = arith.constant 12 : index
    %c0_765 = arith.constant 0 : index
    %c0_766 = arith.constant 0 : index
    %710 = vector.load %arg1[%c3_763, %c12_764, %c0_765, %c0_766] : memref<8x16x1x128xf32, #tpu.memory_space<vmem>>, vector<1x1x1x128xf32>
    %711 = vector.shape_cast %710 : vector<1x1x1x128xf32> to vector<1x128xf32>
    %712 = arith.mulf %711, %459 : vector<1x128xf32>
    %713 = arith.addf %709, %712 : vector<1x128xf32>
    %c3_767 = arith.constant 3 : index
    %c13_768 = arith.constant 13 : index
    %c0_769 = arith.constant 0 : index
    %c0_770 = arith.constant 0 : index
    %714 = vector.load %arg1[%c3_767, %c13_768, %c0_769, %c0_770] : memref<8x16x1x128xf32, #tpu.memory_space<vmem>>, vector<1x1x1x128xf32>
    %715 = vector.shape_cast %714 : vector<1x1x1x128xf32> to vector<1x128xf32>
    %716 = arith.mulf %715, %460 : vector<1x128xf32>
    %717 = arith.addf %713, %716 : vector<1x128xf32>
    %c3_771 = arith.constant 3 : index
    %c14_772 = arith.constant 14 : index
    %c0_773 = arith.constant 0 : index
    %c0_774 = arith.constant 0 : index
    %718 = vector.load %arg1[%c3_771, %c14_772, %c0_773, %c0_774] : memref<8x16x1x128xf32, #tpu.memory_space<vmem>>, vector<1x1x1x128xf32>
    %719 = vector.shape_cast %718 : vector<1x1x1x128xf32> to vector<1x128xf32>
    %720 = arith.mulf %719, %461 : vector<1x128xf32>
    %721 = arith.addf %717, %720 : vector<1x128xf32>
    %c3_775 = arith.constant 3 : index
    %c15_776 = arith.constant 15 : index
    %c0_777 = arith.constant 0 : index
    %c0_778 = arith.constant 0 : index
    %722 = vector.load %arg1[%c3_775, %c15_776, %c0_777, %c0_778] : memref<8x16x1x128xf32, #tpu.memory_space<vmem>>, vector<1x1x1x128xf32>
    %723 = vector.shape_cast %722 : vector<1x1x1x128xf32> to vector<1x128xf32>
    %724 = arith.mulf %723, %462 : vector<1x128xf32>
    %725 = arith.addf %721, %724 : vector<1x128xf32>
    %726 = arith.addf %466, %725 : vector<1x128xf32>
    %c4_779 = arith.constant 4 : index
    %c0_780 = arith.constant 0 : index
    %c0_781 = arith.constant 0 : index
    %c0_782 = arith.constant 0 : index
    %727 = vector.load %arg1[%c4_779, %c0_780, %c0_781, %c0_782] : memref<8x16x1x128xf32, #tpu.memory_space<vmem>>, vector<1x1x1x128xf32>
    %728 = vector.shape_cast %727 : vector<1x1x1x128xf32> to vector<1x128xf32>
    %729 = arith.mulf %728, %447 : vector<1x128xf32>
    %c4_783 = arith.constant 4 : index
    %c1_784 = arith.constant 1 : index
    %c0_785 = arith.constant 0 : index
    %c0_786 = arith.constant 0 : index
    %730 = vector.load %arg1[%c4_783, %c1_784, %c0_785, %c0_786] : memref<8x16x1x128xf32, #tpu.memory_space<vmem>>, vector<1x1x1x128xf32>
    %731 = vector.shape_cast %730 : vector<1x1x1x128xf32> to vector<1x128xf32>
    %732 = arith.mulf %731, %448 : vector<1x128xf32>
    %733 = arith.addf %729, %732 : vector<1x128xf32>
    %c4_787 = arith.constant 4 : index
    %c2_788 = arith.constant 2 : index
    %c0_789 = arith.constant 0 : index
    %c0_790 = arith.constant 0 : index
    %734 = vector.load %arg1[%c4_787, %c2_788, %c0_789, %c0_790] : memref<8x16x1x128xf32, #tpu.memory_space<vmem>>, vector<1x1x1x128xf32>
    %735 = vector.shape_cast %734 : vector<1x1x1x128xf32> to vector<1x128xf32>
    %736 = arith.mulf %735, %449 : vector<1x128xf32>
    %737 = arith.addf %733, %736 : vector<1x128xf32>
    %c4_791 = arith.constant 4 : index
    %c3_792 = arith.constant 3 : index
    %c0_793 = arith.constant 0 : index
    %c0_794 = arith.constant 0 : index
    %738 = vector.load %arg1[%c4_791, %c3_792, %c0_793, %c0_794] : memref<8x16x1x128xf32, #tpu.memory_space<vmem>>, vector<1x1x1x128xf32>
    %739 = vector.shape_cast %738 : vector<1x1x1x128xf32> to vector<1x128xf32>
    %740 = arith.mulf %739, %450 : vector<1x128xf32>
    %741 = arith.addf %737, %740 : vector<1x128xf32>
    %c4_795 = arith.constant 4 : index
    %c4_796 = arith.constant 4 : index
    %c0_797 = arith.constant 0 : index
    %c0_798 = arith.constant 0 : index
    %742 = vector.load %arg1[%c4_795, %c4_796, %c0_797, %c0_798] : memref<8x16x1x128xf32, #tpu.memory_space<vmem>>, vector<1x1x1x128xf32>
    %743 = vector.shape_cast %742 : vector<1x1x1x128xf32> to vector<1x128xf32>
    %744 = arith.mulf %743, %451 : vector<1x128xf32>
    %745 = arith.addf %741, %744 : vector<1x128xf32>
    %c4_799 = arith.constant 4 : index
    %c5_800 = arith.constant 5 : index
    %c0_801 = arith.constant 0 : index
    %c0_802 = arith.constant 0 : index
    %746 = vector.load %arg1[%c4_799, %c5_800, %c0_801, %c0_802] : memref<8x16x1x128xf32, #tpu.memory_space<vmem>>, vector<1x1x1x128xf32>
    %747 = vector.shape_cast %746 : vector<1x1x1x128xf32> to vector<1x128xf32>
    %748 = arith.mulf %747, %452 : vector<1x128xf32>
    %749 = arith.addf %745, %748 : vector<1x128xf32>
    %c4_803 = arith.constant 4 : index
    %c6_804 = arith.constant 6 : index
    %c0_805 = arith.constant 0 : index
    %c0_806 = arith.constant 0 : index
    %750 = vector.load %arg1[%c4_803, %c6_804, %c0_805, %c0_806] : memref<8x16x1x128xf32, #tpu.memory_space<vmem>>, vector<1x1x1x128xf32>
    %751 = vector.shape_cast %750 : vector<1x1x1x128xf32> to vector<1x128xf32>
    %752 = arith.mulf %751, %453 : vector<1x128xf32>
    %753 = arith.addf %749, %752 : vector<1x128xf32>
    %c4_807 = arith.constant 4 : index
    %c7_808 = arith.constant 7 : index
    %c0_809 = arith.constant 0 : index
    %c0_810 = arith.constant 0 : index
    %754 = vector.load %arg1[%c4_807, %c7_808, %c0_809, %c0_810] : memref<8x16x1x128xf32, #tpu.memory_space<vmem>>, vector<1x1x1x128xf32>
    %755 = vector.shape_cast %754 : vector<1x1x1x128xf32> to vector<1x128xf32>
    %756 = arith.mulf %755, %454 : vector<1x128xf32>
    %757 = arith.addf %753, %756 : vector<1x128xf32>
    %c4_811 = arith.constant 4 : index
    %c8_812 = arith.constant 8 : index
    %c0_813 = arith.constant 0 : index
    %c0_814 = arith.constant 0 : index
    %758 = vector.load %arg1[%c4_811, %c8_812, %c0_813, %c0_814] : memref<8x16x1x128xf32, #tpu.memory_space<vmem>>, vector<1x1x1x128xf32>
    %759 = vector.shape_cast %758 : vector<1x1x1x128xf32> to vector<1x128xf32>
    %760 = arith.mulf %759, %455 : vector<1x128xf32>
    %761 = arith.addf %757, %760 : vector<1x128xf32>
    %c4_815 = arith.constant 4 : index
    %c9_816 = arith.constant 9 : index
    %c0_817 = arith.constant 0 : index
    %c0_818 = arith.constant 0 : index
    %762 = vector.load %arg1[%c4_815, %c9_816, %c0_817, %c0_818] : memref<8x16x1x128xf32, #tpu.memory_space<vmem>>, vector<1x1x1x128xf32>
    %763 = vector.shape_cast %762 : vector<1x1x1x128xf32> to vector<1x128xf32>
    %764 = arith.mulf %763, %456 : vector<1x128xf32>
    %765 = arith.addf %761, %764 : vector<1x128xf32>
    %c4_819 = arith.constant 4 : index
    %c10_820 = arith.constant 10 : index
    %c0_821 = arith.constant 0 : index
    %c0_822 = arith.constant 0 : index
    %766 = vector.load %arg1[%c4_819, %c10_820, %c0_821, %c0_822] : memref<8x16x1x128xf32, #tpu.memory_space<vmem>>, vector<1x1x1x128xf32>
    %767 = vector.shape_cast %766 : vector<1x1x1x128xf32> to vector<1x128xf32>
    %768 = arith.mulf %767, %457 : vector<1x128xf32>
    %769 = arith.addf %765, %768 : vector<1x128xf32>
    %c4_823 = arith.constant 4 : index
    %c11_824 = arith.constant 11 : index
    %c0_825 = arith.constant 0 : index
    %c0_826 = arith.constant 0 : index
    %770 = vector.load %arg1[%c4_823, %c11_824, %c0_825, %c0_826] : memref<8x16x1x128xf32, #tpu.memory_space<vmem>>, vector<1x1x1x128xf32>
    %771 = vector.shape_cast %770 : vector<1x1x1x128xf32> to vector<1x128xf32>
    %772 = arith.mulf %771, %458 : vector<1x128xf32>
    %773 = arith.addf %769, %772 : vector<1x128xf32>
    %c4_827 = arith.constant 4 : index
    %c12_828 = arith.constant 12 : index
    %c0_829 = arith.constant 0 : index
    %c0_830 = arith.constant 0 : index
    %774 = vector.load %arg1[%c4_827, %c12_828, %c0_829, %c0_830] : memref<8x16x1x128xf32, #tpu.memory_space<vmem>>, vector<1x1x1x128xf32>
    %775 = vector.shape_cast %774 : vector<1x1x1x128xf32> to vector<1x128xf32>
    %776 = arith.mulf %775, %459 : vector<1x128xf32>
    %777 = arith.addf %773, %776 : vector<1x128xf32>
    %c4_831 = arith.constant 4 : index
    %c13_832 = arith.constant 13 : index
    %c0_833 = arith.constant 0 : index
    %c0_834 = arith.constant 0 : index
    %778 = vector.load %arg1[%c4_831, %c13_832, %c0_833, %c0_834] : memref<8x16x1x128xf32, #tpu.memory_space<vmem>>, vector<1x1x1x128xf32>
    %779 = vector.shape_cast %778 : vector<1x1x1x128xf32> to vector<1x128xf32>
    %780 = arith.mulf %779, %460 : vector<1x128xf32>
    %781 = arith.addf %777, %780 : vector<1x128xf32>
    %c4_835 = arith.constant 4 : index
    %c14_836 = arith.constant 14 : index
    %c0_837 = arith.constant 0 : index
    %c0_838 = arith.constant 0 : index
    %782 = vector.load %arg1[%c4_835, %c14_836, %c0_837, %c0_838] : memref<8x16x1x128xf32, #tpu.memory_space<vmem>>, vector<1x1x1x128xf32>
    %783 = vector.shape_cast %782 : vector<1x1x1x128xf32> to vector<1x128xf32>
    %784 = arith.mulf %783, %461 : vector<1x128xf32>
    %785 = arith.addf %781, %784 : vector<1x128xf32>
    %c4_839 = arith.constant 4 : index
    %c15_840 = arith.constant 15 : index
    %c0_841 = arith.constant 0 : index
    %c0_842 = arith.constant 0 : index
    %786 = vector.load %arg1[%c4_839, %c15_840, %c0_841, %c0_842] : memref<8x16x1x128xf32, #tpu.memory_space<vmem>>, vector<1x1x1x128xf32>
    %787 = vector.shape_cast %786 : vector<1x1x1x128xf32> to vector<1x128xf32>
    %788 = arith.mulf %787, %462 : vector<1x128xf32>
    %789 = arith.addf %785, %788 : vector<1x128xf32>
    %790 = arith.addf %467, %789 : vector<1x128xf32>
    %c5_843 = arith.constant 5 : index
    %c0_844 = arith.constant 0 : index
    %c0_845 = arith.constant 0 : index
    %c0_846 = arith.constant 0 : index
    %791 = vector.load %arg1[%c5_843, %c0_844, %c0_845, %c0_846] : memref<8x16x1x128xf32, #tpu.memory_space<vmem>>, vector<1x1x1x128xf32>
    %792 = vector.shape_cast %791 : vector<1x1x1x128xf32> to vector<1x128xf32>
    %793 = arith.mulf %792, %447 : vector<1x128xf32>
    %c5_847 = arith.constant 5 : index
    %c1_848 = arith.constant 1 : index
    %c0_849 = arith.constant 0 : index
    %c0_850 = arith.constant 0 : index
    %794 = vector.load %arg1[%c5_847, %c1_848, %c0_849, %c0_850] : memref<8x16x1x128xf32, #tpu.memory_space<vmem>>, vector<1x1x1x128xf32>
    %795 = vector.shape_cast %794 : vector<1x1x1x128xf32> to vector<1x128xf32>
    %796 = arith.mulf %795, %448 : vector<1x128xf32>
    %797 = arith.addf %793, %796 : vector<1x128xf32>
    %c5_851 = arith.constant 5 : index
    %c2_852 = arith.constant 2 : index
    %c0_853 = arith.constant 0 : index
    %c0_854 = arith.constant 0 : index
    %798 = vector.load %arg1[%c5_851, %c2_852, %c0_853, %c0_854] : memref<8x16x1x128xf32, #tpu.memory_space<vmem>>, vector<1x1x1x128xf32>
    %799 = vector.shape_cast %798 : vector<1x1x1x128xf32> to vector<1x128xf32>
    %800 = arith.mulf %799, %449 : vector<1x128xf32>
    %801 = arith.addf %797, %800 : vector<1x128xf32>
    %c5_855 = arith.constant 5 : index
    %c3_856 = arith.constant 3 : index
    %c0_857 = arith.constant 0 : index
    %c0_858 = arith.constant 0 : index
    %802 = vector.load %arg1[%c5_855, %c3_856, %c0_857, %c0_858] : memref<8x16x1x128xf32, #tpu.memory_space<vmem>>, vector<1x1x1x128xf32>
    %803 = vector.shape_cast %802 : vector<1x1x1x128xf32> to vector<1x128xf32>
    %804 = arith.mulf %803, %450 : vector<1x128xf32>
    %805 = arith.addf %801, %804 : vector<1x128xf32>
    %c5_859 = arith.constant 5 : index
    %c4_860 = arith.constant 4 : index
    %c0_861 = arith.constant 0 : index
    %c0_862 = arith.constant 0 : index
    %806 = vector.load %arg1[%c5_859, %c4_860, %c0_861, %c0_862] : memref<8x16x1x128xf32, #tpu.memory_space<vmem>>, vector<1x1x1x128xf32>
    %807 = vector.shape_cast %806 : vector<1x1x1x128xf32> to vector<1x128xf32>
    %808 = arith.mulf %807, %451 : vector<1x128xf32>
    %809 = arith.addf %805, %808 : vector<1x128xf32>
    %c5_863 = arith.constant 5 : index
    %c5_864 = arith.constant 5 : index
    %c0_865 = arith.constant 0 : index
    %c0_866 = arith.constant 0 : index
    %810 = vector.load %arg1[%c5_863, %c5_864, %c0_865, %c0_866] : memref<8x16x1x128xf32, #tpu.memory_space<vmem>>, vector<1x1x1x128xf32>
    %811 = vector.shape_cast %810 : vector<1x1x1x128xf32> to vector<1x128xf32>
    %812 = arith.mulf %811, %452 : vector<1x128xf32>
    %813 = arith.addf %809, %812 : vector<1x128xf32>
    %c5_867 = arith.constant 5 : index
    %c6_868 = arith.constant 6 : index
    %c0_869 = arith.constant 0 : index
    %c0_870 = arith.constant 0 : index
    %814 = vector.load %arg1[%c5_867, %c6_868, %c0_869, %c0_870] : memref<8x16x1x128xf32, #tpu.memory_space<vmem>>, vector<1x1x1x128xf32>
    %815 = vector.shape_cast %814 : vector<1x1x1x128xf32> to vector<1x128xf32>
    %816 = arith.mulf %815, %453 : vector<1x128xf32>
    %817 = arith.addf %813, %816 : vector<1x128xf32>
    %c5_871 = arith.constant 5 : index
    %c7_872 = arith.constant 7 : index
    %c0_873 = arith.constant 0 : index
    %c0_874 = arith.constant 0 : index
    %818 = vector.load %arg1[%c5_871, %c7_872, %c0_873, %c0_874] : memref<8x16x1x128xf32, #tpu.memory_space<vmem>>, vector<1x1x1x128xf32>
    %819 = vector.shape_cast %818 : vector<1x1x1x128xf32> to vector<1x128xf32>
    %820 = arith.mulf %819, %454 : vector<1x128xf32>
    %821 = arith.addf %817, %820 : vector<1x128xf32>
    %c5_875 = arith.constant 5 : index
    %c8_876 = arith.constant 8 : index
    %c0_877 = arith.constant 0 : index
    %c0_878 = arith.constant 0 : index
    %822 = vector.load %arg1[%c5_875, %c8_876, %c0_877, %c0_878] : memref<8x16x1x128xf32, #tpu.memory_space<vmem>>, vector<1x1x1x128xf32>
    %823 = vector.shape_cast %822 : vector<1x1x1x128xf32> to vector<1x128xf32>
    %824 = arith.mulf %823, %455 : vector<1x128xf32>
    %825 = arith.addf %821, %824 : vector<1x128xf32>
    %c5_879 = arith.constant 5 : index
    %c9_880 = arith.constant 9 : index
    %c0_881 = arith.constant 0 : index
    %c0_882 = arith.constant 0 : index
    %826 = vector.load %arg1[%c5_879, %c9_880, %c0_881, %c0_882] : memref<8x16x1x128xf32, #tpu.memory_space<vmem>>, vector<1x1x1x128xf32>
    %827 = vector.shape_cast %826 : vector<1x1x1x128xf32> to vector<1x128xf32>
    %828 = arith.mulf %827, %456 : vector<1x128xf32>
    %829 = arith.addf %825, %828 : vector<1x128xf32>
    %c5_883 = arith.constant 5 : index
    %c10_884 = arith.constant 10 : index
    %c0_885 = arith.constant 0 : index
    %c0_886 = arith.constant 0 : index
    %830 = vector.load %arg1[%c5_883, %c10_884, %c0_885, %c0_886] : memref<8x16x1x128xf32, #tpu.memory_space<vmem>>, vector<1x1x1x128xf32>
    %831 = vector.shape_cast %830 : vector<1x1x1x128xf32> to vector<1x128xf32>
    %832 = arith.mulf %831, %457 : vector<1x128xf32>
    %833 = arith.addf %829, %832 : vector<1x128xf32>
    %c5_887 = arith.constant 5 : index
    %c11_888 = arith.constant 11 : index
    %c0_889 = arith.constant 0 : index
    %c0_890 = arith.constant 0 : index
    %834 = vector.load %arg1[%c5_887, %c11_888, %c0_889, %c0_890] : memref<8x16x1x128xf32, #tpu.memory_space<vmem>>, vector<1x1x1x128xf32>
    %835 = vector.shape_cast %834 : vector<1x1x1x128xf32> to vector<1x128xf32>
    %836 = arith.mulf %835, %458 : vector<1x128xf32>
    %837 = arith.addf %833, %836 : vector<1x128xf32>
    %c5_891 = arith.constant 5 : index
    %c12_892 = arith.constant 12 : index
    %c0_893 = arith.constant 0 : index
    %c0_894 = arith.constant 0 : index
    %838 = vector.load %arg1[%c5_891, %c12_892, %c0_893, %c0_894] : memref<8x16x1x128xf32, #tpu.memory_space<vmem>>, vector<1x1x1x128xf32>
    %839 = vector.shape_cast %838 : vector<1x1x1x128xf32> to vector<1x128xf32>
    %840 = arith.mulf %839, %459 : vector<1x128xf32>
    %841 = arith.addf %837, %840 : vector<1x128xf32>
    %c5_895 = arith.constant 5 : index
    %c13_896 = arith.constant 13 : index
    %c0_897 = arith.constant 0 : index
    %c0_898 = arith.constant 0 : index
    %842 = vector.load %arg1[%c5_895, %c13_896, %c0_897, %c0_898] : memref<8x16x1x128xf32, #tpu.memory_space<vmem>>, vector<1x1x1x128xf32>
    %843 = vector.shape_cast %842 : vector<1x1x1x128xf32> to vector<1x128xf32>
    %844 = arith.mulf %843, %460 : vector<1x128xf32>
    %845 = arith.addf %841, %844 : vector<1x128xf32>
    %c5_899 = arith.constant 5 : index
    %c14_900 = arith.constant 14 : index
    %c0_901 = arith.constant 0 : index
    %c0_902 = arith.constant 0 : index
    %846 = vector.load %arg1[%c5_899, %c14_900, %c0_901, %c0_902] : memref<8x16x1x128xf32, #tpu.memory_space<vmem>>, vector<1x1x1x128xf32>
    %847 = vector.shape_cast %846 : vector<1x1x1x128xf32> to vector<1x128xf32>
    %848 = arith.mulf %847, %461 : vector<1x128xf32>
    %849 = arith.addf %845, %848 : vector<1x128xf32>
    %c5_903 = arith.constant 5 : index
    %c15_904 = arith.constant 15 : index
    %c0_905 = arith.constant 0 : index
    %c0_906 = arith.constant 0 : index
    %850 = vector.load %arg1[%c5_903, %c15_904, %c0_905, %c0_906] : memref<8x16x1x128xf32, #tpu.memory_space<vmem>>, vector<1x1x1x128xf32>
    %851 = vector.shape_cast %850 : vector<1x1x1x128xf32> to vector<1x128xf32>
    %852 = arith.mulf %851, %462 : vector<1x128xf32>
    %853 = arith.addf %849, %852 : vector<1x128xf32>
    %854 = arith.addf %468, %853 : vector<1x128xf32>
    %c6_907 = arith.constant 6 : index
    %c0_908 = arith.constant 0 : index
    %c0_909 = arith.constant 0 : index
    %c0_910 = arith.constant 0 : index
    %855 = vector.load %arg1[%c6_907, %c0_908, %c0_909, %c0_910] : memref<8x16x1x128xf32, #tpu.memory_space<vmem>>, vector<1x1x1x128xf32>
    %856 = vector.shape_cast %855 : vector<1x1x1x128xf32> to vector<1x128xf32>
    %857 = arith.mulf %856, %447 : vector<1x128xf32>
    %c6_911 = arith.constant 6 : index
    %c1_912 = arith.constant 1 : index
    %c0_913 = arith.constant 0 : index
    %c0_914 = arith.constant 0 : index
    %858 = vector.load %arg1[%c6_911, %c1_912, %c0_913, %c0_914] : memref<8x16x1x128xf32, #tpu.memory_space<vmem>>, vector<1x1x1x128xf32>
    %859 = vector.shape_cast %858 : vector<1x1x1x128xf32> to vector<1x128xf32>
    %860 = arith.mulf %859, %448 : vector<1x128xf32>
    %861 = arith.addf %857, %860 : vector<1x128xf32>
    %c6_915 = arith.constant 6 : index
    %c2_916 = arith.constant 2 : index
    %c0_917 = arith.constant 0 : index
    %c0_918 = arith.constant 0 : index
    %862 = vector.load %arg1[%c6_915, %c2_916, %c0_917, %c0_918] : memref<8x16x1x128xf32, #tpu.memory_space<vmem>>, vector<1x1x1x128xf32>
    %863 = vector.shape_cast %862 : vector<1x1x1x128xf32> to vector<1x128xf32>
    %864 = arith.mulf %863, %449 : vector<1x128xf32>
    %865 = arith.addf %861, %864 : vector<1x128xf32>
    %c6_919 = arith.constant 6 : index
    %c3_920 = arith.constant 3 : index
    %c0_921 = arith.constant 0 : index
    %c0_922 = arith.constant 0 : index
    %866 = vector.load %arg1[%c6_919, %c3_920, %c0_921, %c0_922] : memref<8x16x1x128xf32, #tpu.memory_space<vmem>>, vector<1x1x1x128xf32>
    %867 = vector.shape_cast %866 : vector<1x1x1x128xf32> to vector<1x128xf32>
    %868 = arith.mulf %867, %450 : vector<1x128xf32>
    %869 = arith.addf %865, %868 : vector<1x128xf32>
    %c6_923 = arith.constant 6 : index
    %c4_924 = arith.constant 4 : index
    %c0_925 = arith.constant 0 : index
    %c0_926 = arith.constant 0 : index
    %870 = vector.load %arg1[%c6_923, %c4_924, %c0_925, %c0_926] : memref<8x16x1x128xf32, #tpu.memory_space<vmem>>, vector<1x1x1x128xf32>
    %871 = vector.shape_cast %870 : vector<1x1x1x128xf32> to vector<1x128xf32>
    %872 = arith.mulf %871, %451 : vector<1x128xf32>
    %873 = arith.addf %869, %872 : vector<1x128xf32>
    %c6_927 = arith.constant 6 : index
    %c5_928 = arith.constant 5 : index
    %c0_929 = arith.constant 0 : index
    %c0_930 = arith.constant 0 : index
    %874 = vector.load %arg1[%c6_927, %c5_928, %c0_929, %c0_930] : memref<8x16x1x128xf32, #tpu.memory_space<vmem>>, vector<1x1x1x128xf32>
    %875 = vector.shape_cast %874 : vector<1x1x1x128xf32> to vector<1x128xf32>
    %876 = arith.mulf %875, %452 : vector<1x128xf32>
    %877 = arith.addf %873, %876 : vector<1x128xf32>
    %c6_931 = arith.constant 6 : index
    %c6_932 = arith.constant 6 : index
    %c0_933 = arith.constant 0 : index
    %c0_934 = arith.constant 0 : index
    %878 = vector.load %arg1[%c6_931, %c6_932, %c0_933, %c0_934] : memref<8x16x1x128xf32, #tpu.memory_space<vmem>>, vector<1x1x1x128xf32>
    %879 = vector.shape_cast %878 : vector<1x1x1x128xf32> to vector<1x128xf32>
    %880 = arith.mulf %879, %453 : vector<1x128xf32>
    %881 = arith.addf %877, %880 : vector<1x128xf32>
    %c6_935 = arith.constant 6 : index
    %c7_936 = arith.constant 7 : index
    %c0_937 = arith.constant 0 : index
    %c0_938 = arith.constant 0 : index
    %882 = vector.load %arg1[%c6_935, %c7_936, %c0_937, %c0_938] : memref<8x16x1x128xf32, #tpu.memory_space<vmem>>, vector<1x1x1x128xf32>
    %883 = vector.shape_cast %882 : vector<1x1x1x128xf32> to vector<1x128xf32>
    %884 = arith.mulf %883, %454 : vector<1x128xf32>
    %885 = arith.addf %881, %884 : vector<1x128xf32>
    %c6_939 = arith.constant 6 : index
    %c8_940 = arith.constant 8 : index
    %c0_941 = arith.constant 0 : index
    %c0_942 = arith.constant 0 : index
    %886 = vector.load %arg1[%c6_939, %c8_940, %c0_941, %c0_942] : memref<8x16x1x128xf32, #tpu.memory_space<vmem>>, vector<1x1x1x128xf32>
    %887 = vector.shape_cast %886 : vector<1x1x1x128xf32> to vector<1x128xf32>
    %888 = arith.mulf %887, %455 : vector<1x128xf32>
    %889 = arith.addf %885, %888 : vector<1x128xf32>
    %c6_943 = arith.constant 6 : index
    %c9_944 = arith.constant 9 : index
    %c0_945 = arith.constant 0 : index
    %c0_946 = arith.constant 0 : index
    %890 = vector.load %arg1[%c6_943, %c9_944, %c0_945, %c0_946] : memref<8x16x1x128xf32, #tpu.memory_space<vmem>>, vector<1x1x1x128xf32>
    %891 = vector.shape_cast %890 : vector<1x1x1x128xf32> to vector<1x128xf32>
    %892 = arith.mulf %891, %456 : vector<1x128xf32>
    %893 = arith.addf %889, %892 : vector<1x128xf32>
    %c6_947 = arith.constant 6 : index
    %c10_948 = arith.constant 10 : index
    %c0_949 = arith.constant 0 : index
    %c0_950 = arith.constant 0 : index
    %894 = vector.load %arg1[%c6_947, %c10_948, %c0_949, %c0_950] : memref<8x16x1x128xf32, #tpu.memory_space<vmem>>, vector<1x1x1x128xf32>
    %895 = vector.shape_cast %894 : vector<1x1x1x128xf32> to vector<1x128xf32>
    %896 = arith.mulf %895, %457 : vector<1x128xf32>
    %897 = arith.addf %893, %896 : vector<1x128xf32>
    %c6_951 = arith.constant 6 : index
    %c11_952 = arith.constant 11 : index
    %c0_953 = arith.constant 0 : index
    %c0_954 = arith.constant 0 : index
    %898 = vector.load %arg1[%c6_951, %c11_952, %c0_953, %c0_954] : memref<8x16x1x128xf32, #tpu.memory_space<vmem>>, vector<1x1x1x128xf32>
    %899 = vector.shape_cast %898 : vector<1x1x1x128xf32> to vector<1x128xf32>
    %900 = arith.mulf %899, %458 : vector<1x128xf32>
    %901 = arith.addf %897, %900 : vector<1x128xf32>
    %c6_955 = arith.constant 6 : index
    %c12_956 = arith.constant 12 : index
    %c0_957 = arith.constant 0 : index
    %c0_958 = arith.constant 0 : index
    %902 = vector.load %arg1[%c6_955, %c12_956, %c0_957, %c0_958] : memref<8x16x1x128xf32, #tpu.memory_space<vmem>>, vector<1x1x1x128xf32>
    %903 = vector.shape_cast %902 : vector<1x1x1x128xf32> to vector<1x128xf32>
    %904 = arith.mulf %903, %459 : vector<1x128xf32>
    %905 = arith.addf %901, %904 : vector<1x128xf32>
    %c6_959 = arith.constant 6 : index
    %c13_960 = arith.constant 13 : index
    %c0_961 = arith.constant 0 : index
    %c0_962 = arith.constant 0 : index
    %906 = vector.load %arg1[%c6_959, %c13_960, %c0_961, %c0_962] : memref<8x16x1x128xf32, #tpu.memory_space<vmem>>, vector<1x1x1x128xf32>
    %907 = vector.shape_cast %906 : vector<1x1x1x128xf32> to vector<1x128xf32>
    %908 = arith.mulf %907, %460 : vector<1x128xf32>
    %909 = arith.addf %905, %908 : vector<1x128xf32>
    %c6_963 = arith.constant 6 : index
    %c14_964 = arith.constant 14 : index
    %c0_965 = arith.constant 0 : index
    %c0_966 = arith.constant 0 : index
    %910 = vector.load %arg1[%c6_963, %c14_964, %c0_965, %c0_966] : memref<8x16x1x128xf32, #tpu.memory_space<vmem>>, vector<1x1x1x128xf32>
    %911 = vector.shape_cast %910 : vector<1x1x1x128xf32> to vector<1x128xf32>
    %912 = arith.mulf %911, %461 : vector<1x128xf32>
    %913 = arith.addf %909, %912 : vector<1x128xf32>
    %c6_967 = arith.constant 6 : index
    %c15_968 = arith.constant 15 : index
    %c0_969 = arith.constant 0 : index
    %c0_970 = arith.constant 0 : index
    %914 = vector.load %arg1[%c6_967, %c15_968, %c0_969, %c0_970] : memref<8x16x1x128xf32, #tpu.memory_space<vmem>>, vector<1x1x1x128xf32>
    %915 = vector.shape_cast %914 : vector<1x1x1x128xf32> to vector<1x128xf32>
    %916 = arith.mulf %915, %462 : vector<1x128xf32>
    %917 = arith.addf %913, %916 : vector<1x128xf32>
    %918 = arith.addf %469, %917 : vector<1x128xf32>
    %c7_971 = arith.constant 7 : index
    %c0_972 = arith.constant 0 : index
    %c0_973 = arith.constant 0 : index
    %c0_974 = arith.constant 0 : index
    %919 = vector.load %arg1[%c7_971, %c0_972, %c0_973, %c0_974] : memref<8x16x1x128xf32, #tpu.memory_space<vmem>>, vector<1x1x1x128xf32>
    %920 = vector.shape_cast %919 : vector<1x1x1x128xf32> to vector<1x128xf32>
    %921 = arith.mulf %920, %447 : vector<1x128xf32>
    %c7_975 = arith.constant 7 : index
    %c1_976 = arith.constant 1 : index
    %c0_977 = arith.constant 0 : index
    %c0_978 = arith.constant 0 : index
    %922 = vector.load %arg1[%c7_975, %c1_976, %c0_977, %c0_978] : memref<8x16x1x128xf32, #tpu.memory_space<vmem>>, vector<1x1x1x128xf32>
    %923 = vector.shape_cast %922 : vector<1x1x1x128xf32> to vector<1x128xf32>
    %924 = arith.mulf %923, %448 : vector<1x128xf32>
    %925 = arith.addf %921, %924 : vector<1x128xf32>
    %c7_979 = arith.constant 7 : index
    %c2_980 = arith.constant 2 : index
    %c0_981 = arith.constant 0 : index
    %c0_982 = arith.constant 0 : index
    %926 = vector.load %arg1[%c7_979, %c2_980, %c0_981, %c0_982] : memref<8x16x1x128xf32, #tpu.memory_space<vmem>>, vector<1x1x1x128xf32>
    %927 = vector.shape_cast %926 : vector<1x1x1x128xf32> to vector<1x128xf32>
    %928 = arith.mulf %927, %449 : vector<1x128xf32>
    %929 = arith.addf %925, %928 : vector<1x128xf32>
    %c7_983 = arith.constant 7 : index
    %c3_984 = arith.constant 3 : index
    %c0_985 = arith.constant 0 : index
    %c0_986 = arith.constant 0 : index
    %930 = vector.load %arg1[%c7_983, %c3_984, %c0_985, %c0_986] : memref<8x16x1x128xf32, #tpu.memory_space<vmem>>, vector<1x1x1x128xf32>
    %931 = vector.shape_cast %930 : vector<1x1x1x128xf32> to vector<1x128xf32>
    %932 = arith.mulf %931, %450 : vector<1x128xf32>
    %933 = arith.addf %929, %932 : vector<1x128xf32>
    %c7_987 = arith.constant 7 : index
    %c4_988 = arith.constant 4 : index
    %c0_989 = arith.constant 0 : index
    %c0_990 = arith.constant 0 : index
    %934 = vector.load %arg1[%c7_987, %c4_988, %c0_989, %c0_990] : memref<8x16x1x128xf32, #tpu.memory_space<vmem>>, vector<1x1x1x128xf32>
    %935 = vector.shape_cast %934 : vector<1x1x1x128xf32> to vector<1x128xf32>
    %936 = arith.mulf %935, %451 : vector<1x128xf32>
    %937 = arith.addf %933, %936 : vector<1x128xf32>
    %c7_991 = arith.constant 7 : index
    %c5_992 = arith.constant 5 : index
    %c0_993 = arith.constant 0 : index
    %c0_994 = arith.constant 0 : index
    %938 = vector.load %arg1[%c7_991, %c5_992, %c0_993, %c0_994] : memref<8x16x1x128xf32, #tpu.memory_space<vmem>>, vector<1x1x1x128xf32>
    %939 = vector.shape_cast %938 : vector<1x1x1x128xf32> to vector<1x128xf32>
    %940 = arith.mulf %939, %452 : vector<1x128xf32>
    %941 = arith.addf %937, %940 : vector<1x128xf32>
    %c7_995 = arith.constant 7 : index
    %c6_996 = arith.constant 6 : index
    %c0_997 = arith.constant 0 : index
    %c0_998 = arith.constant 0 : index
    %942 = vector.load %arg1[%c7_995, %c6_996, %c0_997, %c0_998] : memref<8x16x1x128xf32, #tpu.memory_space<vmem>>, vector<1x1x1x128xf32>
    %943 = vector.shape_cast %942 : vector<1x1x1x128xf32> to vector<1x128xf32>
    %944 = arith.mulf %943, %453 : vector<1x128xf32>
    %945 = arith.addf %941, %944 : vector<1x128xf32>
    %c7_999 = arith.constant 7 : index
    %c7_1000 = arith.constant 7 : index
    %c0_1001 = arith.constant 0 : index
    %c0_1002 = arith.constant 0 : index
    %946 = vector.load %arg1[%c7_999, %c7_1000, %c0_1001, %c0_1002] : memref<8x16x1x128xf32, #tpu.memory_space<vmem>>, vector<1x1x1x128xf32>
    %947 = vector.shape_cast %946 : vector<1x1x1x128xf32> to vector<1x128xf32>
    %948 = arith.mulf %947, %454 : vector<1x128xf32>
    %949 = arith.addf %945, %948 : vector<1x128xf32>
    %c7_1003 = arith.constant 7 : index
    %c8_1004 = arith.constant 8 : index
    %c0_1005 = arith.constant 0 : index
    %c0_1006 = arith.constant 0 : index
    %950 = vector.load %arg1[%c7_1003, %c8_1004, %c0_1005, %c0_1006] : memref<8x16x1x128xf32, #tpu.memory_space<vmem>>, vector<1x1x1x128xf32>
    %951 = vector.shape_cast %950 : vector<1x1x1x128xf32> to vector<1x128xf32>
    %952 = arith.mulf %951, %455 : vector<1x128xf32>
    %953 = arith.addf %949, %952 : vector<1x128xf32>
    %c7_1007 = arith.constant 7 : index
    %c9_1008 = arith.constant 9 : index
    %c0_1009 = arith.constant 0 : index
    %c0_1010 = arith.constant 0 : index
    %954 = vector.load %arg1[%c7_1007, %c9_1008, %c0_1009, %c0_1010] : memref<8x16x1x128xf32, #tpu.memory_space<vmem>>, vector<1x1x1x128xf32>
    %955 = vector.shape_cast %954 : vector<1x1x1x128xf32> to vector<1x128xf32>
    %956 = arith.mulf %955, %456 : vector<1x128xf32>
    %957 = arith.addf %953, %956 : vector<1x128xf32>
    %c7_1011 = arith.constant 7 : index
    %c10_1012 = arith.constant 10 : index
    %c0_1013 = arith.constant 0 : index
    %c0_1014 = arith.constant 0 : index
    %958 = vector.load %arg1[%c7_1011, %c10_1012, %c0_1013, %c0_1014] : memref<8x16x1x128xf32, #tpu.memory_space<vmem>>, vector<1x1x1x128xf32>
    %959 = vector.shape_cast %958 : vector<1x1x1x128xf32> to vector<1x128xf32>
    %960 = arith.mulf %959, %457 : vector<1x128xf32>
    %961 = arith.addf %957, %960 : vector<1x128xf32>
    %c7_1015 = arith.constant 7 : index
    %c11_1016 = arith.constant 11 : index
    %c0_1017 = arith.constant 0 : index
    %c0_1018 = arith.constant 0 : index
    %962 = vector.load %arg1[%c7_1015, %c11_1016, %c0_1017, %c0_1018] : memref<8x16x1x128xf32, #tpu.memory_space<vmem>>, vector<1x1x1x128xf32>
    %963 = vector.shape_cast %962 : vector<1x1x1x128xf32> to vector<1x128xf32>
    %964 = arith.mulf %963, %458 : vector<1x128xf32>
    %965 = arith.addf %961, %964 : vector<1x128xf32>
    %c7_1019 = arith.constant 7 : index
    %c12_1020 = arith.constant 12 : index
    %c0_1021 = arith.constant 0 : index
    %c0_1022 = arith.constant 0 : index
    %966 = vector.load %arg1[%c7_1019, %c12_1020, %c0_1021, %c0_1022] : memref<8x16x1x128xf32, #tpu.memory_space<vmem>>, vector<1x1x1x128xf32>
    %967 = vector.shape_cast %966 : vector<1x1x1x128xf32> to vector<1x128xf32>
    %968 = arith.mulf %967, %459 : vector<1x128xf32>
    %969 = arith.addf %965, %968 : vector<1x128xf32>
    %c7_1023 = arith.constant 7 : index
    %c13_1024 = arith.constant 13 : index
    %c0_1025 = arith.constant 0 : index
    %c0_1026 = arith.constant 0 : index
    %970 = vector.load %arg1[%c7_1023, %c13_1024, %c0_1025, %c0_1026] : memref<8x16x1x128xf32, #tpu.memory_space<vmem>>, vector<1x1x1x128xf32>
    %971 = vector.shape_cast %970 : vector<1x1x1x128xf32> to vector<1x128xf32>
    %972 = arith.mulf %971, %460 : vector<1x128xf32>
    %973 = arith.addf %969, %972 : vector<1x128xf32>
    %c7_1027 = arith.constant 7 : index
    %c14_1028 = arith.constant 14 : index
    %c0_1029 = arith.constant 0 : index
    %c0_1030 = arith.constant 0 : index
    %974 = vector.load %arg1[%c7_1027, %c14_1028, %c0_1029, %c0_1030] : memref<8x16x1x128xf32, #tpu.memory_space<vmem>>, vector<1x1x1x128xf32>
    %975 = vector.shape_cast %974 : vector<1x1x1x128xf32> to vector<1x128xf32>
    %976 = arith.mulf %975, %461 : vector<1x128xf32>
    %977 = arith.addf %973, %976 : vector<1x128xf32>
    %c7_1031 = arith.constant 7 : index
    %c15_1032 = arith.constant 15 : index
    %c0_1033 = arith.constant 0 : index
    %c0_1034 = arith.constant 0 : index
    %978 = vector.load %arg1[%c7_1031, %c15_1032, %c0_1033, %c0_1034] : memref<8x16x1x128xf32, #tpu.memory_space<vmem>>, vector<1x1x1x128xf32>
    %979 = vector.shape_cast %978 : vector<1x1x1x128xf32> to vector<1x128xf32>
    %980 = arith.mulf %979, %462 : vector<1x128xf32>
    %981 = arith.addf %977, %980 : vector<1x128xf32>
    %982 = arith.addf %470, %981 : vector<1x128xf32>
    %983 = arith.maximumf %534, %598 : vector<1x128xf32>
    %984 = arith.maximumf %983, %662 : vector<1x128xf32>
    %985 = arith.maximumf %984, %726 : vector<1x128xf32>
    %986 = arith.maximumf %985, %790 : vector<1x128xf32>
    %987 = arith.maximumf %986, %854 : vector<1x128xf32>
    %988 = arith.maximumf %987, %918 : vector<1x128xf32>
    %989 = arith.maximumf %988, %982 : vector<1x128xf32>
    %990 = arith.subf %534, %989 : vector<1x128xf32>
    %991 = math.exp %990 : vector<1x128xf32>
    %992 = arith.subf %598, %989 : vector<1x128xf32>
    %993 = math.exp %992 : vector<1x128xf32>
    %994 = arith.subf %662, %989 : vector<1x128xf32>
    %995 = math.exp %994 : vector<1x128xf32>
    %996 = arith.subf %726, %989 : vector<1x128xf32>
    %997 = math.exp %996 : vector<1x128xf32>
    %998 = arith.subf %790, %989 : vector<1x128xf32>
    %999 = math.exp %998 : vector<1x128xf32>
    %1000 = arith.subf %854, %989 : vector<1x128xf32>
    %1001 = math.exp %1000 : vector<1x128xf32>
    %1002 = arith.subf %918, %989 : vector<1x128xf32>
    %1003 = math.exp %1002 : vector<1x128xf32>
    %1004 = arith.subf %982, %989 : vector<1x128xf32>
    %1005 = math.exp %1004 : vector<1x128xf32>
    %1006 = arith.addf %991, %993 : vector<1x128xf32>
    %1007 = arith.addf %1006, %995 : vector<1x128xf32>
    %1008 = arith.addf %1007, %997 : vector<1x128xf32>
    %1009 = arith.addf %1008, %999 : vector<1x128xf32>
    %1010 = arith.addf %1009, %1001 : vector<1x128xf32>
    %1011 = arith.addf %1010, %1003 : vector<1x128xf32>
    %1012 = arith.addf %1011, %1005 : vector<1x128xf32>
    %1013 = tpu.reciprocal %1012 {approx = true} : vector<1x128xf32> -> vector<1x128xf32>
    %1014 = arith.mulf %1012, %1013 : vector<1x128xf32>
    %cst_1035 = arith.constant 2.000000e+00 : f32
    %1015 = vector.broadcast %cst_1035 : f32 to vector<1x128xf32>
    %1016 = arith.subf %1015, %1014 : vector<1x128xf32>
    %1017 = arith.mulf %1013, %1016 : vector<1x128xf32>
    %1018 = arith.mulf %991, %1017 : vector<1x128xf32>
    %1019 = arith.mulf %993, %1017 : vector<1x128xf32>
    %1020 = arith.mulf %995, %1017 : vector<1x128xf32>
    %1021 = arith.mulf %997, %1017 : vector<1x128xf32>
    %1022 = arith.mulf %999, %1017 : vector<1x128xf32>
    %1023 = arith.mulf %1001, %1017 : vector<1x128xf32>
    %1024 = arith.mulf %1003, %1017 : vector<1x128xf32>
    %1025 = arith.mulf %1005, %1017 : vector<1x128xf32>
    %c0_1036 = arith.constant 0 : index
    %c0_1037 = arith.constant 0 : index
    %c0_1038 = arith.constant 0 : index
    %c0_1039 = arith.constant 0 : index
    %1026 = vector.load %arg1[%c0_1036, %c0_1037, %c0_1038, %c0_1039] : memref<8x16x1x128xf32, #tpu.memory_space<vmem>>, vector<1x1x1x128xf32>
    %1027 = vector.shape_cast %1026 : vector<1x1x1x128xf32> to vector<1x128xf32>
    %1028 = arith.mulf %1018, %1027 : vector<1x128xf32>
    %c0_1040 = arith.constant 0 : index
    %c1_1041 = arith.constant 1 : index
    %c0_1042 = arith.constant 0 : index
    %c0_1043 = arith.constant 0 : index
    %1029 = vector.load %arg1[%c0_1040, %c1_1041, %c0_1042, %c0_1043] : memref<8x16x1x128xf32, #tpu.memory_space<vmem>>, vector<1x1x1x128xf32>
    %1030 = vector.shape_cast %1029 : vector<1x1x1x128xf32> to vector<1x128xf32>
    %1031 = arith.mulf %1018, %1030 : vector<1x128xf32>
    %c0_1044 = arith.constant 0 : index
    %c2_1045 = arith.constant 2 : index
    %c0_1046 = arith.constant 0 : index
    %c0_1047 = arith.constant 0 : index
    %1032 = vector.load %arg1[%c0_1044, %c2_1045, %c0_1046, %c0_1047] : memref<8x16x1x128xf32, #tpu.memory_space<vmem>>, vector<1x1x1x128xf32>
    %1033 = vector.shape_cast %1032 : vector<1x1x1x128xf32> to vector<1x128xf32>
    %1034 = arith.mulf %1018, %1033 : vector<1x128xf32>
    %c0_1048 = arith.constant 0 : index
    %c3_1049 = arith.constant 3 : index
    %c0_1050 = arith.constant 0 : index
    %c0_1051 = arith.constant 0 : index
    %1035 = vector.load %arg1[%c0_1048, %c3_1049, %c0_1050, %c0_1051] : memref<8x16x1x128xf32, #tpu.memory_space<vmem>>, vector<1x1x1x128xf32>
    %1036 = vector.shape_cast %1035 : vector<1x1x1x128xf32> to vector<1x128xf32>
    %1037 = arith.mulf %1018, %1036 : vector<1x128xf32>
    %c0_1052 = arith.constant 0 : index
    %c4_1053 = arith.constant 4 : index
    %c0_1054 = arith.constant 0 : index
    %c0_1055 = arith.constant 0 : index
    %1038 = vector.load %arg1[%c0_1052, %c4_1053, %c0_1054, %c0_1055] : memref<8x16x1x128xf32, #tpu.memory_space<vmem>>, vector<1x1x1x128xf32>
    %1039 = vector.shape_cast %1038 : vector<1x1x1x128xf32> to vector<1x128xf32>
    %1040 = arith.mulf %1018, %1039 : vector<1x128xf32>
    %c0_1056 = arith.constant 0 : index
    %c5_1057 = arith.constant 5 : index
    %c0_1058 = arith.constant 0 : index
    %c0_1059 = arith.constant 0 : index
    %1041 = vector.load %arg1[%c0_1056, %c5_1057, %c0_1058, %c0_1059] : memref<8x16x1x128xf32, #tpu.memory_space<vmem>>, vector<1x1x1x128xf32>
    %1042 = vector.shape_cast %1041 : vector<1x1x1x128xf32> to vector<1x128xf32>
    %1043 = arith.mulf %1018, %1042 : vector<1x128xf32>
    %c0_1060 = arith.constant 0 : index
    %c6_1061 = arith.constant 6 : index
    %c0_1062 = arith.constant 0 : index
    %c0_1063 = arith.constant 0 : index
    %1044 = vector.load %arg1[%c0_1060, %c6_1061, %c0_1062, %c0_1063] : memref<8x16x1x128xf32, #tpu.memory_space<vmem>>, vector<1x1x1x128xf32>
    %1045 = vector.shape_cast %1044 : vector<1x1x1x128xf32> to vector<1x128xf32>
    %1046 = arith.mulf %1018, %1045 : vector<1x128xf32>
    %c0_1064 = arith.constant 0 : index
    %c7_1065 = arith.constant 7 : index
    %c0_1066 = arith.constant 0 : index
    %c0_1067 = arith.constant 0 : index
    %1047 = vector.load %arg1[%c0_1064, %c7_1065, %c0_1066, %c0_1067] : memref<8x16x1x128xf32, #tpu.memory_space<vmem>>, vector<1x1x1x128xf32>
    %1048 = vector.shape_cast %1047 : vector<1x1x1x128xf32> to vector<1x128xf32>
    %1049 = arith.mulf %1018, %1048 : vector<1x128xf32>
    %c0_1068 = arith.constant 0 : index
    %c8_1069 = arith.constant 8 : index
    %c0_1070 = arith.constant 0 : index
    %c0_1071 = arith.constant 0 : index
    %1050 = vector.load %arg1[%c0_1068, %c8_1069, %c0_1070, %c0_1071] : memref<8x16x1x128xf32, #tpu.memory_space<vmem>>, vector<1x1x1x128xf32>
    %1051 = vector.shape_cast %1050 : vector<1x1x1x128xf32> to vector<1x128xf32>
    %1052 = arith.mulf %1018, %1051 : vector<1x128xf32>
    %c0_1072 = arith.constant 0 : index
    %c9_1073 = arith.constant 9 : index
    %c0_1074 = arith.constant 0 : index
    %c0_1075 = arith.constant 0 : index
    %1053 = vector.load %arg1[%c0_1072, %c9_1073, %c0_1074, %c0_1075] : memref<8x16x1x128xf32, #tpu.memory_space<vmem>>, vector<1x1x1x128xf32>
    %1054 = vector.shape_cast %1053 : vector<1x1x1x128xf32> to vector<1x128xf32>
    %1055 = arith.mulf %1018, %1054 : vector<1x128xf32>
    %c0_1076 = arith.constant 0 : index
    %c10_1077 = arith.constant 10 : index
    %c0_1078 = arith.constant 0 : index
    %c0_1079 = arith.constant 0 : index
    %1056 = vector.load %arg1[%c0_1076, %c10_1077, %c0_1078, %c0_1079] : memref<8x16x1x128xf32, #tpu.memory_space<vmem>>, vector<1x1x1x128xf32>
    %1057 = vector.shape_cast %1056 : vector<1x1x1x128xf32> to vector<1x128xf32>
    %1058 = arith.mulf %1018, %1057 : vector<1x128xf32>
    %c0_1080 = arith.constant 0 : index
    %c11_1081 = arith.constant 11 : index
    %c0_1082 = arith.constant 0 : index
    %c0_1083 = arith.constant 0 : index
    %1059 = vector.load %arg1[%c0_1080, %c11_1081, %c0_1082, %c0_1083] : memref<8x16x1x128xf32, #tpu.memory_space<vmem>>, vector<1x1x1x128xf32>
    %1060 = vector.shape_cast %1059 : vector<1x1x1x128xf32> to vector<1x128xf32>
    %1061 = arith.mulf %1018, %1060 : vector<1x128xf32>
    %c0_1084 = arith.constant 0 : index
    %c12_1085 = arith.constant 12 : index
    %c0_1086 = arith.constant 0 : index
    %c0_1087 = arith.constant 0 : index
    %1062 = vector.load %arg1[%c0_1084, %c12_1085, %c0_1086, %c0_1087] : memref<8x16x1x128xf32, #tpu.memory_space<vmem>>, vector<1x1x1x128xf32>
    %1063 = vector.shape_cast %1062 : vector<1x1x1x128xf32> to vector<1x128xf32>
    %1064 = arith.mulf %1018, %1063 : vector<1x128xf32>
    %c0_1088 = arith.constant 0 : index
    %c13_1089 = arith.constant 13 : index
    %c0_1090 = arith.constant 0 : index
    %c0_1091 = arith.constant 0 : index
    %1065 = vector.load %arg1[%c0_1088, %c13_1089, %c0_1090, %c0_1091] : memref<8x16x1x128xf32, #tpu.memory_space<vmem>>, vector<1x1x1x128xf32>
    %1066 = vector.shape_cast %1065 : vector<1x1x1x128xf32> to vector<1x128xf32>
    %1067 = arith.mulf %1018, %1066 : vector<1x128xf32>
    %c0_1092 = arith.constant 0 : index
    %c14_1093 = arith.constant 14 : index
    %c0_1094 = arith.constant 0 : index
    %c0_1095 = arith.constant 0 : index
    %1068 = vector.load %arg1[%c0_1092, %c14_1093, %c0_1094, %c0_1095] : memref<8x16x1x128xf32, #tpu.memory_space<vmem>>, vector<1x1x1x128xf32>
    %1069 = vector.shape_cast %1068 : vector<1x1x1x128xf32> to vector<1x128xf32>
    %1070 = arith.mulf %1018, %1069 : vector<1x128xf32>
    %c0_1096 = arith.constant 0 : index
    %c15_1097 = arith.constant 15 : index
    %c0_1098 = arith.constant 0 : index
    %c0_1099 = arith.constant 0 : index
    %1071 = vector.load %arg1[%c0_1096, %c15_1097, %c0_1098, %c0_1099] : memref<8x16x1x128xf32, #tpu.memory_space<vmem>>, vector<1x1x1x128xf32>
    %1072 = vector.shape_cast %1071 : vector<1x1x1x128xf32> to vector<1x128xf32>
    %1073 = arith.mulf %1018, %1072 : vector<1x128xf32>
    %c1_1100 = arith.constant 1 : index
    %c0_1101 = arith.constant 0 : index
    %c0_1102 = arith.constant 0 : index
    %c0_1103 = arith.constant 0 : index
    %1074 = vector.load %arg1[%c1_1100, %c0_1101, %c0_1102, %c0_1103] : memref<8x16x1x128xf32, #tpu.memory_space<vmem>>, vector<1x1x1x128xf32>
    %1075 = vector.shape_cast %1074 : vector<1x1x1x128xf32> to vector<1x128xf32>
    %1076 = arith.mulf %1019, %1075 : vector<1x128xf32>
    %1077 = arith.addf %1028, %1076 : vector<1x128xf32>
    %c1_1104 = arith.constant 1 : index
    %c1_1105 = arith.constant 1 : index
    %c0_1106 = arith.constant 0 : index
    %c0_1107 = arith.constant 0 : index
    %1078 = vector.load %arg1[%c1_1104, %c1_1105, %c0_1106, %c0_1107] : memref<8x16x1x128xf32, #tpu.memory_space<vmem>>, vector<1x1x1x128xf32>
    %1079 = vector.shape_cast %1078 : vector<1x1x1x128xf32> to vector<1x128xf32>
    %1080 = arith.mulf %1019, %1079 : vector<1x128xf32>
    %1081 = arith.addf %1031, %1080 : vector<1x128xf32>
    %c1_1108 = arith.constant 1 : index
    %c2_1109 = arith.constant 2 : index
    %c0_1110 = arith.constant 0 : index
    %c0_1111 = arith.constant 0 : index
    %1082 = vector.load %arg1[%c1_1108, %c2_1109, %c0_1110, %c0_1111] : memref<8x16x1x128xf32, #tpu.memory_space<vmem>>, vector<1x1x1x128xf32>
    %1083 = vector.shape_cast %1082 : vector<1x1x1x128xf32> to vector<1x128xf32>
    %1084 = arith.mulf %1019, %1083 : vector<1x128xf32>
    %1085 = arith.addf %1034, %1084 : vector<1x128xf32>
    %c1_1112 = arith.constant 1 : index
    %c3_1113 = arith.constant 3 : index
    %c0_1114 = arith.constant 0 : index
    %c0_1115 = arith.constant 0 : index
    %1086 = vector.load %arg1[%c1_1112, %c3_1113, %c0_1114, %c0_1115] : memref<8x16x1x128xf32, #tpu.memory_space<vmem>>, vector<1x1x1x128xf32>
    %1087 = vector.shape_cast %1086 : vector<1x1x1x128xf32> to vector<1x128xf32>
    %1088 = arith.mulf %1019, %1087 : vector<1x128xf32>
    %1089 = arith.addf %1037, %1088 : vector<1x128xf32>
    %c1_1116 = arith.constant 1 : index
    %c4_1117 = arith.constant 4 : index
    %c0_1118 = arith.constant 0 : index
    %c0_1119 = arith.constant 0 : index
    %1090 = vector.load %arg1[%c1_1116, %c4_1117, %c0_1118, %c0_1119] : memref<8x16x1x128xf32, #tpu.memory_space<vmem>>, vector<1x1x1x128xf32>
    %1091 = vector.shape_cast %1090 : vector<1x1x1x128xf32> to vector<1x128xf32>
    %1092 = arith.mulf %1019, %1091 : vector<1x128xf32>
    %1093 = arith.addf %1040, %1092 : vector<1x128xf32>
    %c1_1120 = arith.constant 1 : index
    %c5_1121 = arith.constant 5 : index
    %c0_1122 = arith.constant 0 : index
    %c0_1123 = arith.constant 0 : index
    %1094 = vector.load %arg1[%c1_1120, %c5_1121, %c0_1122, %c0_1123] : memref<8x16x1x128xf32, #tpu.memory_space<vmem>>, vector<1x1x1x128xf32>
    %1095 = vector.shape_cast %1094 : vector<1x1x1x128xf32> to vector<1x128xf32>
    %1096 = arith.mulf %1019, %1095 : vector<1x128xf32>
    %1097 = arith.addf %1043, %1096 : vector<1x128xf32>
    %c1_1124 = arith.constant 1 : index
    %c6_1125 = arith.constant 6 : index
    %c0_1126 = arith.constant 0 : index
    %c0_1127 = arith.constant 0 : index
    %1098 = vector.load %arg1[%c1_1124, %c6_1125, %c0_1126, %c0_1127] : memref<8x16x1x128xf32, #tpu.memory_space<vmem>>, vector<1x1x1x128xf32>
    %1099 = vector.shape_cast %1098 : vector<1x1x1x128xf32> to vector<1x128xf32>
    %1100 = arith.mulf %1019, %1099 : vector<1x128xf32>
    %1101 = arith.addf %1046, %1100 : vector<1x128xf32>
    %c1_1128 = arith.constant 1 : index
    %c7_1129 = arith.constant 7 : index
    %c0_1130 = arith.constant 0 : index
    %c0_1131 = arith.constant 0 : index
    %1102 = vector.load %arg1[%c1_1128, %c7_1129, %c0_1130, %c0_1131] : memref<8x16x1x128xf32, #tpu.memory_space<vmem>>, vector<1x1x1x128xf32>
    %1103 = vector.shape_cast %1102 : vector<1x1x1x128xf32> to vector<1x128xf32>
    %1104 = arith.mulf %1019, %1103 : vector<1x128xf32>
    %1105 = arith.addf %1049, %1104 : vector<1x128xf32>
    %c1_1132 = arith.constant 1 : index
    %c8_1133 = arith.constant 8 : index
    %c0_1134 = arith.constant 0 : index
    %c0_1135 = arith.constant 0 : index
    %1106 = vector.load %arg1[%c1_1132, %c8_1133, %c0_1134, %c0_1135] : memref<8x16x1x128xf32, #tpu.memory_space<vmem>>, vector<1x1x1x128xf32>
    %1107 = vector.shape_cast %1106 : vector<1x1x1x128xf32> to vector<1x128xf32>
    %1108 = arith.mulf %1019, %1107 : vector<1x128xf32>
    %1109 = arith.addf %1052, %1108 : vector<1x128xf32>
    %c1_1136 = arith.constant 1 : index
    %c9_1137 = arith.constant 9 : index
    %c0_1138 = arith.constant 0 : index
    %c0_1139 = arith.constant 0 : index
    %1110 = vector.load %arg1[%c1_1136, %c9_1137, %c0_1138, %c0_1139] : memref<8x16x1x128xf32, #tpu.memory_space<vmem>>, vector<1x1x1x128xf32>
    %1111 = vector.shape_cast %1110 : vector<1x1x1x128xf32> to vector<1x128xf32>
    %1112 = arith.mulf %1019, %1111 : vector<1x128xf32>
    %1113 = arith.addf %1055, %1112 : vector<1x128xf32>
    %c1_1140 = arith.constant 1 : index
    %c10_1141 = arith.constant 10 : index
    %c0_1142 = arith.constant 0 : index
    %c0_1143 = arith.constant 0 : index
    %1114 = vector.load %arg1[%c1_1140, %c10_1141, %c0_1142, %c0_1143] : memref<8x16x1x128xf32, #tpu.memory_space<vmem>>, vector<1x1x1x128xf32>
    %1115 = vector.shape_cast %1114 : vector<1x1x1x128xf32> to vector<1x128xf32>
    %1116 = arith.mulf %1019, %1115 : vector<1x128xf32>
    %1117 = arith.addf %1058, %1116 : vector<1x128xf32>
    %c1_1144 = arith.constant 1 : index
    %c11_1145 = arith.constant 11 : index
    %c0_1146 = arith.constant 0 : index
    %c0_1147 = arith.constant 0 : index
    %1118 = vector.load %arg1[%c1_1144, %c11_1145, %c0_1146, %c0_1147] : memref<8x16x1x128xf32, #tpu.memory_space<vmem>>, vector<1x1x1x128xf32>
    %1119 = vector.shape_cast %1118 : vector<1x1x1x128xf32> to vector<1x128xf32>
    %1120 = arith.mulf %1019, %1119 : vector<1x128xf32>
    %1121 = arith.addf %1061, %1120 : vector<1x128xf32>
    %c1_1148 = arith.constant 1 : index
    %c12_1149 = arith.constant 12 : index
    %c0_1150 = arith.constant 0 : index
    %c0_1151 = arith.constant 0 : index
    %1122 = vector.load %arg1[%c1_1148, %c12_1149, %c0_1150, %c0_1151] : memref<8x16x1x128xf32, #tpu.memory_space<vmem>>, vector<1x1x1x128xf32>
    %1123 = vector.shape_cast %1122 : vector<1x1x1x128xf32> to vector<1x128xf32>
    %1124 = arith.mulf %1019, %1123 : vector<1x128xf32>
    %1125 = arith.addf %1064, %1124 : vector<1x128xf32>
    %c1_1152 = arith.constant 1 : index
    %c13_1153 = arith.constant 13 : index
    %c0_1154 = arith.constant 0 : index
    %c0_1155 = arith.constant 0 : index
    %1126 = vector.load %arg1[%c1_1152, %c13_1153, %c0_1154, %c0_1155] : memref<8x16x1x128xf32, #tpu.memory_space<vmem>>, vector<1x1x1x128xf32>
    %1127 = vector.shape_cast %1126 : vector<1x1x1x128xf32> to vector<1x128xf32>
    %1128 = arith.mulf %1019, %1127 : vector<1x128xf32>
    %1129 = arith.addf %1067, %1128 : vector<1x128xf32>
    %c1_1156 = arith.constant 1 : index
    %c14_1157 = arith.constant 14 : index
    %c0_1158 = arith.constant 0 : index
    %c0_1159 = arith.constant 0 : index
    %1130 = vector.load %arg1[%c1_1156, %c14_1157, %c0_1158, %c0_1159] : memref<8x16x1x128xf32, #tpu.memory_space<vmem>>, vector<1x1x1x128xf32>
    %1131 = vector.shape_cast %1130 : vector<1x1x1x128xf32> to vector<1x128xf32>
    %1132 = arith.mulf %1019, %1131 : vector<1x128xf32>
    %1133 = arith.addf %1070, %1132 : vector<1x128xf32>
    %c1_1160 = arith.constant 1 : index
    %c15_1161 = arith.constant 15 : index
    %c0_1162 = arith.constant 0 : index
    %c0_1163 = arith.constant 0 : index
    %1134 = vector.load %arg1[%c1_1160, %c15_1161, %c0_1162, %c0_1163] : memref<8x16x1x128xf32, #tpu.memory_space<vmem>>, vector<1x1x1x128xf32>
    %1135 = vector.shape_cast %1134 : vector<1x1x1x128xf32> to vector<1x128xf32>
    %1136 = arith.mulf %1019, %1135 : vector<1x128xf32>
    %1137 = arith.addf %1073, %1136 : vector<1x128xf32>
    %c2_1164 = arith.constant 2 : index
    %c0_1165 = arith.constant 0 : index
    %c0_1166 = arith.constant 0 : index
    %c0_1167 = arith.constant 0 : index
    %1138 = vector.load %arg1[%c2_1164, %c0_1165, %c0_1166, %c0_1167] : memref<8x16x1x128xf32, #tpu.memory_space<vmem>>, vector<1x1x1x128xf32>
    %1139 = vector.shape_cast %1138 : vector<1x1x1x128xf32> to vector<1x128xf32>
    %1140 = arith.mulf %1020, %1139 : vector<1x128xf32>
    %1141 = arith.addf %1077, %1140 : vector<1x128xf32>
    %c2_1168 = arith.constant 2 : index
    %c1_1169 = arith.constant 1 : index
    %c0_1170 = arith.constant 0 : index
    %c0_1171 = arith.constant 0 : index
    %1142 = vector.load %arg1[%c2_1168, %c1_1169, %c0_1170, %c0_1171] : memref<8x16x1x128xf32, #tpu.memory_space<vmem>>, vector<1x1x1x128xf32>
    %1143 = vector.shape_cast %1142 : vector<1x1x1x128xf32> to vector<1x128xf32>
    %1144 = arith.mulf %1020, %1143 : vector<1x128xf32>
    %1145 = arith.addf %1081, %1144 : vector<1x128xf32>
    %c2_1172 = arith.constant 2 : index
    %c2_1173 = arith.constant 2 : index
    %c0_1174 = arith.constant 0 : index
    %c0_1175 = arith.constant 0 : index
    %1146 = vector.load %arg1[%c2_1172, %c2_1173, %c0_1174, %c0_1175] : memref<8x16x1x128xf32, #tpu.memory_space<vmem>>, vector<1x1x1x128xf32>
    %1147 = vector.shape_cast %1146 : vector<1x1x1x128xf32> to vector<1x128xf32>
    %1148 = arith.mulf %1020, %1147 : vector<1x128xf32>
    %1149 = arith.addf %1085, %1148 : vector<1x128xf32>
    %c2_1176 = arith.constant 2 : index
    %c3_1177 = arith.constant 3 : index
    %c0_1178 = arith.constant 0 : index
    %c0_1179 = arith.constant 0 : index
    %1150 = vector.load %arg1[%c2_1176, %c3_1177, %c0_1178, %c0_1179] : memref<8x16x1x128xf32, #tpu.memory_space<vmem>>, vector<1x1x1x128xf32>
    %1151 = vector.shape_cast %1150 : vector<1x1x1x128xf32> to vector<1x128xf32>
    %1152 = arith.mulf %1020, %1151 : vector<1x128xf32>
    %1153 = arith.addf %1089, %1152 : vector<1x128xf32>
    %c2_1180 = arith.constant 2 : index
    %c4_1181 = arith.constant 4 : index
    %c0_1182 = arith.constant 0 : index
    %c0_1183 = arith.constant 0 : index
    %1154 = vector.load %arg1[%c2_1180, %c4_1181, %c0_1182, %c0_1183] : memref<8x16x1x128xf32, #tpu.memory_space<vmem>>, vector<1x1x1x128xf32>
    %1155 = vector.shape_cast %1154 : vector<1x1x1x128xf32> to vector<1x128xf32>
    %1156 = arith.mulf %1020, %1155 : vector<1x128xf32>
    %1157 = arith.addf %1093, %1156 : vector<1x128xf32>
    %c2_1184 = arith.constant 2 : index
    %c5_1185 = arith.constant 5 : index
    %c0_1186 = arith.constant 0 : index
    %c0_1187 = arith.constant 0 : index
    %1158 = vector.load %arg1[%c2_1184, %c5_1185, %c0_1186, %c0_1187] : memref<8x16x1x128xf32, #tpu.memory_space<vmem>>, vector<1x1x1x128xf32>
    %1159 = vector.shape_cast %1158 : vector<1x1x1x128xf32> to vector<1x128xf32>
    %1160 = arith.mulf %1020, %1159 : vector<1x128xf32>
    %1161 = arith.addf %1097, %1160 : vector<1x128xf32>
    %c2_1188 = arith.constant 2 : index
    %c6_1189 = arith.constant 6 : index
    %c0_1190 = arith.constant 0 : index
    %c0_1191 = arith.constant 0 : index
    %1162 = vector.load %arg1[%c2_1188, %c6_1189, %c0_1190, %c0_1191] : memref<8x16x1x128xf32, #tpu.memory_space<vmem>>, vector<1x1x1x128xf32>
    %1163 = vector.shape_cast %1162 : vector<1x1x1x128xf32> to vector<1x128xf32>
    %1164 = arith.mulf %1020, %1163 : vector<1x128xf32>
    %1165 = arith.addf %1101, %1164 : vector<1x128xf32>
    %c2_1192 = arith.constant 2 : index
    %c7_1193 = arith.constant 7 : index
    %c0_1194 = arith.constant 0 : index
    %c0_1195 = arith.constant 0 : index
    %1166 = vector.load %arg1[%c2_1192, %c7_1193, %c0_1194, %c0_1195] : memref<8x16x1x128xf32, #tpu.memory_space<vmem>>, vector<1x1x1x128xf32>
    %1167 = vector.shape_cast %1166 : vector<1x1x1x128xf32> to vector<1x128xf32>
    %1168 = arith.mulf %1020, %1167 : vector<1x128xf32>
    %1169 = arith.addf %1105, %1168 : vector<1x128xf32>
    %c2_1196 = arith.constant 2 : index
    %c8_1197 = arith.constant 8 : index
    %c0_1198 = arith.constant 0 : index
    %c0_1199 = arith.constant 0 : index
    %1170 = vector.load %arg1[%c2_1196, %c8_1197, %c0_1198, %c0_1199] : memref<8x16x1x128xf32, #tpu.memory_space<vmem>>, vector<1x1x1x128xf32>
    %1171 = vector.shape_cast %1170 : vector<1x1x1x128xf32> to vector<1x128xf32>
    %1172 = arith.mulf %1020, %1171 : vector<1x128xf32>
    %1173 = arith.addf %1109, %1172 : vector<1x128xf32>
    %c2_1200 = arith.constant 2 : index
    %c9_1201 = arith.constant 9 : index
    %c0_1202 = arith.constant 0 : index
    %c0_1203 = arith.constant 0 : index
    %1174 = vector.load %arg1[%c2_1200, %c9_1201, %c0_1202, %c0_1203] : memref<8x16x1x128xf32, #tpu.memory_space<vmem>>, vector<1x1x1x128xf32>
    %1175 = vector.shape_cast %1174 : vector<1x1x1x128xf32> to vector<1x128xf32>
    %1176 = arith.mulf %1020, %1175 : vector<1x128xf32>
    %1177 = arith.addf %1113, %1176 : vector<1x128xf32>
    %c2_1204 = arith.constant 2 : index
    %c10_1205 = arith.constant 10 : index
    %c0_1206 = arith.constant 0 : index
    %c0_1207 = arith.constant 0 : index
    %1178 = vector.load %arg1[%c2_1204, %c10_1205, %c0_1206, %c0_1207] : memref<8x16x1x128xf32, #tpu.memory_space<vmem>>, vector<1x1x1x128xf32>
    %1179 = vector.shape_cast %1178 : vector<1x1x1x128xf32> to vector<1x128xf32>
    %1180 = arith.mulf %1020, %1179 : vector<1x128xf32>
    %1181 = arith.addf %1117, %1180 : vector<1x128xf32>
    %c2_1208 = arith.constant 2 : index
    %c11_1209 = arith.constant 11 : index
    %c0_1210 = arith.constant 0 : index
    %c0_1211 = arith.constant 0 : index
    %1182 = vector.load %arg1[%c2_1208, %c11_1209, %c0_1210, %c0_1211] : memref<8x16x1x128xf32, #tpu.memory_space<vmem>>, vector<1x1x1x128xf32>
    %1183 = vector.shape_cast %1182 : vector<1x1x1x128xf32> to vector<1x128xf32>
    %1184 = arith.mulf %1020, %1183 : vector<1x128xf32>
    %1185 = arith.addf %1121, %1184 : vector<1x128xf32>
    %c2_1212 = arith.constant 2 : index
    %c12_1213 = arith.constant 12 : index
    %c0_1214 = arith.constant 0 : index
    %c0_1215 = arith.constant 0 : index
    %1186 = vector.load %arg1[%c2_1212, %c12_1213, %c0_1214, %c0_1215] : memref<8x16x1x128xf32, #tpu.memory_space<vmem>>, vector<1x1x1x128xf32>
    %1187 = vector.shape_cast %1186 : vector<1x1x1x128xf32> to vector<1x128xf32>
    %1188 = arith.mulf %1020, %1187 : vector<1x128xf32>
    %1189 = arith.addf %1125, %1188 : vector<1x128xf32>
    %c2_1216 = arith.constant 2 : index
    %c13_1217 = arith.constant 13 : index
    %c0_1218 = arith.constant 0 : index
    %c0_1219 = arith.constant 0 : index
    %1190 = vector.load %arg1[%c2_1216, %c13_1217, %c0_1218, %c0_1219] : memref<8x16x1x128xf32, #tpu.memory_space<vmem>>, vector<1x1x1x128xf32>
    %1191 = vector.shape_cast %1190 : vector<1x1x1x128xf32> to vector<1x128xf32>
    %1192 = arith.mulf %1020, %1191 : vector<1x128xf32>
    %1193 = arith.addf %1129, %1192 : vector<1x128xf32>
    %c2_1220 = arith.constant 2 : index
    %c14_1221 = arith.constant 14 : index
    %c0_1222 = arith.constant 0 : index
    %c0_1223 = arith.constant 0 : index
    %1194 = vector.load %arg1[%c2_1220, %c14_1221, %c0_1222, %c0_1223] : memref<8x16x1x128xf32, #tpu.memory_space<vmem>>, vector<1x1x1x128xf32>
    %1195 = vector.shape_cast %1194 : vector<1x1x1x128xf32> to vector<1x128xf32>
    %1196 = arith.mulf %1020, %1195 : vector<1x128xf32>
    %1197 = arith.addf %1133, %1196 : vector<1x128xf32>
    %c2_1224 = arith.constant 2 : index
    %c15_1225 = arith.constant 15 : index
    %c0_1226 = arith.constant 0 : index
    %c0_1227 = arith.constant 0 : index
    %1198 = vector.load %arg1[%c2_1224, %c15_1225, %c0_1226, %c0_1227] : memref<8x16x1x128xf32, #tpu.memory_space<vmem>>, vector<1x1x1x128xf32>
    %1199 = vector.shape_cast %1198 : vector<1x1x1x128xf32> to vector<1x128xf32>
    %1200 = arith.mulf %1020, %1199 : vector<1x128xf32>
    %1201 = arith.addf %1137, %1200 : vector<1x128xf32>
    %c3_1228 = arith.constant 3 : index
    %c0_1229 = arith.constant 0 : index
    %c0_1230 = arith.constant 0 : index
    %c0_1231 = arith.constant 0 : index
    %1202 = vector.load %arg1[%c3_1228, %c0_1229, %c0_1230, %c0_1231] : memref<8x16x1x128xf32, #tpu.memory_space<vmem>>, vector<1x1x1x128xf32>
    %1203 = vector.shape_cast %1202 : vector<1x1x1x128xf32> to vector<1x128xf32>
    %1204 = arith.mulf %1021, %1203 : vector<1x128xf32>
    %1205 = arith.addf %1141, %1204 : vector<1x128xf32>
    %c3_1232 = arith.constant 3 : index
    %c1_1233 = arith.constant 1 : index
    %c0_1234 = arith.constant 0 : index
    %c0_1235 = arith.constant 0 : index
    %1206 = vector.load %arg1[%c3_1232, %c1_1233, %c0_1234, %c0_1235] : memref<8x16x1x128xf32, #tpu.memory_space<vmem>>, vector<1x1x1x128xf32>
    %1207 = vector.shape_cast %1206 : vector<1x1x1x128xf32> to vector<1x128xf32>
    %1208 = arith.mulf %1021, %1207 : vector<1x128xf32>
    %1209 = arith.addf %1145, %1208 : vector<1x128xf32>
    %c3_1236 = arith.constant 3 : index
    %c2_1237 = arith.constant 2 : index
    %c0_1238 = arith.constant 0 : index
    %c0_1239 = arith.constant 0 : index
    %1210 = vector.load %arg1[%c3_1236, %c2_1237, %c0_1238, %c0_1239] : memref<8x16x1x128xf32, #tpu.memory_space<vmem>>, vector<1x1x1x128xf32>
    %1211 = vector.shape_cast %1210 : vector<1x1x1x128xf32> to vector<1x128xf32>
    %1212 = arith.mulf %1021, %1211 : vector<1x128xf32>
    %1213 = arith.addf %1149, %1212 : vector<1x128xf32>
    %c3_1240 = arith.constant 3 : index
    %c3_1241 = arith.constant 3 : index
    %c0_1242 = arith.constant 0 : index
    %c0_1243 = arith.constant 0 : index
    %1214 = vector.load %arg1[%c3_1240, %c3_1241, %c0_1242, %c0_1243] : memref<8x16x1x128xf32, #tpu.memory_space<vmem>>, vector<1x1x1x128xf32>
    %1215 = vector.shape_cast %1214 : vector<1x1x1x128xf32> to vector<1x128xf32>
    %1216 = arith.mulf %1021, %1215 : vector<1x128xf32>
    %1217 = arith.addf %1153, %1216 : vector<1x128xf32>
    %c3_1244 = arith.constant 3 : index
    %c4_1245 = arith.constant 4 : index
    %c0_1246 = arith.constant 0 : index
    %c0_1247 = arith.constant 0 : index
    %1218 = vector.load %arg1[%c3_1244, %c4_1245, %c0_1246, %c0_1247] : memref<8x16x1x128xf32, #tpu.memory_space<vmem>>, vector<1x1x1x128xf32>
    %1219 = vector.shape_cast %1218 : vector<1x1x1x128xf32> to vector<1x128xf32>
    %1220 = arith.mulf %1021, %1219 : vector<1x128xf32>
    %1221 = arith.addf %1157, %1220 : vector<1x128xf32>
    %c3_1248 = arith.constant 3 : index
    %c5_1249 = arith.constant 5 : index
    %c0_1250 = arith.constant 0 : index
    %c0_1251 = arith.constant 0 : index
    %1222 = vector.load %arg1[%c3_1248, %c5_1249, %c0_1250, %c0_1251] : memref<8x16x1x128xf32, #tpu.memory_space<vmem>>, vector<1x1x1x128xf32>
    %1223 = vector.shape_cast %1222 : vector<1x1x1x128xf32> to vector<1x128xf32>
    %1224 = arith.mulf %1021, %1223 : vector<1x128xf32>
    %1225 = arith.addf %1161, %1224 : vector<1x128xf32>
    %c3_1252 = arith.constant 3 : index
    %c6_1253 = arith.constant 6 : index
    %c0_1254 = arith.constant 0 : index
    %c0_1255 = arith.constant 0 : index
    %1226 = vector.load %arg1[%c3_1252, %c6_1253, %c0_1254, %c0_1255] : memref<8x16x1x128xf32, #tpu.memory_space<vmem>>, vector<1x1x1x128xf32>
    %1227 = vector.shape_cast %1226 : vector<1x1x1x128xf32> to vector<1x128xf32>
    %1228 = arith.mulf %1021, %1227 : vector<1x128xf32>
    %1229 = arith.addf %1165, %1228 : vector<1x128xf32>
    %c3_1256 = arith.constant 3 : index
    %c7_1257 = arith.constant 7 : index
    %c0_1258 = arith.constant 0 : index
    %c0_1259 = arith.constant 0 : index
    %1230 = vector.load %arg1[%c3_1256, %c7_1257, %c0_1258, %c0_1259] : memref<8x16x1x128xf32, #tpu.memory_space<vmem>>, vector<1x1x1x128xf32>
    %1231 = vector.shape_cast %1230 : vector<1x1x1x128xf32> to vector<1x128xf32>
    %1232 = arith.mulf %1021, %1231 : vector<1x128xf32>
    %1233 = arith.addf %1169, %1232 : vector<1x128xf32>
    %c3_1260 = arith.constant 3 : index
    %c8_1261 = arith.constant 8 : index
    %c0_1262 = arith.constant 0 : index
    %c0_1263 = arith.constant 0 : index
    %1234 = vector.load %arg1[%c3_1260, %c8_1261, %c0_1262, %c0_1263] : memref<8x16x1x128xf32, #tpu.memory_space<vmem>>, vector<1x1x1x128xf32>
    %1235 = vector.shape_cast %1234 : vector<1x1x1x128xf32> to vector<1x128xf32>
    %1236 = arith.mulf %1021, %1235 : vector<1x128xf32>
    %1237 = arith.addf %1173, %1236 : vector<1x128xf32>
    %c3_1264 = arith.constant 3 : index
    %c9_1265 = arith.constant 9 : index
    %c0_1266 = arith.constant 0 : index
    %c0_1267 = arith.constant 0 : index
    %1238 = vector.load %arg1[%c3_1264, %c9_1265, %c0_1266, %c0_1267] : memref<8x16x1x128xf32, #tpu.memory_space<vmem>>, vector<1x1x1x128xf32>
    %1239 = vector.shape_cast %1238 : vector<1x1x1x128xf32> to vector<1x128xf32>
    %1240 = arith.mulf %1021, %1239 : vector<1x128xf32>
    %1241 = arith.addf %1177, %1240 : vector<1x128xf32>
    %c3_1268 = arith.constant 3 : index
    %c10_1269 = arith.constant 10 : index
    %c0_1270 = arith.constant 0 : index
    %c0_1271 = arith.constant 0 : index
    %1242 = vector.load %arg1[%c3_1268, %c10_1269, %c0_1270, %c0_1271] : memref<8x16x1x128xf32, #tpu.memory_space<vmem>>, vector<1x1x1x128xf32>
    %1243 = vector.shape_cast %1242 : vector<1x1x1x128xf32> to vector<1x128xf32>
    %1244 = arith.mulf %1021, %1243 : vector<1x128xf32>
    %1245 = arith.addf %1181, %1244 : vector<1x128xf32>
    %c3_1272 = arith.constant 3 : index
    %c11_1273 = arith.constant 11 : index
    %c0_1274 = arith.constant 0 : index
    %c0_1275 = arith.constant 0 : index
    %1246 = vector.load %arg1[%c3_1272, %c11_1273, %c0_1274, %c0_1275] : memref<8x16x1x128xf32, #tpu.memory_space<vmem>>, vector<1x1x1x128xf32>
    %1247 = vector.shape_cast %1246 : vector<1x1x1x128xf32> to vector<1x128xf32>
    %1248 = arith.mulf %1021, %1247 : vector<1x128xf32>
    %1249 = arith.addf %1185, %1248 : vector<1x128xf32>
    %c3_1276 = arith.constant 3 : index
    %c12_1277 = arith.constant 12 : index
    %c0_1278 = arith.constant 0 : index
    %c0_1279 = arith.constant 0 : index
    %1250 = vector.load %arg1[%c3_1276, %c12_1277, %c0_1278, %c0_1279] : memref<8x16x1x128xf32, #tpu.memory_space<vmem>>, vector<1x1x1x128xf32>
    %1251 = vector.shape_cast %1250 : vector<1x1x1x128xf32> to vector<1x128xf32>
    %1252 = arith.mulf %1021, %1251 : vector<1x128xf32>
    %1253 = arith.addf %1189, %1252 : vector<1x128xf32>
    %c3_1280 = arith.constant 3 : index
    %c13_1281 = arith.constant 13 : index
    %c0_1282 = arith.constant 0 : index
    %c0_1283 = arith.constant 0 : index
    %1254 = vector.load %arg1[%c3_1280, %c13_1281, %c0_1282, %c0_1283] : memref<8x16x1x128xf32, #tpu.memory_space<vmem>>, vector<1x1x1x128xf32>
    %1255 = vector.shape_cast %1254 : vector<1x1x1x128xf32> to vector<1x128xf32>
    %1256 = arith.mulf %1021, %1255 : vector<1x128xf32>
    %1257 = arith.addf %1193, %1256 : vector<1x128xf32>
    %c3_1284 = arith.constant 3 : index
    %c14_1285 = arith.constant 14 : index
    %c0_1286 = arith.constant 0 : index
    %c0_1287 = arith.constant 0 : index
    %1258 = vector.load %arg1[%c3_1284, %c14_1285, %c0_1286, %c0_1287] : memref<8x16x1x128xf32, #tpu.memory_space<vmem>>, vector<1x1x1x128xf32>
    %1259 = vector.shape_cast %1258 : vector<1x1x1x128xf32> to vector<1x128xf32>
    %1260 = arith.mulf %1021, %1259 : vector<1x128xf32>
    %1261 = arith.addf %1197, %1260 : vector<1x128xf32>
    %c3_1288 = arith.constant 3 : index
    %c15_1289 = arith.constant 15 : index
    %c0_1290 = arith.constant 0 : index
    %c0_1291 = arith.constant 0 : index
    %1262 = vector.load %arg1[%c3_1288, %c15_1289, %c0_1290, %c0_1291] : memref<8x16x1x128xf32, #tpu.memory_space<vmem>>, vector<1x1x1x128xf32>
    %1263 = vector.shape_cast %1262 : vector<1x1x1x128xf32> to vector<1x128xf32>
    %1264 = arith.mulf %1021, %1263 : vector<1x128xf32>
    %1265 = arith.addf %1201, %1264 : vector<1x128xf32>
    %c4_1292 = arith.constant 4 : index
    %c0_1293 = arith.constant 0 : index
    %c0_1294 = arith.constant 0 : index
    %c0_1295 = arith.constant 0 : index
    %1266 = vector.load %arg1[%c4_1292, %c0_1293, %c0_1294, %c0_1295] : memref<8x16x1x128xf32, #tpu.memory_space<vmem>>, vector<1x1x1x128xf32>
    %1267 = vector.shape_cast %1266 : vector<1x1x1x128xf32> to vector<1x128xf32>
    %1268 = arith.mulf %1022, %1267 : vector<1x128xf32>
    %1269 = arith.addf %1205, %1268 : vector<1x128xf32>
    %c4_1296 = arith.constant 4 : index
    %c1_1297 = arith.constant 1 : index
    %c0_1298 = arith.constant 0 : index
    %c0_1299 = arith.constant 0 : index
    %1270 = vector.load %arg1[%c4_1296, %c1_1297, %c0_1298, %c0_1299] : memref<8x16x1x128xf32, #tpu.memory_space<vmem>>, vector<1x1x1x128xf32>
    %1271 = vector.shape_cast %1270 : vector<1x1x1x128xf32> to vector<1x128xf32>
    %1272 = arith.mulf %1022, %1271 : vector<1x128xf32>
    %1273 = arith.addf %1209, %1272 : vector<1x128xf32>
    %c4_1300 = arith.constant 4 : index
    %c2_1301 = arith.constant 2 : index
    %c0_1302 = arith.constant 0 : index
    %c0_1303 = arith.constant 0 : index
    %1274 = vector.load %arg1[%c4_1300, %c2_1301, %c0_1302, %c0_1303] : memref<8x16x1x128xf32, #tpu.memory_space<vmem>>, vector<1x1x1x128xf32>
    %1275 = vector.shape_cast %1274 : vector<1x1x1x128xf32> to vector<1x128xf32>
    %1276 = arith.mulf %1022, %1275 : vector<1x128xf32>
    %1277 = arith.addf %1213, %1276 : vector<1x128xf32>
    %c4_1304 = arith.constant 4 : index
    %c3_1305 = arith.constant 3 : index
    %c0_1306 = arith.constant 0 : index
    %c0_1307 = arith.constant 0 : index
    %1278 = vector.load %arg1[%c4_1304, %c3_1305, %c0_1306, %c0_1307] : memref<8x16x1x128xf32, #tpu.memory_space<vmem>>, vector<1x1x1x128xf32>
    %1279 = vector.shape_cast %1278 : vector<1x1x1x128xf32> to vector<1x128xf32>
    %1280 = arith.mulf %1022, %1279 : vector<1x128xf32>
    %1281 = arith.addf %1217, %1280 : vector<1x128xf32>
    %c4_1308 = arith.constant 4 : index
    %c4_1309 = arith.constant 4 : index
    %c0_1310 = arith.constant 0 : index
    %c0_1311 = arith.constant 0 : index
    %1282 = vector.load %arg1[%c4_1308, %c4_1309, %c0_1310, %c0_1311] : memref<8x16x1x128xf32, #tpu.memory_space<vmem>>, vector<1x1x1x128xf32>
    %1283 = vector.shape_cast %1282 : vector<1x1x1x128xf32> to vector<1x128xf32>
    %1284 = arith.mulf %1022, %1283 : vector<1x128xf32>
    %1285 = arith.addf %1221, %1284 : vector<1x128xf32>
    %c4_1312 = arith.constant 4 : index
    %c5_1313 = arith.constant 5 : index
    %c0_1314 = arith.constant 0 : index
    %c0_1315 = arith.constant 0 : index
    %1286 = vector.load %arg1[%c4_1312, %c5_1313, %c0_1314, %c0_1315] : memref<8x16x1x128xf32, #tpu.memory_space<vmem>>, vector<1x1x1x128xf32>
    %1287 = vector.shape_cast %1286 : vector<1x1x1x128xf32> to vector<1x128xf32>
    %1288 = arith.mulf %1022, %1287 : vector<1x128xf32>
    %1289 = arith.addf %1225, %1288 : vector<1x128xf32>
    %c4_1316 = arith.constant 4 : index
    %c6_1317 = arith.constant 6 : index
    %c0_1318 = arith.constant 0 : index
    %c0_1319 = arith.constant 0 : index
    %1290 = vector.load %arg1[%c4_1316, %c6_1317, %c0_1318, %c0_1319] : memref<8x16x1x128xf32, #tpu.memory_space<vmem>>, vector<1x1x1x128xf32>
    %1291 = vector.shape_cast %1290 : vector<1x1x1x128xf32> to vector<1x128xf32>
    %1292 = arith.mulf %1022, %1291 : vector<1x128xf32>
    %1293 = arith.addf %1229, %1292 : vector<1x128xf32>
    %c4_1320 = arith.constant 4 : index
    %c7_1321 = arith.constant 7 : index
    %c0_1322 = arith.constant 0 : index
    %c0_1323 = arith.constant 0 : index
    %1294 = vector.load %arg1[%c4_1320, %c7_1321, %c0_1322, %c0_1323] : memref<8x16x1x128xf32, #tpu.memory_space<vmem>>, vector<1x1x1x128xf32>
    %1295 = vector.shape_cast %1294 : vector<1x1x1x128xf32> to vector<1x128xf32>
    %1296 = arith.mulf %1022, %1295 : vector<1x128xf32>
    %1297 = arith.addf %1233, %1296 : vector<1x128xf32>
    %c4_1324 = arith.constant 4 : index
    %c8_1325 = arith.constant 8 : index
    %c0_1326 = arith.constant 0 : index
    %c0_1327 = arith.constant 0 : index
    %1298 = vector.load %arg1[%c4_1324, %c8_1325, %c0_1326, %c0_1327] : memref<8x16x1x128xf32, #tpu.memory_space<vmem>>, vector<1x1x1x128xf32>
    %1299 = vector.shape_cast %1298 : vector<1x1x1x128xf32> to vector<1x128xf32>
    %1300 = arith.mulf %1022, %1299 : vector<1x128xf32>
    %1301 = arith.addf %1237, %1300 : vector<1x128xf32>
    %c4_1328 = arith.constant 4 : index
    %c9_1329 = arith.constant 9 : index
    %c0_1330 = arith.constant 0 : index
    %c0_1331 = arith.constant 0 : index
    %1302 = vector.load %arg1[%c4_1328, %c9_1329, %c0_1330, %c0_1331] : memref<8x16x1x128xf32, #tpu.memory_space<vmem>>, vector<1x1x1x128xf32>
    %1303 = vector.shape_cast %1302 : vector<1x1x1x128xf32> to vector<1x128xf32>
    %1304 = arith.mulf %1022, %1303 : vector<1x128xf32>
    %1305 = arith.addf %1241, %1304 : vector<1x128xf32>
    %c4_1332 = arith.constant 4 : index
    %c10_1333 = arith.constant 10 : index
    %c0_1334 = arith.constant 0 : index
    %c0_1335 = arith.constant 0 : index
    %1306 = vector.load %arg1[%c4_1332, %c10_1333, %c0_1334, %c0_1335] : memref<8x16x1x128xf32, #tpu.memory_space<vmem>>, vector<1x1x1x128xf32>
    %1307 = vector.shape_cast %1306 : vector<1x1x1x128xf32> to vector<1x128xf32>
    %1308 = arith.mulf %1022, %1307 : vector<1x128xf32>
    %1309 = arith.addf %1245, %1308 : vector<1x128xf32>
    %c4_1336 = arith.constant 4 : index
    %c11_1337 = arith.constant 11 : index
    %c0_1338 = arith.constant 0 : index
    %c0_1339 = arith.constant 0 : index
    %1310 = vector.load %arg1[%c4_1336, %c11_1337, %c0_1338, %c0_1339] : memref<8x16x1x128xf32, #tpu.memory_space<vmem>>, vector<1x1x1x128xf32>
    %1311 = vector.shape_cast %1310 : vector<1x1x1x128xf32> to vector<1x128xf32>
    %1312 = arith.mulf %1022, %1311 : vector<1x128xf32>
    %1313 = arith.addf %1249, %1312 : vector<1x128xf32>
    %c4_1340 = arith.constant 4 : index
    %c12_1341 = arith.constant 12 : index
    %c0_1342 = arith.constant 0 : index
    %c0_1343 = arith.constant 0 : index
    %1314 = vector.load %arg1[%c4_1340, %c12_1341, %c0_1342, %c0_1343] : memref<8x16x1x128xf32, #tpu.memory_space<vmem>>, vector<1x1x1x128xf32>
    %1315 = vector.shape_cast %1314 : vector<1x1x1x128xf32> to vector<1x128xf32>
    %1316 = arith.mulf %1022, %1315 : vector<1x128xf32>
    %1317 = arith.addf %1253, %1316 : vector<1x128xf32>
    %c4_1344 = arith.constant 4 : index
    %c13_1345 = arith.constant 13 : index
    %c0_1346 = arith.constant 0 : index
    %c0_1347 = arith.constant 0 : index
    %1318 = vector.load %arg1[%c4_1344, %c13_1345, %c0_1346, %c0_1347] : memref<8x16x1x128xf32, #tpu.memory_space<vmem>>, vector<1x1x1x128xf32>
    %1319 = vector.shape_cast %1318 : vector<1x1x1x128xf32> to vector<1x128xf32>
    %1320 = arith.mulf %1022, %1319 : vector<1x128xf32>
    %1321 = arith.addf %1257, %1320 : vector<1x128xf32>
    %c4_1348 = arith.constant 4 : index
    %c14_1349 = arith.constant 14 : index
    %c0_1350 = arith.constant 0 : index
    %c0_1351 = arith.constant 0 : index
    %1322 = vector.load %arg1[%c4_1348, %c14_1349, %c0_1350, %c0_1351] : memref<8x16x1x128xf32, #tpu.memory_space<vmem>>, vector<1x1x1x128xf32>
    %1323 = vector.shape_cast %1322 : vector<1x1x1x128xf32> to vector<1x128xf32>
    %1324 = arith.mulf %1022, %1323 : vector<1x128xf32>
    %1325 = arith.addf %1261, %1324 : vector<1x128xf32>
    %c4_1352 = arith.constant 4 : index
    %c15_1353 = arith.constant 15 : index
    %c0_1354 = arith.constant 0 : index
    %c0_1355 = arith.constant 0 : index
    %1326 = vector.load %arg1[%c4_1352, %c15_1353, %c0_1354, %c0_1355] : memref<8x16x1x128xf32, #tpu.memory_space<vmem>>, vector<1x1x1x128xf32>
    %1327 = vector.shape_cast %1326 : vector<1x1x1x128xf32> to vector<1x128xf32>
    %1328 = arith.mulf %1022, %1327 : vector<1x128xf32>
    %1329 = arith.addf %1265, %1328 : vector<1x128xf32>
    %c5_1356 = arith.constant 5 : index
    %c0_1357 = arith.constant 0 : index
    %c0_1358 = arith.constant 0 : index
    %c0_1359 = arith.constant 0 : index
    %1330 = vector.load %arg1[%c5_1356, %c0_1357, %c0_1358, %c0_1359] : memref<8x16x1x128xf32, #tpu.memory_space<vmem>>, vector<1x1x1x128xf32>
    %1331 = vector.shape_cast %1330 : vector<1x1x1x128xf32> to vector<1x128xf32>
    %1332 = arith.mulf %1023, %1331 : vector<1x128xf32>
    %1333 = arith.addf %1269, %1332 : vector<1x128xf32>
    %c5_1360 = arith.constant 5 : index
    %c1_1361 = arith.constant 1 : index
    %c0_1362 = arith.constant 0 : index
    %c0_1363 = arith.constant 0 : index
    %1334 = vector.load %arg1[%c5_1360, %c1_1361, %c0_1362, %c0_1363] : memref<8x16x1x128xf32, #tpu.memory_space<vmem>>, vector<1x1x1x128xf32>
    %1335 = vector.shape_cast %1334 : vector<1x1x1x128xf32> to vector<1x128xf32>
    %1336 = arith.mulf %1023, %1335 : vector<1x128xf32>
    %1337 = arith.addf %1273, %1336 : vector<1x128xf32>
    %c5_1364 = arith.constant 5 : index
    %c2_1365 = arith.constant 2 : index
    %c0_1366 = arith.constant 0 : index
    %c0_1367 = arith.constant 0 : index
    %1338 = vector.load %arg1[%c5_1364, %c2_1365, %c0_1366, %c0_1367] : memref<8x16x1x128xf32, #tpu.memory_space<vmem>>, vector<1x1x1x128xf32>
    %1339 = vector.shape_cast %1338 : vector<1x1x1x128xf32> to vector<1x128xf32>
    %1340 = arith.mulf %1023, %1339 : vector<1x128xf32>
    %1341 = arith.addf %1277, %1340 : vector<1x128xf32>
    %c5_1368 = arith.constant 5 : index
    %c3_1369 = arith.constant 3 : index
    %c0_1370 = arith.constant 0 : index
    %c0_1371 = arith.constant 0 : index
    %1342 = vector.load %arg1[%c5_1368, %c3_1369, %c0_1370, %c0_1371] : memref<8x16x1x128xf32, #tpu.memory_space<vmem>>, vector<1x1x1x128xf32>
    %1343 = vector.shape_cast %1342 : vector<1x1x1x128xf32> to vector<1x128xf32>
    %1344 = arith.mulf %1023, %1343 : vector<1x128xf32>
    %1345 = arith.addf %1281, %1344 : vector<1x128xf32>
    %c5_1372 = arith.constant 5 : index
    %c4_1373 = arith.constant 4 : index
    %c0_1374 = arith.constant 0 : index
    %c0_1375 = arith.constant 0 : index
    %1346 = vector.load %arg1[%c5_1372, %c4_1373, %c0_1374, %c0_1375] : memref<8x16x1x128xf32, #tpu.memory_space<vmem>>, vector<1x1x1x128xf32>
    %1347 = vector.shape_cast %1346 : vector<1x1x1x128xf32> to vector<1x128xf32>
    %1348 = arith.mulf %1023, %1347 : vector<1x128xf32>
    %1349 = arith.addf %1285, %1348 : vector<1x128xf32>
    %c5_1376 = arith.constant 5 : index
    %c5_1377 = arith.constant 5 : index
    %c0_1378 = arith.constant 0 : index
    %c0_1379 = arith.constant 0 : index
    %1350 = vector.load %arg1[%c5_1376, %c5_1377, %c0_1378, %c0_1379] : memref<8x16x1x128xf32, #tpu.memory_space<vmem>>, vector<1x1x1x128xf32>
    %1351 = vector.shape_cast %1350 : vector<1x1x1x128xf32> to vector<1x128xf32>
    %1352 = arith.mulf %1023, %1351 : vector<1x128xf32>
    %1353 = arith.addf %1289, %1352 : vector<1x128xf32>
    %c5_1380 = arith.constant 5 : index
    %c6_1381 = arith.constant 6 : index
    %c0_1382 = arith.constant 0 : index
    %c0_1383 = arith.constant 0 : index
    %1354 = vector.load %arg1[%c5_1380, %c6_1381, %c0_1382, %c0_1383] : memref<8x16x1x128xf32, #tpu.memory_space<vmem>>, vector<1x1x1x128xf32>
    %1355 = vector.shape_cast %1354 : vector<1x1x1x128xf32> to vector<1x128xf32>
    %1356 = arith.mulf %1023, %1355 : vector<1x128xf32>
    %1357 = arith.addf %1293, %1356 : vector<1x128xf32>
    %c5_1384 = arith.constant 5 : index
    %c7_1385 = arith.constant 7 : index
    %c0_1386 = arith.constant 0 : index
    %c0_1387 = arith.constant 0 : index
    %1358 = vector.load %arg1[%c5_1384, %c7_1385, %c0_1386, %c0_1387] : memref<8x16x1x128xf32, #tpu.memory_space<vmem>>, vector<1x1x1x128xf32>
    %1359 = vector.shape_cast %1358 : vector<1x1x1x128xf32> to vector<1x128xf32>
    %1360 = arith.mulf %1023, %1359 : vector<1x128xf32>
    %1361 = arith.addf %1297, %1360 : vector<1x128xf32>
    %c5_1388 = arith.constant 5 : index
    %c8_1389 = arith.constant 8 : index
    %c0_1390 = arith.constant 0 : index
    %c0_1391 = arith.constant 0 : index
    %1362 = vector.load %arg1[%c5_1388, %c8_1389, %c0_1390, %c0_1391] : memref<8x16x1x128xf32, #tpu.memory_space<vmem>>, vector<1x1x1x128xf32>
    %1363 = vector.shape_cast %1362 : vector<1x1x1x128xf32> to vector<1x128xf32>
    %1364 = arith.mulf %1023, %1363 : vector<1x128xf32>
    %1365 = arith.addf %1301, %1364 : vector<1x128xf32>
    %c5_1392 = arith.constant 5 : index
    %c9_1393 = arith.constant 9 : index
    %c0_1394 = arith.constant 0 : index
    %c0_1395 = arith.constant 0 : index
    %1366 = vector.load %arg1[%c5_1392, %c9_1393, %c0_1394, %c0_1395] : memref<8x16x1x128xf32, #tpu.memory_space<vmem>>, vector<1x1x1x128xf32>
    %1367 = vector.shape_cast %1366 : vector<1x1x1x128xf32> to vector<1x128xf32>
    %1368 = arith.mulf %1023, %1367 : vector<1x128xf32>
    %1369 = arith.addf %1305, %1368 : vector<1x128xf32>
    %c5_1396 = arith.constant 5 : index
    %c10_1397 = arith.constant 10 : index
    %c0_1398 = arith.constant 0 : index
    %c0_1399 = arith.constant 0 : index
    %1370 = vector.load %arg1[%c5_1396, %c10_1397, %c0_1398, %c0_1399] : memref<8x16x1x128xf32, #tpu.memory_space<vmem>>, vector<1x1x1x128xf32>
    %1371 = vector.shape_cast %1370 : vector<1x1x1x128xf32> to vector<1x128xf32>
    %1372 = arith.mulf %1023, %1371 : vector<1x128xf32>
    %1373 = arith.addf %1309, %1372 : vector<1x128xf32>
    %c5_1400 = arith.constant 5 : index
    %c11_1401 = arith.constant 11 : index
    %c0_1402 = arith.constant 0 : index
    %c0_1403 = arith.constant 0 : index
    %1374 = vector.load %arg1[%c5_1400, %c11_1401, %c0_1402, %c0_1403] : memref<8x16x1x128xf32, #tpu.memory_space<vmem>>, vector<1x1x1x128xf32>
    %1375 = vector.shape_cast %1374 : vector<1x1x1x128xf32> to vector<1x128xf32>
    %1376 = arith.mulf %1023, %1375 : vector<1x128xf32>
    %1377 = arith.addf %1313, %1376 : vector<1x128xf32>
    %c5_1404 = arith.constant 5 : index
    %c12_1405 = arith.constant 12 : index
    %c0_1406 = arith.constant 0 : index
    %c0_1407 = arith.constant 0 : index
    %1378 = vector.load %arg1[%c5_1404, %c12_1405, %c0_1406, %c0_1407] : memref<8x16x1x128xf32, #tpu.memory_space<vmem>>, vector<1x1x1x128xf32>
    %1379 = vector.shape_cast %1378 : vector<1x1x1x128xf32> to vector<1x128xf32>
    %1380 = arith.mulf %1023, %1379 : vector<1x128xf32>
    %1381 = arith.addf %1317, %1380 : vector<1x128xf32>
    %c5_1408 = arith.constant 5 : index
    %c13_1409 = arith.constant 13 : index
    %c0_1410 = arith.constant 0 : index
    %c0_1411 = arith.constant 0 : index
    %1382 = vector.load %arg1[%c5_1408, %c13_1409, %c0_1410, %c0_1411] : memref<8x16x1x128xf32, #tpu.memory_space<vmem>>, vector<1x1x1x128xf32>
    %1383 = vector.shape_cast %1382 : vector<1x1x1x128xf32> to vector<1x128xf32>
    %1384 = arith.mulf %1023, %1383 : vector<1x128xf32>
    %1385 = arith.addf %1321, %1384 : vector<1x128xf32>
    %c5_1412 = arith.constant 5 : index
    %c14_1413 = arith.constant 14 : index
    %c0_1414 = arith.constant 0 : index
    %c0_1415 = arith.constant 0 : index
    %1386 = vector.load %arg1[%c5_1412, %c14_1413, %c0_1414, %c0_1415] : memref<8x16x1x128xf32, #tpu.memory_space<vmem>>, vector<1x1x1x128xf32>
    %1387 = vector.shape_cast %1386 : vector<1x1x1x128xf32> to vector<1x128xf32>
    %1388 = arith.mulf %1023, %1387 : vector<1x128xf32>
    %1389 = arith.addf %1325, %1388 : vector<1x128xf32>
    %c5_1416 = arith.constant 5 : index
    %c15_1417 = arith.constant 15 : index
    %c0_1418 = arith.constant 0 : index
    %c0_1419 = arith.constant 0 : index
    %1390 = vector.load %arg1[%c5_1416, %c15_1417, %c0_1418, %c0_1419] : memref<8x16x1x128xf32, #tpu.memory_space<vmem>>, vector<1x1x1x128xf32>
    %1391 = vector.shape_cast %1390 : vector<1x1x1x128xf32> to vector<1x128xf32>
    %1392 = arith.mulf %1023, %1391 : vector<1x128xf32>
    %1393 = arith.addf %1329, %1392 : vector<1x128xf32>
    %c6_1420 = arith.constant 6 : index
    %c0_1421 = arith.constant 0 : index
    %c0_1422 = arith.constant 0 : index
    %c0_1423 = arith.constant 0 : index
    %1394 = vector.load %arg1[%c6_1420, %c0_1421, %c0_1422, %c0_1423] : memref<8x16x1x128xf32, #tpu.memory_space<vmem>>, vector<1x1x1x128xf32>
    %1395 = vector.shape_cast %1394 : vector<1x1x1x128xf32> to vector<1x128xf32>
    %1396 = arith.mulf %1024, %1395 : vector<1x128xf32>
    %1397 = arith.addf %1333, %1396 : vector<1x128xf32>
    %c6_1424 = arith.constant 6 : index
    %c1_1425 = arith.constant 1 : index
    %c0_1426 = arith.constant 0 : index
    %c0_1427 = arith.constant 0 : index
    %1398 = vector.load %arg1[%c6_1424, %c1_1425, %c0_1426, %c0_1427] : memref<8x16x1x128xf32, #tpu.memory_space<vmem>>, vector<1x1x1x128xf32>
    %1399 = vector.shape_cast %1398 : vector<1x1x1x128xf32> to vector<1x128xf32>
    %1400 = arith.mulf %1024, %1399 : vector<1x128xf32>
    %1401 = arith.addf %1337, %1400 : vector<1x128xf32>
    %c6_1428 = arith.constant 6 : index
    %c2_1429 = arith.constant 2 : index
    %c0_1430 = arith.constant 0 : index
    %c0_1431 = arith.constant 0 : index
    %1402 = vector.load %arg1[%c6_1428, %c2_1429, %c0_1430, %c0_1431] : memref<8x16x1x128xf32, #tpu.memory_space<vmem>>, vector<1x1x1x128xf32>
    %1403 = vector.shape_cast %1402 : vector<1x1x1x128xf32> to vector<1x128xf32>
    %1404 = arith.mulf %1024, %1403 : vector<1x128xf32>
    %1405 = arith.addf %1341, %1404 : vector<1x128xf32>
    %c6_1432 = arith.constant 6 : index
    %c3_1433 = arith.constant 3 : index
    %c0_1434 = arith.constant 0 : index
    %c0_1435 = arith.constant 0 : index
    %1406 = vector.load %arg1[%c6_1432, %c3_1433, %c0_1434, %c0_1435] : memref<8x16x1x128xf32, #tpu.memory_space<vmem>>, vector<1x1x1x128xf32>
    %1407 = vector.shape_cast %1406 : vector<1x1x1x128xf32> to vector<1x128xf32>
    %1408 = arith.mulf %1024, %1407 : vector<1x128xf32>
    %1409 = arith.addf %1345, %1408 : vector<1x128xf32>
    %c6_1436 = arith.constant 6 : index
    %c4_1437 = arith.constant 4 : index
    %c0_1438 = arith.constant 0 : index
    %c0_1439 = arith.constant 0 : index
    %1410 = vector.load %arg1[%c6_1436, %c4_1437, %c0_1438, %c0_1439] : memref<8x16x1x128xf32, #tpu.memory_space<vmem>>, vector<1x1x1x128xf32>
    %1411 = vector.shape_cast %1410 : vector<1x1x1x128xf32> to vector<1x128xf32>
    %1412 = arith.mulf %1024, %1411 : vector<1x128xf32>
    %1413 = arith.addf %1349, %1412 : vector<1x128xf32>
    %c6_1440 = arith.constant 6 : index
    %c5_1441 = arith.constant 5 : index
    %c0_1442 = arith.constant 0 : index
    %c0_1443 = arith.constant 0 : index
    %1414 = vector.load %arg1[%c6_1440, %c5_1441, %c0_1442, %c0_1443] : memref<8x16x1x128xf32, #tpu.memory_space<vmem>>, vector<1x1x1x128xf32>
    %1415 = vector.shape_cast %1414 : vector<1x1x1x128xf32> to vector<1x128xf32>
    %1416 = arith.mulf %1024, %1415 : vector<1x128xf32>
    %1417 = arith.addf %1353, %1416 : vector<1x128xf32>
    %c6_1444 = arith.constant 6 : index
    %c6_1445 = arith.constant 6 : index
    %c0_1446 = arith.constant 0 : index
    %c0_1447 = arith.constant 0 : index
    %1418 = vector.load %arg1[%c6_1444, %c6_1445, %c0_1446, %c0_1447] : memref<8x16x1x128xf32, #tpu.memory_space<vmem>>, vector<1x1x1x128xf32>
    %1419 = vector.shape_cast %1418 : vector<1x1x1x128xf32> to vector<1x128xf32>
    %1420 = arith.mulf %1024, %1419 : vector<1x128xf32>
    %1421 = arith.addf %1357, %1420 : vector<1x128xf32>
    %c6_1448 = arith.constant 6 : index
    %c7_1449 = arith.constant 7 : index
    %c0_1450 = arith.constant 0 : index
    %c0_1451 = arith.constant 0 : index
    %1422 = vector.load %arg1[%c6_1448, %c7_1449, %c0_1450, %c0_1451] : memref<8x16x1x128xf32, #tpu.memory_space<vmem>>, vector<1x1x1x128xf32>
    %1423 = vector.shape_cast %1422 : vector<1x1x1x128xf32> to vector<1x128xf32>
    %1424 = arith.mulf %1024, %1423 : vector<1x128xf32>
    %1425 = arith.addf %1361, %1424 : vector<1x128xf32>
    %c6_1452 = arith.constant 6 : index
    %c8_1453 = arith.constant 8 : index
    %c0_1454 = arith.constant 0 : index
    %c0_1455 = arith.constant 0 : index
    %1426 = vector.load %arg1[%c6_1452, %c8_1453, %c0_1454, %c0_1455] : memref<8x16x1x128xf32, #tpu.memory_space<vmem>>, vector<1x1x1x128xf32>
    %1427 = vector.shape_cast %1426 : vector<1x1x1x128xf32> to vector<1x128xf32>
    %1428 = arith.mulf %1024, %1427 : vector<1x128xf32>
    %1429 = arith.addf %1365, %1428 : vector<1x128xf32>
    %c6_1456 = arith.constant 6 : index
    %c9_1457 = arith.constant 9 : index
    %c0_1458 = arith.constant 0 : index
    %c0_1459 = arith.constant 0 : index
    %1430 = vector.load %arg1[%c6_1456, %c9_1457, %c0_1458, %c0_1459] : memref<8x16x1x128xf32, #tpu.memory_space<vmem>>, vector<1x1x1x128xf32>
    %1431 = vector.shape_cast %1430 : vector<1x1x1x128xf32> to vector<1x128xf32>
    %1432 = arith.mulf %1024, %1431 : vector<1x128xf32>
    %1433 = arith.addf %1369, %1432 : vector<1x128xf32>
    %c6_1460 = arith.constant 6 : index
    %c10_1461 = arith.constant 10 : index
    %c0_1462 = arith.constant 0 : index
    %c0_1463 = arith.constant 0 : index
    %1434 = vector.load %arg1[%c6_1460, %c10_1461, %c0_1462, %c0_1463] : memref<8x16x1x128xf32, #tpu.memory_space<vmem>>, vector<1x1x1x128xf32>
    %1435 = vector.shape_cast %1434 : vector<1x1x1x128xf32> to vector<1x128xf32>
    %1436 = arith.mulf %1024, %1435 : vector<1x128xf32>
    %1437 = arith.addf %1373, %1436 : vector<1x128xf32>
    %c6_1464 = arith.constant 6 : index
    %c11_1465 = arith.constant 11 : index
    %c0_1466 = arith.constant 0 : index
    %c0_1467 = arith.constant 0 : index
    %1438 = vector.load %arg1[%c6_1464, %c11_1465, %c0_1466, %c0_1467] : memref<8x16x1x128xf32, #tpu.memory_space<vmem>>, vector<1x1x1x128xf32>
    %1439 = vector.shape_cast %1438 : vector<1x1x1x128xf32> to vector<1x128xf32>
    %1440 = arith.mulf %1024, %1439 : vector<1x128xf32>
    %1441 = arith.addf %1377, %1440 : vector<1x128xf32>
    %c6_1468 = arith.constant 6 : index
    %c12_1469 = arith.constant 12 : index
    %c0_1470 = arith.constant 0 : index
    %c0_1471 = arith.constant 0 : index
    %1442 = vector.load %arg1[%c6_1468, %c12_1469, %c0_1470, %c0_1471] : memref<8x16x1x128xf32, #tpu.memory_space<vmem>>, vector<1x1x1x128xf32>
    %1443 = vector.shape_cast %1442 : vector<1x1x1x128xf32> to vector<1x128xf32>
    %1444 = arith.mulf %1024, %1443 : vector<1x128xf32>
    %1445 = arith.addf %1381, %1444 : vector<1x128xf32>
    %c6_1472 = arith.constant 6 : index
    %c13_1473 = arith.constant 13 : index
    %c0_1474 = arith.constant 0 : index
    %c0_1475 = arith.constant 0 : index
    %1446 = vector.load %arg1[%c6_1472, %c13_1473, %c0_1474, %c0_1475] : memref<8x16x1x128xf32, #tpu.memory_space<vmem>>, vector<1x1x1x128xf32>
    %1447 = vector.shape_cast %1446 : vector<1x1x1x128xf32> to vector<1x128xf32>
    %1448 = arith.mulf %1024, %1447 : vector<1x128xf32>
    %1449 = arith.addf %1385, %1448 : vector<1x128xf32>
    %c6_1476 = arith.constant 6 : index
    %c14_1477 = arith.constant 14 : index
    %c0_1478 = arith.constant 0 : index
    %c0_1479 = arith.constant 0 : index
    %1450 = vector.load %arg1[%c6_1476, %c14_1477, %c0_1478, %c0_1479] : memref<8x16x1x128xf32, #tpu.memory_space<vmem>>, vector<1x1x1x128xf32>
    %1451 = vector.shape_cast %1450 : vector<1x1x1x128xf32> to vector<1x128xf32>
    %1452 = arith.mulf %1024, %1451 : vector<1x128xf32>
    %1453 = arith.addf %1389, %1452 : vector<1x128xf32>
    %c6_1480 = arith.constant 6 : index
    %c15_1481 = arith.constant 15 : index
    %c0_1482 = arith.constant 0 : index
    %c0_1483 = arith.constant 0 : index
    %1454 = vector.load %arg1[%c6_1480, %c15_1481, %c0_1482, %c0_1483] : memref<8x16x1x128xf32, #tpu.memory_space<vmem>>, vector<1x1x1x128xf32>
    %1455 = vector.shape_cast %1454 : vector<1x1x1x128xf32> to vector<1x128xf32>
    %1456 = arith.mulf %1024, %1455 : vector<1x128xf32>
    %1457 = arith.addf %1393, %1456 : vector<1x128xf32>
    %c7_1484 = arith.constant 7 : index
    %c0_1485 = arith.constant 0 : index
    %c0_1486 = arith.constant 0 : index
    %c0_1487 = arith.constant 0 : index
    %1458 = vector.load %arg1[%c7_1484, %c0_1485, %c0_1486, %c0_1487] : memref<8x16x1x128xf32, #tpu.memory_space<vmem>>, vector<1x1x1x128xf32>
    %1459 = vector.shape_cast %1458 : vector<1x1x1x128xf32> to vector<1x128xf32>
    %1460 = arith.mulf %1025, %1459 : vector<1x128xf32>
    %1461 = arith.addf %1397, %1460 : vector<1x128xf32>
    %c7_1488 = arith.constant 7 : index
    %c1_1489 = arith.constant 1 : index
    %c0_1490 = arith.constant 0 : index
    %c0_1491 = arith.constant 0 : index
    %1462 = vector.load %arg1[%c7_1488, %c1_1489, %c0_1490, %c0_1491] : memref<8x16x1x128xf32, #tpu.memory_space<vmem>>, vector<1x1x1x128xf32>
    %1463 = vector.shape_cast %1462 : vector<1x1x1x128xf32> to vector<1x128xf32>
    %1464 = arith.mulf %1025, %1463 : vector<1x128xf32>
    %1465 = arith.addf %1401, %1464 : vector<1x128xf32>
    %c7_1492 = arith.constant 7 : index
    %c2_1493 = arith.constant 2 : index
    %c0_1494 = arith.constant 0 : index
    %c0_1495 = arith.constant 0 : index
    %1466 = vector.load %arg1[%c7_1492, %c2_1493, %c0_1494, %c0_1495] : memref<8x16x1x128xf32, #tpu.memory_space<vmem>>, vector<1x1x1x128xf32>
    %1467 = vector.shape_cast %1466 : vector<1x1x1x128xf32> to vector<1x128xf32>
    %1468 = arith.mulf %1025, %1467 : vector<1x128xf32>
    %1469 = arith.addf %1405, %1468 : vector<1x128xf32>
    %c7_1496 = arith.constant 7 : index
    %c3_1497 = arith.constant 3 : index
    %c0_1498 = arith.constant 0 : index
    %c0_1499 = arith.constant 0 : index
    %1470 = vector.load %arg1[%c7_1496, %c3_1497, %c0_1498, %c0_1499] : memref<8x16x1x128xf32, #tpu.memory_space<vmem>>, vector<1x1x1x128xf32>
    %1471 = vector.shape_cast %1470 : vector<1x1x1x128xf32> to vector<1x128xf32>
    %1472 = arith.mulf %1025, %1471 : vector<1x128xf32>
    %1473 = arith.addf %1409, %1472 : vector<1x128xf32>
    %c7_1500 = arith.constant 7 : index
    %c4_1501 = arith.constant 4 : index
    %c0_1502 = arith.constant 0 : index
    %c0_1503 = arith.constant 0 : index
    %1474 = vector.load %arg1[%c7_1500, %c4_1501, %c0_1502, %c0_1503] : memref<8x16x1x128xf32, #tpu.memory_space<vmem>>, vector<1x1x1x128xf32>
    %1475 = vector.shape_cast %1474 : vector<1x1x1x128xf32> to vector<1x128xf32>
    %1476 = arith.mulf %1025, %1475 : vector<1x128xf32>
    %1477 = arith.addf %1413, %1476 : vector<1x128xf32>
    %c7_1504 = arith.constant 7 : index
    %c5_1505 = arith.constant 5 : index
    %c0_1506 = arith.constant 0 : index
    %c0_1507 = arith.constant 0 : index
    %1478 = vector.load %arg1[%c7_1504, %c5_1505, %c0_1506, %c0_1507] : memref<8x16x1x128xf32, #tpu.memory_space<vmem>>, vector<1x1x1x128xf32>
    %1479 = vector.shape_cast %1478 : vector<1x1x1x128xf32> to vector<1x128xf32>
    %1480 = arith.mulf %1025, %1479 : vector<1x128xf32>
    %1481 = arith.addf %1417, %1480 : vector<1x128xf32>
    %c7_1508 = arith.constant 7 : index
    %c6_1509 = arith.constant 6 : index
    %c0_1510 = arith.constant 0 : index
    %c0_1511 = arith.constant 0 : index
    %1482 = vector.load %arg1[%c7_1508, %c6_1509, %c0_1510, %c0_1511] : memref<8x16x1x128xf32, #tpu.memory_space<vmem>>, vector<1x1x1x128xf32>
    %1483 = vector.shape_cast %1482 : vector<1x1x1x128xf32> to vector<1x128xf32>
    %1484 = arith.mulf %1025, %1483 : vector<1x128xf32>
    %1485 = arith.addf %1421, %1484 : vector<1x128xf32>
    %c7_1512 = arith.constant 7 : index
    %c7_1513 = arith.constant 7 : index
    %c0_1514 = arith.constant 0 : index
    %c0_1515 = arith.constant 0 : index
    %1486 = vector.load %arg1[%c7_1512, %c7_1513, %c0_1514, %c0_1515] : memref<8x16x1x128xf32, #tpu.memory_space<vmem>>, vector<1x1x1x128xf32>
    %1487 = vector.shape_cast %1486 : vector<1x1x1x128xf32> to vector<1x128xf32>
    %1488 = arith.mulf %1025, %1487 : vector<1x128xf32>
    %1489 = arith.addf %1425, %1488 : vector<1x128xf32>
    %c7_1516 = arith.constant 7 : index
    %c8_1517 = arith.constant 8 : index
    %c0_1518 = arith.constant 0 : index
    %c0_1519 = arith.constant 0 : index
    %1490 = vector.load %arg1[%c7_1516, %c8_1517, %c0_1518, %c0_1519] : memref<8x16x1x128xf32, #tpu.memory_space<vmem>>, vector<1x1x1x128xf32>
    %1491 = vector.shape_cast %1490 : vector<1x1x1x128xf32> to vector<1x128xf32>
    %1492 = arith.mulf %1025, %1491 : vector<1x128xf32>
    %1493 = arith.addf %1429, %1492 : vector<1x128xf32>
    %c7_1520 = arith.constant 7 : index
    %c9_1521 = arith.constant 9 : index
    %c0_1522 = arith.constant 0 : index
    %c0_1523 = arith.constant 0 : index
    %1494 = vector.load %arg1[%c7_1520, %c9_1521, %c0_1522, %c0_1523] : memref<8x16x1x128xf32, #tpu.memory_space<vmem>>, vector<1x1x1x128xf32>
    %1495 = vector.shape_cast %1494 : vector<1x1x1x128xf32> to vector<1x128xf32>
    %1496 = arith.mulf %1025, %1495 : vector<1x128xf32>
    %1497 = arith.addf %1433, %1496 : vector<1x128xf32>
    %c7_1524 = arith.constant 7 : index
    %c10_1525 = arith.constant 10 : index
    %c0_1526 = arith.constant 0 : index
    %c0_1527 = arith.constant 0 : index
    %1498 = vector.load %arg1[%c7_1524, %c10_1525, %c0_1526, %c0_1527] : memref<8x16x1x128xf32, #tpu.memory_space<vmem>>, vector<1x1x1x128xf32>
    %1499 = vector.shape_cast %1498 : vector<1x1x1x128xf32> to vector<1x128xf32>
    %1500 = arith.mulf %1025, %1499 : vector<1x128xf32>
    %1501 = arith.addf %1437, %1500 : vector<1x128xf32>
    %c7_1528 = arith.constant 7 : index
    %c11_1529 = arith.constant 11 : index
    %c0_1530 = arith.constant 0 : index
    %c0_1531 = arith.constant 0 : index
    %1502 = vector.load %arg1[%c7_1528, %c11_1529, %c0_1530, %c0_1531] : memref<8x16x1x128xf32, #tpu.memory_space<vmem>>, vector<1x1x1x128xf32>
    %1503 = vector.shape_cast %1502 : vector<1x1x1x128xf32> to vector<1x128xf32>
    %1504 = arith.mulf %1025, %1503 : vector<1x128xf32>
    %1505 = arith.addf %1441, %1504 : vector<1x128xf32>
    %c7_1532 = arith.constant 7 : index
    %c12_1533 = arith.constant 12 : index
    %c0_1534 = arith.constant 0 : index
    %c0_1535 = arith.constant 0 : index
    %1506 = vector.load %arg1[%c7_1532, %c12_1533, %c0_1534, %c0_1535] : memref<8x16x1x128xf32, #tpu.memory_space<vmem>>, vector<1x1x1x128xf32>
    %1507 = vector.shape_cast %1506 : vector<1x1x1x128xf32> to vector<1x128xf32>
    %1508 = arith.mulf %1025, %1507 : vector<1x128xf32>
    %1509 = arith.addf %1445, %1508 : vector<1x128xf32>
    %c7_1536 = arith.constant 7 : index
    %c13_1537 = arith.constant 13 : index
    %c0_1538 = arith.constant 0 : index
    %c0_1539 = arith.constant 0 : index
    %1510 = vector.load %arg1[%c7_1536, %c13_1537, %c0_1538, %c0_1539] : memref<8x16x1x128xf32, #tpu.memory_space<vmem>>, vector<1x1x1x128xf32>
    %1511 = vector.shape_cast %1510 : vector<1x1x1x128xf32> to vector<1x128xf32>
    %1512 = arith.mulf %1025, %1511 : vector<1x128xf32>
    %1513 = arith.addf %1449, %1512 : vector<1x128xf32>
    %c7_1540 = arith.constant 7 : index
    %c14_1541 = arith.constant 14 : index
    %c0_1542 = arith.constant 0 : index
    %c0_1543 = arith.constant 0 : index
    %1514 = vector.load %arg1[%c7_1540, %c14_1541, %c0_1542, %c0_1543] : memref<8x16x1x128xf32, #tpu.memory_space<vmem>>, vector<1x1x1x128xf32>
    %1515 = vector.shape_cast %1514 : vector<1x1x1x128xf32> to vector<1x128xf32>
    %1516 = arith.mulf %1025, %1515 : vector<1x128xf32>
    %1517 = arith.addf %1453, %1516 : vector<1x128xf32>
    %c7_1544 = arith.constant 7 : index
    %c15_1545 = arith.constant 15 : index
    %c0_1546 = arith.constant 0 : index
    %c0_1547 = arith.constant 0 : index
    %1518 = vector.load %arg1[%c7_1544, %c15_1545, %c0_1546, %c0_1547] : memref<8x16x1x128xf32, #tpu.memory_space<vmem>>, vector<1x1x1x128xf32>
    %1519 = vector.shape_cast %1518 : vector<1x1x1x128xf32> to vector<1x128xf32>
    %1520 = arith.mulf %1025, %1519 : vector<1x128xf32>
    %1521 = arith.addf %1457, %1520 : vector<1x128xf32>
    %1522 = arith.mulf %1461, %1461 : vector<1x128xf32>
    %1523 = arith.mulf %1465, %1465 : vector<1x128xf32>
    %1524 = arith.addf %1522, %1523 : vector<1x128xf32>
    %1525 = arith.mulf %1469, %1469 : vector<1x128xf32>
    %1526 = arith.addf %1524, %1525 : vector<1x128xf32>
    %1527 = arith.mulf %1473, %1473 : vector<1x128xf32>
    %1528 = arith.addf %1526, %1527 : vector<1x128xf32>
    %1529 = arith.mulf %1477, %1477 : vector<1x128xf32>
    %1530 = arith.addf %1528, %1529 : vector<1x128xf32>
    %1531 = arith.mulf %1481, %1481 : vector<1x128xf32>
    %1532 = arith.addf %1530, %1531 : vector<1x128xf32>
    %1533 = arith.mulf %1485, %1485 : vector<1x128xf32>
    %1534 = arith.addf %1532, %1533 : vector<1x128xf32>
    %1535 = arith.mulf %1489, %1489 : vector<1x128xf32>
    %1536 = arith.addf %1534, %1535 : vector<1x128xf32>
    %1537 = arith.mulf %1493, %1493 : vector<1x128xf32>
    %1538 = arith.addf %1536, %1537 : vector<1x128xf32>
    %1539 = arith.mulf %1497, %1497 : vector<1x128xf32>
    %1540 = arith.addf %1538, %1539 : vector<1x128xf32>
    %1541 = arith.mulf %1501, %1501 : vector<1x128xf32>
    %1542 = arith.addf %1540, %1541 : vector<1x128xf32>
    %1543 = arith.mulf %1505, %1505 : vector<1x128xf32>
    %1544 = arith.addf %1542, %1543 : vector<1x128xf32>
    %1545 = arith.mulf %1509, %1509 : vector<1x128xf32>
    %1546 = arith.addf %1544, %1545 : vector<1x128xf32>
    %1547 = arith.mulf %1513, %1513 : vector<1x128xf32>
    %1548 = arith.addf %1546, %1547 : vector<1x128xf32>
    %1549 = arith.mulf %1517, %1517 : vector<1x128xf32>
    %1550 = arith.addf %1548, %1549 : vector<1x128xf32>
    %1551 = arith.mulf %1521, %1521 : vector<1x128xf32>
    %1552 = arith.addf %1550, %1551 : vector<1x128xf32>
    %cst_1548 = arith.constant 1.000000e+00 : f32
    %1553 = vector.broadcast %cst_1548 : f32 to vector<1x128xf32>
    %1554 = arith.addf %1552, %1553 : vector<1x128xf32>
    %1555 = tpu.reciprocal %1554 {approx = true} : vector<1x128xf32> -> vector<1x128xf32>
    %1556 = arith.mulf %1554, %1555 : vector<1x128xf32>
    %cst_1549 = arith.constant 2.000000e+00 : f32
    %1557 = vector.broadcast %cst_1549 : f32 to vector<1x128xf32>
    %1558 = arith.subf %1557, %1556 : vector<1x128xf32>
    %1559 = arith.mulf %1555, %1558 : vector<1x128xf32>
    %1560 = arith.mulf %1552, %1559 : vector<1x128xf32>
    %cst_1550 = arith.constant 9.99999993E-9 : f32
    %1561 = vector.broadcast %cst_1550 : f32 to vector<1x128xf32>
    %1562 = arith.addf %1552, %1561 : vector<1x128xf32>
    %1563 = tpu.reciprocal %1562 {approx = true} : vector<1x128xf32> -> vector<1x128xf32>
    %1564 = arith.mulf %1562, %1563 : vector<1x128xf32>
    %cst_1551 = arith.constant 2.000000e+00 : f32
    %1565 = vector.broadcast %cst_1551 : f32 to vector<1x128xf32>
    %1566 = arith.subf %1565, %1564 : vector<1x128xf32>
    %1567 = arith.mulf %1563, %1566 : vector<1x128xf32>
    %1568 = arith.mulf %1560, %1567 : vector<1x128xf32>
    %1569 = arith.mulf %1568, %1461 : vector<1x128xf32>
    %1570 = arith.mulf %1568, %1465 : vector<1x128xf32>
    %1571 = arith.mulf %1568, %1469 : vector<1x128xf32>
    %1572 = arith.mulf %1568, %1473 : vector<1x128xf32>
    %1573 = arith.mulf %1568, %1477 : vector<1x128xf32>
    %1574 = arith.mulf %1568, %1481 : vector<1x128xf32>
    %1575 = arith.mulf %1568, %1485 : vector<1x128xf32>
    %1576 = arith.mulf %1568, %1489 : vector<1x128xf32>
    %1577 = arith.mulf %1568, %1493 : vector<1x128xf32>
    %1578 = arith.mulf %1568, %1497 : vector<1x128xf32>
    %1579 = arith.mulf %1568, %1501 : vector<1x128xf32>
    %1580 = arith.mulf %1568, %1505 : vector<1x128xf32>
    %1581 = arith.mulf %1568, %1509 : vector<1x128xf32>
    %1582 = arith.mulf %1568, %1513 : vector<1x128xf32>
    %1583 = arith.mulf %1568, %1517 : vector<1x128xf32>
    %1584 = arith.mulf %1568, %1521 : vector<1x128xf32>
    %c0_1552 = arith.constant 0 : index
    %c0_1553 = arith.constant 0 : index
    %c0_1554 = arith.constant 0 : index
    %1585 = vector.load %arg2[%c0_1552, %c0_1553, %c0_1554] : memref<16x1x128xf32, #tpu.memory_space<vmem>>, vector<1x1x128xf32>
    %1586 = vector.shape_cast %1585 : vector<1x1x128xf32> to vector<1x128xf32>
    %1587 = vector.shape_cast %1569 : vector<1x128xf32> to vector<1x1x128xf32>
    tpu.vector_store %arg2[%c0_1552, %c0_1553, %c0_1554], %1587 {strides = array<i32>} : memref<16x1x128xf32, #tpu.memory_space<vmem>>, vector<1x1x128xf32>,
    %c1_1555 = arith.constant 1 : index
    %c0_1556 = arith.constant 0 : index
    %c0_1557 = arith.constant 0 : index
    %1588 = vector.load %arg2[%c1_1555, %c0_1556, %c0_1557] : memref<16x1x128xf32, #tpu.memory_space<vmem>>, vector<1x1x128xf32>
    %1589 = vector.shape_cast %1588 : vector<1x1x128xf32> to vector<1x128xf32>
    %1590 = vector.shape_cast %1570 : vector<1x128xf32> to vector<1x1x128xf32>
    tpu.vector_store %arg2[%c1_1555, %c0_1556, %c0_1557], %1590 {strides = array<i32>} : memref<16x1x128xf32, #tpu.memory_space<vmem>>, vector<1x1x128xf32>,
    %c2_1558 = arith.constant 2 : index
    %c0_1559 = arith.constant 0 : index
    %c0_1560 = arith.constant 0 : index
    %1591 = vector.load %arg2[%c2_1558, %c0_1559, %c0_1560] : memref<16x1x128xf32, #tpu.memory_space<vmem>>, vector<1x1x128xf32>
    %1592 = vector.shape_cast %1591 : vector<1x1x128xf32> to vector<1x128xf32>
    %1593 = vector.shape_cast %1571 : vector<1x128xf32> to vector<1x1x128xf32>
    tpu.vector_store %arg2[%c2_1558, %c0_1559, %c0_1560], %1593 {strides = array<i32>} : memref<16x1x128xf32, #tpu.memory_space<vmem>>, vector<1x1x128xf32>,
    %c3_1561 = arith.constant 3 : index
    %c0_1562 = arith.constant 0 : index
    %c0_1563 = arith.constant 0 : index
    %1594 = vector.load %arg2[%c3_1561, %c0_1562, %c0_1563] : memref<16x1x128xf32, #tpu.memory_space<vmem>>, vector<1x1x128xf32>
    %1595 = vector.shape_cast %1594 : vector<1x1x128xf32> to vector<1x128xf32>
    %1596 = vector.shape_cast %1572 : vector<1x128xf32> to vector<1x1x128xf32>
    tpu.vector_store %arg2[%c3_1561, %c0_1562, %c0_1563], %1596 {strides = array<i32>} : memref<16x1x128xf32, #tpu.memory_space<vmem>>, vector<1x1x128xf32>,
    %c4_1564 = arith.constant 4 : index
    %c0_1565 = arith.constant 0 : index
    %c0_1566 = arith.constant 0 : index
    %1597 = vector.load %arg2[%c4_1564, %c0_1565, %c0_1566] : memref<16x1x128xf32, #tpu.memory_space<vmem>>, vector<1x1x128xf32>
    %1598 = vector.shape_cast %1597 : vector<1x1x128xf32> to vector<1x128xf32>
    %1599 = vector.shape_cast %1573 : vector<1x128xf32> to vector<1x1x128xf32>
    tpu.vector_store %arg2[%c4_1564, %c0_1565, %c0_1566], %1599 {strides = array<i32>} : memref<16x1x128xf32, #tpu.memory_space<vmem>>, vector<1x1x128xf32>,
    %c5_1567 = arith.constant 5 : index
    %c0_1568 = arith.constant 0 : index
    %c0_1569 = arith.constant 0 : index
    %1600 = vector.load %arg2[%c5_1567, %c0_1568, %c0_1569] : memref<16x1x128xf32, #tpu.memory_space<vmem>>, vector<1x1x128xf32>
    %1601 = vector.shape_cast %1600 : vector<1x1x128xf32> to vector<1x128xf32>
    %1602 = vector.shape_cast %1574 : vector<1x128xf32> to vector<1x1x128xf32>
    tpu.vector_store %arg2[%c5_1567, %c0_1568, %c0_1569], %1602 {strides = array<i32>} : memref<16x1x128xf32, #tpu.memory_space<vmem>>, vector<1x1x128xf32>,
    %c6_1570 = arith.constant 6 : index
    %c0_1571 = arith.constant 0 : index
    %c0_1572 = arith.constant 0 : index
    %1603 = vector.load %arg2[%c6_1570, %c0_1571, %c0_1572] : memref<16x1x128xf32, #tpu.memory_space<vmem>>, vector<1x1x128xf32>
    %1604 = vector.shape_cast %1603 : vector<1x1x128xf32> to vector<1x128xf32>
    %1605 = vector.shape_cast %1575 : vector<1x128xf32> to vector<1x1x128xf32>
    tpu.vector_store %arg2[%c6_1570, %c0_1571, %c0_1572], %1605 {strides = array<i32>} : memref<16x1x128xf32, #tpu.memory_space<vmem>>, vector<1x1x128xf32>,
    %c7_1573 = arith.constant 7 : index
    %c0_1574 = arith.constant 0 : index
    %c0_1575 = arith.constant 0 : index
    %1606 = vector.load %arg2[%c7_1573, %c0_1574, %c0_1575] : memref<16x1x128xf32, #tpu.memory_space<vmem>>, vector<1x1x128xf32>
    %1607 = vector.shape_cast %1606 : vector<1x1x128xf32> to vector<1x128xf32>
    %1608 = vector.shape_cast %1576 : vector<1x128xf32> to vector<1x1x128xf32>
    tpu.vector_store %arg2[%c7_1573, %c0_1574, %c0_1575], %1608 {strides = array<i32>} : memref<16x1x128xf32, #tpu.memory_space<vmem>>, vector<1x1x128xf32>,
    %c8_1576 = arith.constant 8 : index
    %c0_1577 = arith.constant 0 : index
    %c0_1578 = arith.constant 0 : index
    %1609 = vector.load %arg2[%c8_1576, %c0_1577, %c0_1578] : memref<16x1x128xf32, #tpu.memory_space<vmem>>, vector<1x1x128xf32>
    %1610 = vector.shape_cast %1609 : vector<1x1x128xf32> to vector<1x128xf32>
    %1611 = vector.shape_cast %1577 : vector<1x128xf32> to vector<1x1x128xf32>
    tpu.vector_store %arg2[%c8_1576, %c0_1577, %c0_1578], %1611 {strides = array<i32>} : memref<16x1x128xf32, #tpu.memory_space<vmem>>, vector<1x1x128xf32>,
    %c9_1579 = arith.constant 9 : index
    %c0_1580 = arith.constant 0 : index
    %c0_1581 = arith.constant 0 : index
    %1612 = vector.load %arg2[%c9_1579, %c0_1580, %c0_1581] : memref<16x1x128xf32, #tpu.memory_space<vmem>>, vector<1x1x128xf32>
    %1613 = vector.shape_cast %1612 : vector<1x1x128xf32> to vector<1x128xf32>
    %1614 = vector.shape_cast %1578 : vector<1x128xf32> to vector<1x1x128xf32>
    tpu.vector_store %arg2[%c9_1579, %c0_1580, %c0_1581], %1614 {strides = array<i32>} : memref<16x1x128xf32, #tpu.memory_space<vmem>>, vector<1x1x128xf32>,
    %c10_1582 = arith.constant 10 : index
    %c0_1583 = arith.constant 0 : index
    %c0_1584 = arith.constant 0 : index
    %1615 = vector.load %arg2[%c10_1582, %c0_1583, %c0_1584] : memref<16x1x128xf32, #tpu.memory_space<vmem>>, vector<1x1x128xf32>
    %1616 = vector.shape_cast %1615 : vector<1x1x128xf32> to vector<1x128xf32>
    %1617 = vector.shape_cast %1579 : vector<1x128xf32> to vector<1x1x128xf32>
    tpu.vector_store %arg2[%c10_1582, %c0_1583, %c0_1584], %1617 {strides = array<i32>} : memref<16x1x128xf32, #tpu.memory_space<vmem>>, vector<1x1x128xf32>,
    %c11_1585 = arith.constant 11 : index
    %c0_1586 = arith.constant 0 : index
    %c0_1587 = arith.constant 0 : index
    %1618 = vector.load %arg2[%c11_1585, %c0_1586, %c0_1587] : memref<16x1x128xf32, #tpu.memory_space<vmem>>, vector<1x1x128xf32>
    %1619 = vector.shape_cast %1618 : vector<1x1x128xf32> to vector<1x128xf32>
    %1620 = vector.shape_cast %1580 : vector<1x128xf32> to vector<1x1x128xf32>
    tpu.vector_store %arg2[%c11_1585, %c0_1586, %c0_1587], %1620 {strides = array<i32>} : memref<16x1x128xf32, #tpu.memory_space<vmem>>, vector<1x1x128xf32>,
    %c12_1588 = arith.constant 12 : index
    %c0_1589 = arith.constant 0 : index
    %c0_1590 = arith.constant 0 : index
    %1621 = vector.load %arg2[%c12_1588, %c0_1589, %c0_1590] : memref<16x1x128xf32, #tpu.memory_space<vmem>>, vector<1x1x128xf32>
    %1622 = vector.shape_cast %1621 : vector<1x1x128xf32> to vector<1x128xf32>
    %1623 = vector.shape_cast %1581 : vector<1x128xf32> to vector<1x1x128xf32>
    tpu.vector_store %arg2[%c12_1588, %c0_1589, %c0_1590], %1623 {strides = array<i32>} : memref<16x1x128xf32, #tpu.memory_space<vmem>>, vector<1x1x128xf32>,
    %c13_1591 = arith.constant 13 : index
    %c0_1592 = arith.constant 0 : index
    %c0_1593 = arith.constant 0 : index
    %1624 = vector.load %arg2[%c13_1591, %c0_1592, %c0_1593] : memref<16x1x128xf32, #tpu.memory_space<vmem>>, vector<1x1x128xf32>
    %1625 = vector.shape_cast %1624 : vector<1x1x128xf32> to vector<1x128xf32>
    %1626 = vector.shape_cast %1582 : vector<1x128xf32> to vector<1x1x128xf32>
    tpu.vector_store %arg2[%c13_1591, %c0_1592, %c0_1593], %1626 {strides = array<i32>} : memref<16x1x128xf32, #tpu.memory_space<vmem>>, vector<1x1x128xf32>,
    %c14_1594 = arith.constant 14 : index
    %c0_1595 = arith.constant 0 : index
    %c0_1596 = arith.constant 0 : index
    %1627 = vector.load %arg2[%c14_1594, %c0_1595, %c0_1596] : memref<16x1x128xf32, #tpu.memory_space<vmem>>, vector<1x1x128xf32>
    %1628 = vector.shape_cast %1627 : vector<1x1x128xf32> to vector<1x128xf32>
    %1629 = vector.shape_cast %1583 : vector<1x128xf32> to vector<1x1x128xf32>
    tpu.vector_store %arg2[%c14_1594, %c0_1595, %c0_1596], %1629 {strides = array<i32>} : memref<16x1x128xf32, #tpu.memory_space<vmem>>, vector<1x1x128xf32>,
    %c15_1597 = arith.constant 15 : index
    %c0_1598 = arith.constant 0 : index
    %c0_1599 = arith.constant 0 : index
    %1630 = vector.load %arg2[%c15_1597, %c0_1598, %c0_1599] : memref<16x1x128xf32, #tpu.memory_space<vmem>>, vector<1x1x128xf32>
    %1631 = vector.shape_cast %1630 : vector<1x1x128xf32> to vector<1x128xf32>
    %1632 = vector.shape_cast %1584 : vector<1x128xf32> to vector<1x1x128xf32>
    tpu.vector_store %arg2[%c15_1597, %c0_1598, %c0_1599], %1632 {strides = array<i32>} : memref<16x1x128xf32, #tpu.memory_space<vmem>>, vector<1x1x128xf32>,
    return
  }
  func.func @transform_0(%arg0: i32) -> (i32, i32, i32, i32) {
    %c0_i32 = arith.constant 0 : i32
    %c0_i32_0 = arith.constant 0 : i32
    %c0_i32_1 = arith.constant 0 : i32
    %c0_i32_2 = arith.constant 0 : i32
    return %c0_i32, %c0_i32_0, %arg0, %c0_i32_1 : i32, i32, i32, i32
  }
  func.func @transform_1(%arg0: i32) -> (i32, i32, i32) {
    %c0_i32 = arith.constant 0 : i32
    %c0_i32_0 = arith.constant 0 : i32
    %c0_i32_1 = arith.constant 0 : i32
    return %c0_i32, %arg0, %c0_i32_0 : i32, i32, i32
  }
}

</mosaic_0001>

<bundles_post_ra>
// kernel: tpu_custom_call.1
= control target key start
LH: loop header
LB: loop body
LE: loop exit
PB: predicated region body
PF: predicated region fallthrough
CT: control target
= control target key end

     0   :  { %6 = vsyncpa [#allocation3], 0  ;;  %s2363_s0 = inlined_call_operand.hbm [shape: f32[8,16,1,128], index: 0, kind: input, shape index: {}]   ;;  %s2364_s1 = inlined_call_operand.hbm [shape: f32[16,1,128], index: 1, kind: output, shape index: {}]  }
   0x1   :  { %7 = vsyncpa [#allocation4], 0  ;;  %s12_s8 = sshll.u32 %s2363_s0, 4  ;;  %s1332_s9 = smov [#allocation2]   ;;  %s13_s8 = int_to_ptr.hbm [resolvable:$true] %s12_s8 }
   0x2   :  { %s14_s10 = sshll.u32 %s1332_s9, 4  ;;  %s1333_s11 = smov 16   ;;  %s15_s10 = int_to_ptr.vmem [resolvable:$true] %s14_s10 }
   0x3   :  { %s1334_s12 = smov 1  }
   0x4   :  { %20 = dma.hbm_to_vmem [thread:$0]  %s13_s8, 2048, %s15_s10, [#allocation3], %s1333_s11, %s1333_s11, %s1334_s12  }
   0x5   :  { %1328 = dma.done.wait [#allocation3], 2048  }
   0x6   :  { %1329 = vsyncadd [#allocation3], 4294965248  ;;  %v1352_v0 = vld [vmem:[#allocation2] sm:$0x1]  ;;  %v1354_v1 = vld [vmem:[#allocation2 + $0x1] sm:$0x1] }
   0x7   :  { %v1356_v2 = vld [vmem:[#allocation2 + $0x2] sm:$0x1]  ;;  %v1358_v3 = vld [vmem:[#allocation2 + $0x10] sm:$0x1]  ;;  %v1360_v4 = vld [vmem:[#allocation2 + $0x11] sm:$0x1] }
   0x8   :  { %v1362_v5 = vld [vmem:[#allocation2 + $0x12] sm:$0x1]  ;;  %v1364_v6 = vld [vmem:[#allocation2 + $0x3] sm:$0x1]  ;;  %v1366_v7 = vld [vmem:[#allocation2 + $0x13] sm:$0x1]  ;;  %v58_v9 = vadd.f32 %v1358_v3, %v1352_v0  ;;  %v61_v10 = vadd.f32 %v1360_v4, %v1354_v1 }
   0x9   :  { %v1368_v8 = vld [vmem:[#allocation2 + $0x4] sm:$0x1]  ;;  %v64_v11 = vadd.f32 %v1362_v5, %v1356_v2  ;;  %v1376_v12 = vld [vmem:[#allocation2 + $0x14] sm:$0x1]  ;;  %v1378_v13 = vld [vmem:[#allocation2 + $0x20] sm:$0x1]  ;;  %v67_v16 = vadd.f32 %v1366_v7, %v1364_v6 }
   0xa   :  { %v1380_v14 = vld [vmem:[#allocation2 + $0x21] sm:$0x1]  ;;  %v1382_v15 = vld [vmem:[#allocation2 + $0x22] sm:$0x1]  ;;  %v1386_v17 = vld [vmem:[#allocation2 + $0x5] sm:$0x1]  ;;  %v70_v21 = vadd.f32 %v1376_v12, %v1368_v8  ;;  %v106_v23 = vadd.f32 %v1378_v13, %v58_v9 }
   0xb   :  { %v1388_v18 = vld [vmem:[#allocation2 + $0x15] sm:$0x1]  ;;  %v1390_v19 = vld [vmem:[#allocation2 + $0x23] sm:$0x1]  ;;  %v1392_v20 = vld [vmem:[#allocation2 + $0x6] sm:$0x1]  ;;  %v109_v24 = vadd.f32 %v1380_v14, %v61_v10  ;;  %v112_v25 = vadd.f32 %v1382_v15, %v64_v11 }
   0xc   :  { %v1396_v22 = vld [vmem:[#allocation2 + $0x16] sm:$0x1]  ;;  %v1401_v26 = vld [vmem:[#allocation2 + $0x24] sm:$0x1]  ;;  %v1403_v27 = vld [vmem:[#allocation2 + $0x30] sm:$0x1]  ;;  %v73_v32 = vadd.f32 %v1388_v18, %v1386_v17  ;;  %v115_v33 = vadd.f32 %v1390_v19, %v67_v16 }
   0xd   :  { %2464 = vst [vmem:[#allocation8_spill] sm:$0xff] %v1403_v27  ;;  %v1405_v28 = vld [vmem:[#allocation2 + $0x31] sm:$0x1]  ;;  %v1407_v29 = vld [vmem:[#allocation2 + $0x32] sm:$0x1]  ;;  %v76_v34 = vadd.f32 %v1396_v22, %v1392_v20  ;;  %v118_v40 = vadd.f32 %v1401_v26, %v70_v21  ;;  %v154_v42 = vadd.f32 %v1403_v27, %v106_v23  ;;  %s1335_s0 = smov [#allocation5]  }
   0xe   :  { %2465 = vst [vmem:[#allocation9_spill] sm:$0xff] %v1405_v28  ;;  %v1409_v30 = vld [vmem:[#allocation2 + $0x7] sm:$0x1]  ;;  %v1411_v31 = vld [vmem:[#allocation2 + $0x8] sm:$0x1]  ;;  %v157_v43 = vadd.f32 %v1405_v28, %v109_v24  ;;  %v160_v44 = vadd.f32 %v1407_v29, %v112_v25  ;;  %s1107_s13 = sshll.u32 %s1335_s0, 4  ;;  %s1108_s13 = int_to_ptr.vmem [resolvable:$true] %s1107_s13 }
   0xf   :  { %2466 = vst [vmem:[#allocation10_spill] sm:$0xff] %v1407_v29  ;;  %v1418_v35 = vld [vmem:[#allocation2 + $0x17] sm:$0x1]  ;;  %v1420_v36 = vld [vmem:[#allocation2 + $0x25] sm:$0x1]  ;;  %s1109_s16 = sshll.u32 %s2364_s1, 4  ;;  %s1110_s16 = int_to_ptr.hbm [resolvable:$true] %s1109_s16 }
  0x10   :  { %2467 = vst [vmem:[#allocation11_spill] sm:$0xff] %v1418_v35  ;;  %v1422_v37 = vld [vmem:[#allocation2 + $0x33] sm:$0x1]  ;;  %v1424_v38 = vld [vmem:[#allocation2 + $0x9] sm:$0x1]  ;;  %v79_v50 = vadd.f32 %v1418_v35, %v1409_v30  ;;  %v121_v53 = vadd.f32 %v1420_v36, %v73_v32 }
  0x11   :  { %2468 = vst [vmem:[#allocation12_spill] sm:$0xff] %v1420_v36  ;;  %v1426_v39 = vld [vmem:[#allocation2 + $0x18] sm:$0x1]  ;;  %v1429_v41 = vld [vmem:[#allocation2 + $0x26] sm:$0x1]  ;;  %v163_v54 = vadd.f32 %v1422_v37, %v115_v33 }
  0x12   :  { %2469 = vst [vmem:[#allocation13_spill] sm:$0xff] %v1422_v37  ;;  %v1434_v45 = vld [vmem:[#allocation2 + $0x34] sm:$0x1]  ;;  %v1436_v46 = vld [vmem:[#allocation2 + $0x40] sm:$0x1]  ;;  %v82_v55 = vadd.f32 %v1426_v39, %v1411_v31  ;;  %v124_v56 = vadd.f32 %v1429_v41, %v76_v34 }
  0x13   :  { %2470 = vst [vmem:[#allocation14_spill] sm:$0xff] %v1424_v38  ;;  %v1438_v47 = vld [vmem:[#allocation2 + $0x41] sm:$0x1]  ;;  %v1440_v48 = vld [vmem:[#allocation2 + $0x42] sm:$0x1]  ;;  %v166_v63 = vadd.f32 %v1434_v45, %v118_v40  ;;  %v202_v10 = vadd.f32 %v1436_v46, %v154_v42 }
  0x14   :  { %2471 = vst [vmem:[#allocation15_spill] sm:$0xff] %v1426_v39  ;;  %v1442_v49 = vld [vmem:[#allocation2 + $0xa] sm:$0x1]  ;;  %v1446_v51 = vld [vmem:[#allocation2 + $0x19] sm:$0x1]  ;;  %v205_v11 = vadd.f32 %v1438_v47, %v157_v43  ;;  %v208_v16 = vadd.f32 %v1440_v48, %v160_v44 }
  0x15   :  { %2472 = vst [vmem:[#allocation16_spill] sm:$0xff] %v1429_v41  ;;  %v1448_v52 = vld [vmem:[#allocation2 + $0x1a] sm:$0x1]  ;;  %v1455_v57 = vld [vmem:[#allocation2 + $0x27] sm:$0x1]  ;;  %v85_v23 = vadd.f32 %v1446_v51, %v1424_v38 }
  0x16   :  { %2473 = vst [vmem:[#allocation17_spill] sm:$0xff] %v1434_v45  ;;  %v1457_v58 = vld [vmem:[#allocation2 + $0x35] sm:$0x1]  ;;  %v1459_v59 = vld [vmem:[#allocation2 + $0x43] sm:$0x1]  ;;  %v127_v40 = vadd.f32 %v1455_v57, %v79_v50 }
  0x17   :  { %2474 = vst [vmem:[#allocation18_spill] sm:$0xff] %v1436_v46  ;;  %v1461_v60 = vld [vmem:[#allocation2 + $0xb] sm:$0x1]  ;;  %v1463_v61 = vld [vmem:[#allocation2 + $0x1b] sm:$0x1]  ;;  %v169_v44 = vadd.f32 %v1457_v58, %v121_v53 }
  0x18   :  { %2475 = vst [vmem:[#allocation19_spill] sm:$0xff] %v1438_v47  ;;  %v1465_v62 = vld [vmem:[#allocation2 + $0x28] sm:$0x1]  ;;  %v1468_v9 = vld [vmem:[#allocation2 + $0x36] sm:$0x1]  ;;  %v88_v47 = vadd.f32 %v1448_v52, %v1442_v49 }
  0x19   :  { %2476 = vst [vmem:[#allocation20_spill] sm:$0xff] %v1440_v48  ;;  %v1473_v21 = vld [vmem:[#allocation2 + $0x44] sm:$0x1]  ;;  %v1477_v24 = vld [vmem:[#allocation2 + $0x50] sm:$0x1]  ;;  %v211_v48 = vadd.f32 %v1459_v59, %v163_v54  ;;  %v130_v46 = vadd.f32 %v1465_v62, %v82_v55  ;;  %v172_v45 = vadd.f32 %v1468_v9, %v124_v56 }
  0x1a   :  { %2477 = vst [vmem:[#allocation21_spill] sm:$0xff] %v1442_v49  ;;  %v1479_v25 = vld [vmem:[#allocation2 + $0x51] sm:$0x1]  ;;  %v1481_v32 = vld [vmem:[#allocation2 + $0x52] sm:$0x1]  ;;  %v214_v54 = vadd.f32 %v1473_v21, %v166_v63  ;;  %v250_v55 = vadd.f32 %v1477_v24, %v202_v10 }
  0x1b   :  { %2478 = vst [vmem:[#allocation22_spill] sm:$0xff] %v1446_v51  ;;  %v1483_v33 = vld [vmem:[#allocation2 + $0xc] sm:$0x1]  ;;  %v1485_v34 = vld [vmem:[#allocation2 + $0x1c] sm:$0x1]  ;;  %v253_v56 = vadd.f32 %v1479_v25, %v205_v11 }
  0x1c   :  { %2479 = vst [vmem:[#allocation23_spill] sm:$0xff] %v1448_v52  ;;  %v1488_v42 = vld [vmem:[#allocation2 + $0x29] sm:$0x1]  ;;  %v1490_v43 = vld [vmem:[#allocation2 + $0x2a] sm:$0x1] }
  0x1d   :  { %2480 = vst [vmem:[#allocation24_spill] sm:$0xff] %v1455_v57  ;;  %v1498_v51 = vld [vmem:[#allocation2 + $0x37] sm:$0x1]  ;;  %v1500_v37 = vld [vmem:[#allocation2 + $0x45] sm:$0x1]  ;;  %v133_v29 = vadd.f32 %v1488_v42, %v85_v23  ;;  %v94_v23 = vadd.f32 %v1485_v34, %v1483_v33 }
  0x1e   :  { %2481 = vst [vmem:[#allocation25_spill] sm:$0xff] %v1457_v58  ;;  %v1502_v50 = vld [vmem:[#allocation2 + $0x53] sm:$0x1]  ;;  %v1504_v57 = vld [vmem:[#allocation2 + $0xd] sm:$0x1] }
  0x1f   :  { %2482 = vst [vmem:[#allocation26_spill] sm:$0xff] %v1459_v59  ;;  %v1506_v41 = vld [vmem:[#allocation2 + $0x1d] sm:$0x1]  ;;  %v1508_v53 = vld [vmem:[#allocation2 + $0x38] sm:$0x1] }
  0x20   :  { %2483 = vst [vmem:[#allocation27_spill] sm:$0xff] %v1461_v60  ;;  %v1511_v59 = vld [vmem:[#allocation2 + $0x46] sm:$0x1]  ;;  %v1516_v58 = vld [vmem:[#allocation2 + $0x54] sm:$0x1] }
  0x21   :  { %2484 = vst [vmem:[#allocation28_spill] sm:$0xff] %v1463_v61  ;;  %v1518_v52 = vld [vmem:[#allocation2 + $0xe] sm:$0x1]  ;;  %v1522_v49 = vld [vmem:[#allocation2 + $0x1e] sm:$0x1]  ;;  %v220_v28 = vadd.f32 %v1511_v59, %v172_v45 }
  0x22   :  { %2485 = vst [vmem:[#allocation29_spill] sm:$0xff] %v1465_v62  ;;  %v91_v62 = vadd.f32 %v1463_v61, %v1461_v60  ;;  %v1525_v63 = vld [vmem:[#allocation2 + $0x60] sm:$0x1]  ;;  %v1529_v10 = vld [vmem:[#allocation2 + $0x62] sm:$0x1]  ;;  %v259_v61 = vadd.f32 %v1502_v50, %v211_v48  ;;  %v178_v60 = vadd.f32 %v1508_v53, %v130_v46  ;;  %v262_v46 = vadd.f32 %v1516_v58, %v214_v54 }
  0x23   :  { %2486 = vst [vmem:[#allocation30_spill] sm:$0xff] %v1468_v9  ;;  %v256_v9 = vadd.f32 %v1481_v32, %v208_v16  ;;  %v1531_v11 = vld [vmem:[#allocation2 + $0x2b] sm:$0x1]  ;;  %v1533_v16 = vld [vmem:[#allocation2 + $0x2c] sm:$0x1]  ;;  %v298_v45 = vadd.f32 %v1525_v63, %v250_v55  ;;  %v100_v55 = vadd.f32 %v1522_v49, %v1518_v52 }
  0x24   :  { %2487 = vst [vmem:[#allocation31_spill] sm:$0xff] %v1473_v21  ;;  %v1527_v21 = vld [vmem:[#allocation2 + $0x61] sm:$0x1]  ;;  %v1545_v27 = vld [vmem:[#allocation2 + $0x47] sm:$0x1] }
  0x25   :  { %2488 = vst [vmem:[#allocation32_spill] sm:$0xff] %v1477_v24  ;;  %v217_v24 = vadd.f32 %v1500_v37, %v169_v44  ;;  %v1547_v36 = vld [vmem:[#allocation2 + $0x55] sm:$0x1]  ;;  %v1553_v44 = vld [vmem:[#allocation2 + $0x1f] sm:$0x1] }
  0x26   :  { %2489 = vst [vmem:[#allocation33_spill] sm:$0xff] %v1479_v25  ;;  %v1536_v25 = vld [vmem:[#allocation2 + $0x39] sm:$0x1]  ;;  %v1555_v48 = vld [vmem:[#allocation2 + $0x2d] sm:$0x1] }
  0x27   :  { %2490 = vst [vmem:[#allocation34_spill] sm:$0xff] %v1481_v32  ;;  %v175_v32 = vadd.f32 %v1498_v51, %v127_v40  ;;  %v1549_v40 = vld [vmem:[#allocation2 + $0x63] sm:$0x1]  ;;  %v181_v39 = vadd.f32 %v1536_v25, %v133_v29  ;;  %v1573_v35 = vld [vmem:[#allocation2 + $0x3b] sm:$0x1] }
  0x28   :  { %2491 = vst [vmem:[#allocation35_spill] sm:$0xff] %v1483_v33  ;;  %v1570_v33 = vld [vmem:[#allocation2 + $0x2e] sm:$0x1]  ;;  %v1575_v54 = vld [vmem:[#allocation2 + $0x49] sm:$0x1] }
  0x29   :  { %2492 = vst [vmem:[#allocation36_spill] sm:$0xff] %v1485_v34  ;;  %v139_v34 = vadd.f32 %v1531_v11, %v91_v62  ;;  %v1585_v62 = vld [vmem:[#allocation2 + $0x57] sm:$0x1]  ;;  %v1588_v29 = vld [vmem:[#allocation2 + $0x70] sm:$0x1]  ;;  %v229_v38 = vadd.f32 %v1575_v54, %v181_v39 }
  0x2a   :  { %2493 = vst [vmem:[#allocation37_spill] sm:$0xff] %v1488_v42  ;;  %v136_v42 = vadd.f32 %v1490_v43, %v88_v47  ;;  %v1562_v47 = vld [vmem:[#allocation2 + $0x56] sm:$0x1] }
  0x2b   :  { %2494 = vst [vmem:[#allocation38_spill] sm:$0xff] %v1490_v43  ;;  %v97_v43 = vadd.f32 %v1506_v41, %v1504_v57 }
  0x2c   :  { %2495 = vst [vmem:[#allocation39_spill] sm:$0xff] %v1498_v51  ;;  %v1551_v51 = vld [vmem:[#allocation2 + $0xf] sm:$0x1] }
  0x2d   :  { %2496 = vst [vmem:[#allocation40_spill] sm:$0xff] %v1500_v37  ;;  %v1559_v37 = vld [vmem:[#allocation2 + $0x48] sm:$0x1] }
  0x2e   :  { %2497 = vst [vmem:[#allocation41_spill] sm:$0xff] %v1502_v50  ;;  %v1557_v50 = vld [vmem:[#allocation2 + $0x3a] sm:$0x1] }
  0x2f   :  { %2498 = vst [vmem:[#allocation42_spill] sm:$0xff] %v1504_v57  ;;  %v1620_v57 = vld [vmem:[#allocation2 + $0x3e] sm:$0x1] }
  0x30   :  { %2499 = vst [vmem:[#allocation43_spill] sm:$0xff] %v1506_v41  ;;  %v268_v41 = vadd.f32 %v1562_v47, %v220_v28  ;;  %v346_v28 = vadd.f32 %v1588_v29, %v298_v45  ;;  %v148_v45 = vadd.f32 %v1570_v33, %v100_v55 }
  0x31   :  { %2500 = vst [vmem:[#allocation44_spill] sm:$0xff] %v1508_v53  ;;  %v304_v53 = vadd.f32 %v1529_v10, %v256_v9  ;;  %v223_v9 = vadd.f32 %v1545_v27, %v175_v32  ;;  %v1598_v32 = vld [vmem:[#allocation2 + $0x72] sm:$0x1] }
  0x32   :  { %2501 = vst [vmem:[#allocation45_spill] sm:$0xff] %v1511_v59  ;;  %v301_v59 = vadd.f32 %v1527_v21, %v253_v56  ;;  %v1581_v56 = vld [vmem:[#allocation2 + $0x3c] sm:$0x1] }
  0x33   :  { %2502 = vst [vmem:[#allocation46_spill] sm:$0xff] %v1516_v58  ;;  %v1577_v58 = vld [vmem:[#allocation2 + $0x64] sm:$0x1] }
  0x34   :  { %2503 = vst [vmem:[#allocation47_spill] sm:$0xff] %v1518_v52  ;;  %v1596_v52 = vld [vmem:[#allocation2 + $0x65] sm:$0x1] }
  0x35   :  { %2504 = vst [vmem:[#allocation48_spill] sm:$0xff] %v1522_v49  ;;  %v226_v49 = vadd.f32 %v1559_v37, %v178_v60 }
  0x36   :  { %2505 = vst [vmem:[#allocation49_spill] sm:$0xff] %v1525_v63  ;;  %v1590_v63 = vld [vmem:[#allocation2 + $0x71] sm:$0x1] }
  0x37   :  { %2506 = vst [vmem:[#allocation50_spill] sm:$0xff] %v1527_v21  ;;  %v307_v21 = vadd.f32 %v1549_v40, %v259_v61  ;;  %v1604_v61 = vld [vmem:[#allocation2 + $0x3d] sm:$0x1]  ;;  %v349_v60 = vadd.f32 %v1590_v63, %v301_v59  ;;  %v1628_v59 = vld [vmem:[#allocation2 + $0x4c] sm:$0x1] }
  0x38   :  { %2507 = vst [vmem:[#allocation51_spill] sm:$0xff] %v1529_v10  ;;  %v265_v10 = vadd.f32 %v1547_v36, %v217_v24  ;;  %v1600_v24 = vld [vmem:[#allocation2 + $0x73] sm:$0x1] }
  0x39   :  { %2508 = vst [vmem:[#allocation52_spill] sm:$0xff] %v1531_v11  ;;  %v184_v11 = vadd.f32 %v1557_v50, %v136_v42  ;;  %v310_v42 = vadd.f32 %v1577_v58, %v262_v46  ;;  %v1623_v46 = vld [vmem:[#allocation2 + $0x4b] sm:$0x1] }
  0x3a   :  { %2509 = vst [vmem:[#allocation53_spill] sm:$0xff] %v1533_v16 }
  0x3b   :  { %2510 = vst [vmem:[#allocation54_spill] sm:$0xff] %v1536_v25  ;;  %v142_v25 = vadd.f32 %v1533_v16, %v94_v23  ;;  %v1611_v23 = vld [vmem:[#allocation2 + $0x66] sm:$0x1]  ;;  %v187_v16 = vadd.f32 %v1573_v35, %v139_v34  ;;  %v313_v34 = vadd.f32 %v1596_v52, %v265_v10  ;;  %v1650_v10 = vmul.f32 0.125, %v346_v28  ;;  %v1665_v28 = vld [vmem:[#allocation2 + $0x5b] sm:$0x1] }
  0x3c   :  { %2511 = vst [vmem:[#allocation55_spill] sm:$0xff] %v1545_v27  ;;  %v1608_v27 = vld [vmem:[#allocation2 + $0x58] sm:$0x1]  ;;  %v316_v55 = vadd.f32 %v1611_v23, %v268_v41 }
  0x3d   :  { %2512 = vst [vmem:[#allocation56_spill] sm:$0xff] %v1547_v36  ;;  %v1602_v36 = vld [vmem:[#allocation2 + $0x2f] sm:$0x1]  ;;  %v190_v39 = vadd.f32 %v1581_v56, %v142_v25 }
  0x3e   :  { %2513 = vst [vmem:[#allocation57_spill] sm:$0xff] %v1549_v40  ;;  %v1606_v40 = vld [vmem:[#allocation2 + $0x4a] sm:$0x1] }
  0x3f   :  { %2514 = vst [vmem:[#allocation58_spill] sm:$0xff] %v1555_v48 }
  0x40   :  { %2515 = vst [vmem:[#allocation59_spill] sm:$0xff] %v1557_v50  ;;  %v145_v50 = vadd.f32 %v1555_v48, %v97_v43  ;;  %v355_v43 = vadd.f32 %v1600_v24, %v307_v21  ;;  %v1648_v48 = vld [vmem:[#allocation2 + $0x76] sm:$0x1]  ;;  %v1652_v21 = vmul.f32 0.125, %v349_v60 }
  0x41   :  { %2516 = vst [vmem:[#allocation60_spill] sm:$0xff] %v1559_v37  ;;  %v103_v37 = vadd.f32 %v1553_v44, %v1551_v51 }
  0x42   :  { %2517 = vst [vmem:[#allocation61_spill] sm:$0xff] %v1562_v47  ;;  %v352_v47 = vadd.f32 %v1598_v32, %v304_v53  ;;  %v271_v53 = vadd.f32 %v1585_v62, %v223_v9  ;;  %v1645_v9 = vld [vmem:[#allocation2 + $0x75] sm:$0x1]  ;;  %v193_v41 = vadd.f32 %v1604_v61, %v145_v50  ;;  %v238_v50 = vadd.f32 %v1628_v59, %v190_v39 }
  0x43   :  { %2518 = vst [vmem:[#allocation62_spill] sm:$0xff] %v1570_v33  ;;  %v1643_v33 = vld [vmem:[#allocation2 + $0x68] sm:$0x1] }
  0x44   :  { %2519 = vst [vmem:[#allocation63_spill] sm:$0xff] %v1573_v35  ;;  %v1641_v35 = vld [vmem:[#allocation2 + $0x67] sm:$0x1]  ;;  %v1654_v25 = vmul.f32 0.125, %v352_v47  ;;  %v1668_v47 = vld [vmem:[#allocation2 + $0x69] sm:$0x1] }
  0x45   :  { %2520 = vst [vmem:[#allocation64_spill] sm:$0xff] %v1575_v54  ;;  %v274_v54 = vadd.f32 %v1608_v27, %v226_v49  ;;  %v151_v49 = vadd.f32 %v1602_v36, %v103_v37  ;;  %v319_v60 = vadd.f32 %v1641_v35, %v271_v53  ;;  %v361_v37 = vadd.f32 %v1645_v9, %v313_v34  ;;  %v1683_v53 = vld [vmem:[#allocation2 + $0x6a] sm:$0x1] }
  0x46   :  { %2521 = vst [vmem:[#allocation65_spill] sm:$0xff] %v1577_v58  ;;  %v1625_v58 = vld [vmem:[#allocation2 + $0x74] sm:$0x1]  ;;  %v408_v34 = vmul.f32 %v1650_v10, %v1650_v10 }
  0x47   :  { %2522 = vst [vmem:[#allocation66_spill] sm:$0xff] %v1585_v62  ;;  %v358_v62 = vadd.f32 %v1625_v58, %v310_v42 }
  0x48   :  { %2523 = vst [vmem:[#allocation67_spill] sm:$0xff] %v1588_v29  ;;  %v232_v29 = vadd.f32 %v1606_v40, %v184_v11  ;;  %v1658_v11 = vld [vmem:[#allocation2 + $0x3f] sm:$0x1] }
  0x49   :  { %2524 = vst [vmem:[#allocation68_spill] sm:$0xff] %v1590_v63  ;;  %v1633_v63 = vld [vmem:[#allocation2 + $0x5a] sm:$0x1] }
  0x4a   :  { %2525 = vst [vmem:[#allocation69_spill] sm:$0xff] %v1596_v52  ;;  %v1671_v52 = vmul.f32 0.125, %v355_v43  ;;  %v409_v43 = vmul.f32 %v1652_v21, %v1652_v21 }
  0x4b   :  { %2526 = vst [vmem:[#allocation70_spill] sm:$0xff] %v1598_v32  ;;  %v1631_v32 = vld [vmem:[#allocation2 + $0x59] sm:$0x1] }
  0x4c   :  { %2527 = vst [vmem:[#allocation71_spill] sm:$0xff] %v1600_v24  ;;  %v235_v24 = vadd.f32 %v1623_v46, %v187_v16  ;;  %v277_v42 = vadd.f32 %v1631_v32, %v229_v38  ;;  %v280_v16 = vadd.f32 %v1633_v63, %v232_v29  ;;  %v322_v38 = vadd.f32 %v1643_v33, %v274_v54 }
  0x4d   :  { %2528 = vst [vmem:[#allocation72_spill] sm:$0xff] %v1606_v40  ;;  %v411_v29 = vmul.f32 %v1654_v25, %v1654_v25  ;;  %v199_v54 = vadd.f32 %v1658_v11, %v151_v49  ;;  %v1706_v40 = vmul.f32 0.125, %v361_v37  ;;  %v413_v49 = vmul.f32 %v1671_v52, %v1671_v52 }
  0x4e   :  { %2529 = vst [vmem:[#allocation73_spill] sm:$0xff] %v1608_v27  ;;  %v1674_v27 = vld [vmem:[#allocation2 + $0x4e] sm:$0x1] }
  0x4f   :  { %2530 = vst [vmem:[#allocation74_spill] sm:$0xff] %v1611_v23  ;;  %v1661_v23 = vld [vmem:[#allocation2 + $0x4d] sm:$0x1] }
  0x50   :  { %2531 = vst [vmem:[#allocation75_spill] sm:$0xff] %v1620_v57  ;;  %v241_v39 = vadd.f32 %v1661_v23, %v193_v41 }
  0x51   :  { %2532 = vst [vmem:[#allocation76_spill] sm:$0xff] %v1623_v46  ;;  %v1681_v46 = vld [vmem:[#allocation2 + $0x5c] sm:$0x1] }
  0x52   :  { %2533 = vst [vmem:[#allocation77_spill] sm:$0xff] %v1625_v58  ;;  %v196_v58 = vadd.f32 %v1620_v57, %v148_v45  ;;  %v364_v45 = vadd.f32 %v1648_v48, %v316_v55  ;;  %v1695_v55 = vld [vmem:[#allocation2 + $0x4f] sm:$0x1]  ;;  %v410_v57 = vadd.f32 %v409_v43, %v408_v34 }
  0x53   :  { %2534 = vst [vmem:[#allocation78_spill] sm:$0xff] %v1628_v59 }
  0x54   :  { %2535 = vst [vmem:[#allocation79_spill] sm:$0xff] %v1631_v32  ;;  %v1679_v32 = vld [vmem:[#allocation2 + $0x77] sm:$0x1]  ;;  %v244_v41 = vadd.f32 %v1674_v27, %v196_v58  ;;  %v1720_v37 = vmul.f32 0.125, %v364_v45  ;;  %v412_v34 = vadd.f32 %v411_v29, %v410_v57  ;;  %v247_v58 = vadd.f32 %v1695_v55, %v199_v54 }
  0x55   :  { %2536 = vst [vmem:[#allocation80_spill] sm:$0xff] %v1633_v63  ;;  %v1703_v63 = vld [vmem:[#allocation2 + $0x6b] sm:$0x1]  ;;  %v367_v59 = vadd.f32 %v1679_v32, %v319_v60  ;;  %v417_v29 = vmul.f32 %v1706_v40, %v1706_v40 }
  0x56   :  { %2537 = vst [vmem:[#allocation81_spill] sm:$0xff] %v1641_v35  ;;  %v1685_v35 = vmul.f32 0.125, %v358_v62  ;;  %v325_v62 = vadd.f32 %v1668_v47, %v277_v42  ;;  %v328_v42 = vadd.f32 %v1683_v53, %v280_v16  ;;  %v414_v57 = vadd.f32 %v413_v49, %v412_v34  ;;  %v1751_v34 = vld [vmem:[#allocation2 + $0x7c] sm:$0x1] }
  0x57   :  { %2538 = vst [vmem:[#allocation82_spill] sm:$0xff] %v1643_v33  ;;  %v1701_v33 = vld [vmem:[#allocation2 + $0x5d] sm:$0x1]  ;;  %v1734_v45 = vmul.f32 0.125, %v367_v59  ;;  %v419_v59 = vmul.f32 %v1720_v37, %v1720_v37 }
  0x58   :  { %2539 = vst [vmem:[#allocation83_spill] sm:$0xff] %v1645_v9  ;;  %v1699_v9 = vld [vmem:[#allocation2 + $0x78] sm:$0x1]  ;;  %v415_v43 = vmul.f32 %v1685_v35, %v1685_v35 }
  0x59   :  { %2540 = vst [vmem:[#allocation84_spill] sm:$0xff] %v1648_v48  ;;  %v283_v48 = vadd.f32 %v1665_v28, %v235_v24  ;;  %v286_v24 = vadd.f32 %v1681_v46, %v238_v50  ;;  %v370_v60 = vadd.f32 %v1699_v9, %v322_v38  ;;  %v289_v50 = vadd.f32 %v1701_v33, %v241_v39 }
  0x5a   :  { %2541 = vst [vmem:[#allocation85_spill] sm:$0xff] %v1661_v23  ;;  %v1717_v23 = vld [vmem:[#allocation2 + $0x6c] sm:$0x1] }
  0x5b   :  { %2542 = vst [vmem:[#allocation86_spill] sm:$0xff] %v1665_v28  ;;  %v1715_v28 = vld [vmem:[#allocation2 + $0x5e] sm:$0x1]  ;;  %v331_v16 = vadd.f32 %v1703_v63, %v283_v48  ;;  %v334_v39 = vadd.f32 %v1717_v23, %v286_v24  ;;  %v1742_v48 = vld [vmem:[#allocation2 + $0x6e] sm:$0x1] }
  0x5c   :  { %2543 = vst [vmem:[#allocation87_spill] sm:$0xff] %v1668_v47  ;;  %v1713_v47 = vld [vmem:[#allocation2 + $0x79] sm:$0x1]  ;;  %v292_v54 = vadd.f32 %v1715_v28, %v244_v41  ;;  %v1753_v41 = vld [vmem:[#allocation2 + $0x6f] sm:$0x1] }
  0x5d   :  { %2544 = vst [vmem:[#allocation88_spill] sm:$0xff] %v1679_v32  ;;  %v1727_v32 = vld [vmem:[#allocation2 + $0x7a] sm:$0x1]  ;;  %v373_v38 = vadd.f32 %v1713_v47, %v325_v62 }
  0x5e   :  { %2545 = vst [vmem:[#allocation89_spill] sm:$0xff] %v1681_v46  ;;  %v1731_v46 = vld [vmem:[#allocation2 + $0x6d] sm:$0x1] }
  0x5f   :  { %2546 = vst [vmem:[#allocation90_spill] sm:$0xff] %v1683_v53  ;;  %v1729_v53 = vld [vmem:[#allocation2 + $0x5f] sm:$0x1]  ;;  %v337_v49 = vadd.f32 %v1731_v46, %v289_v50 }
  0x60   :  { %2547 = vst [vmem:[#allocation91_spill] sm:$0xff] %v1695_v55  ;;  %v1745_v55 = vmul.f32 0.125, %v370_v60  ;;  %v295_v62 = vadd.f32 %v1729_v53, %v247_v58  ;;  %v340_v60 = vadd.f32 %v1742_v48, %v292_v54  ;;  %v382_v58 = vadd.f32 %v1751_v34, %v334_v39 }
  0x61   :  { %2548 = vst [vmem:[#allocation92_spill] sm:$0xff] %v1699_v9  ;;  %v1740_v9 = vld [vmem:[#allocation2 + $0x7b] sm:$0x1] }
  0x62   :  { %2549 = vst [vmem:[#allocation93_spill] sm:$0xff] %v1701_v33  ;;  %v416_v33 = vadd.f32 %v415_v43, %v414_v57  ;;  %v379_v24 = vadd.f32 %v1740_v9, %v331_v16  ;;  %v1761_v43 = vld [vmem:[#allocation2 + $0x7d] sm:$0x1]  ;;  %v343_v16 = vadd.f32 %v1753_v41, %v295_v62 }
  0x63   :  { %2550 = vst [vmem:[#allocation94_spill] sm:$0xff] %v1703_v63  ;;  %v376_v63 = vadd.f32 %v1727_v32, %v328_v42  ;;  %v421_v42 = vmul.f32 %v1734_v45, %v1734_v45 }
  0x64   :  { %2551 = vst [vmem:[#allocation95_spill] sm:$0xff] %v1713_v47  ;;  %v1756_v47 = vmul.f32 0.125, %v373_v38  ;;  %v1769_v38 = vld [vmem:[#allocation2 + $0x7e] sm:$0x1] }
  0x65   :  { %2552 = vst [vmem:[#allocation96_spill] sm:$0xff] %v1717_v23  ;;  %v418_v23 = vadd.f32 %v417_v29, %v416_v33  ;;  %v1764_v57 = vmul.f32 0.125, %v376_v63  ;;  %v385_v33 = vadd.f32 %v1761_v43, %v337_v49  ;;  %v1772_v29 = vmul.f32 0.125, %v379_v24 }
  0x66   :  { %2553 = vst [vmem:[#allocation97_spill] sm:$0xff] %v1727_v32  ;;  %v423_v32 = vmul.f32 %v1745_v55, %v1745_v55  ;;  %v425_v54 = vmul.f32 %v1756_v47, %v1756_v47  ;;  %v388_v63 = vadd.f32 %v1769_v38, %v340_v60 }
  0x67   :  { %2554 = vst [vmem:[#allocation98_spill] sm:$0xff] %v1729_v53  ;;  %v420_v50 = vadd.f32 %v419_v59, %v418_v23  ;;  %v1779_v23 = vmul.f32 0.125, %v382_v58  ;;  %v427_v59 = vmul.f32 %v1764_v57, %v1764_v57  ;;  %v429_v24 = vmul.f32 %v1772_v29, %v1772_v29 }
  0x68   :  { %2555 = vst [vmem:[#allocation99_spill] sm:$0xff] %v1731_v46 }
  0x69   :  { %2556 = vst [vmem:[#allocation100_spill] sm:$0xff] %v1740_v9  ;;  %v422_v9 = vadd.f32 %v421_v42, %v420_v50  ;;  %v1788_v42 = vmul.f32 0.125, %v388_v63  ;;  %v431_v60 = vmul.f32 %v1779_v23, %v1779_v23 }
  0x6a   :  { %2557 = vst [vmem:[#allocation101_spill] sm:$0xff] %v1742_v48  ;;  %v1776_v48 = vld [vmem:[#allocation2 + $0x7f] sm:$0x1] }
  0x6b   :  { %2558 = vst [vmem:[#allocation102_spill] sm:$0xff] %v1751_v34  ;;  %v424_v39 = vadd.f32 %v423_v32, %v422_v9  ;;  %v391_v62 = vadd.f32 %v1776_v48, %v343_v16  ;;  %v1784_v34 = vmul.f32 0.125, %v385_v33  ;;  %v435_v16 = vmul.f32 %v1788_v42, %v1788_v42 }
  0x6c   :  { %2559 = vst [vmem:[#allocation103_spill] sm:$0xff] %v1753_v41 }
  0x6d   :  { %2560 = vst [vmem:[#allocation104_spill] sm:$0xff] %v1761_v43  ;;  %v426_v49 = vadd.f32 %v425_v54, %v424_v39  ;;  %v1792_v58 = vmul.f32 0.125, %v391_v62  ;;  %v433_v9 = vmul.f32 %v1784_v34, %v1784_v34 }
  0x6e   :  { %2561 = vst [vmem:[#allocation105_spill] sm:$0xff] %v1769_v38 }
  0x6f   :  { %2562 = vst [vmem:[#allocation106_spill] sm:$0xff] %v1776_v48  ;;  %v428_v50 = vadd.f32 %v427_v59, %v426_v49  ;;  %v437_v54 = vmul.f32 %v1792_v58, %v1792_v58 }
  0x71   :  { %v430_v32 = vadd.f32 %v429_v24, %v428_v50 }
  0x73   :  { %v432_v38 = vadd.f32 %v431_v60, %v430_v32 }
  0x75   :  { %v434_v33 = vadd.f32 %v433_v9, %v432_v38 }
  0x77   :  { %v436_v63 = vadd.f32 %v435_v16, %v434_v33 }
  0x79   :  { %v438_v39 = vadd.f32 %v437_v54, %v436_v63 }
  0x7b   :  { %v439_v59 = vadd.f32 1.0, %v438_v39  ;;  %v445_v49 = vadd.f32 1e-08, %v438_v39 }
  0x7d   :  { %1126 = vrcp.f32 %v439_v59 }
  0x7e   :  { %1128 = vrcp.f32 %v445_v49 }
  0x83   :  { %v1127_v62 = vpop.eup %1126 }
  0x84   :  { %v1129_v48 = vpop.eup %1128  ;;  %v441_v24 = vmul.f32 %v1127_v62, %v439_v59 }
  0x85   :  { %v447_v50 = vmul.f32 %v1129_v48, %v445_v49 }
  0x86   :  { %v442_v43 = vsub.f32 2.0, %v441_v24 }
  0x87   :  { %v448_v41 = vsub.f32 2.0, %v447_v50 }
  0x88   :  { %v443_v60 = vmul.f32 %v1127_v62, %v442_v43 }
  0x89   :  { %v449_v32 = vmul.f32 %v1129_v48, %v448_v41 }
  0x8a   :  { %v444_v46 = vmul.f32 %v443_v60, %v438_v39 }
  0x8c   :  { %v450_v53 = vmul.f32 %v449_v32, %v444_v46 }
  0x8e   :  { %v1801_v38 = vmul.f32 %v450_v53, %v1650_v10  ;;  %v1804_v9 = vmul.f32 %v450_v53, %v1652_v21  ;;  %v1807_v16 = vmul.f32 %v450_v53, %v1654_v25  ;;  %v1810_v33 = vmul.f32 %v450_v53, %v1671_v52 }
  0x8f   :  { %v1813_v54 = vmul.f32 %v450_v53, %v1685_v35  ;;  %v1822_v21 = vmul.f32 %v450_v53, %v1706_v40  ;;  %v1827_v41 = vmul.f32 %v450_v53, %v1720_v37  ;;  %v1836_v40 = vmul.f32 %v450_v53, %v1734_v45 }
  0x90   :  { %v467_v48 = vmul.f32 %v1801_v38, %v1352_v0  ;;  %v468_v46 = vmul.f32 %v1804_v9, %v1354_v1  ;;  %v470_v10 = vmul.f32 %v1807_v16, %v1356_v2  ;;  %v472_v52 = vmul.f32 %v1810_v33, %v1364_v6 }
  0x91   :  { %v474_v0 = vmul.f32 %v1813_v54, %v1368_v8  ;;  %v499_v1 = vmul.f32 %v1801_v38, %v1358_v3  ;;  %v500_v2 = vmul.f32 %v1804_v9, %v1360_v4  ;;  %v502_v43 = vmul.f32 %v1807_v16, %v1362_v5 }
  0x92   :  { %v469_v25 = vadd.f32 %v468_v46, %v467_v48  ;;  %v476_v37 = vmul.f32 %v1822_v21, %v1386_v17  ;;  %v504_v8 = vmul.f32 %v1810_v33, %v1366_v7  ;;  %v1845_v39 = vmul.f32 %v450_v53, %v1745_v55 }
  0x93   :  { %v501_v63 = vadd.f32 %v500_v2, %v499_v1  ;;  %v1848_v3 = vmul.f32 %v450_v53, %v1756_v47  ;;  %v1851_v4 = vmul.f32 %v450_v53, %v1764_v57  ;;  %v478_v5 = vmul.f32 %v1827_v41, %v1392_v20  ;;  %v2568_v2 = vld [vmem:[#allocation9_spill] sm:$0xff] }
  0x94   :  { %v471_v35 = vadd.f32 %v470_v10, %v469_v25  ;;  %v506_v17 = vmul.f32 %v1813_v54, %v1376_v12  ;;  %v1858_v49 = vmul.f32 %v450_v53, %v1772_v29  ;;  %v480_v7 = vmul.f32 %v1836_v40, %v1409_v30 }
  0x95   :  { %v503_v59 = vadd.f32 %v502_v43, %v501_v63  ;;  %v531_v47 = vmul.f32 %v1801_v38, %v1378_v13  ;;  %v532_v55 = vmul.f32 %v1804_v9, %v1380_v14  ;;  %v508_v20 = vmul.f32 %v1822_v21, %v1388_v18  ;;  %v2570_v63 = vld [vmem:[#allocation21_spill] sm:$0xff] }
  0x96   :  { %v473_v6 = vadd.f32 %v472_v52, %v471_v35  ;;  %v534_v12 = vmul.f32 %v1807_v16, %v1382_v15  ;;  %v1871_v29 = vmul.f32 %v450_v53, %v1779_v23  ;;  %v1874_v24 = vmul.f32 %v450_v53, %v1784_v34  ;;  %v2565_v52 = vld [vmem:[#allocation15_spill] sm:$0xff]  ;;  %v2566_v35 = vld [vmem:[#allocation12_spill] sm:$0xff] }
  0x97   :  { %v505_v62 = vadd.f32 %v504_v8, %v503_v59  ;;  %v533_v30 = vadd.f32 %v532_v55, %v531_v47  ;;  %v536_v13 = vmul.f32 %v1810_v33, %v1390_v19  ;;  %v482_v14 = vmul.f32 %v1845_v39, %v1411_v31  ;;  %v2563_v19 = vld [vmem:[#allocation14_spill] sm:$0xff]  ;;  %v2564_v31 = vld [vmem:[#allocation11_spill] sm:$0xff] }
  0x98   :  { %v475_v45 = vadd.f32 %v474_v0, %v473_v6  ;;  %v510_v18 = vmul.f32 %v1827_v41, %v1396_v22  ;;  %v1883_v15 = vmul.f32 %v450_v53, %v1788_v42  ;;  %v1886_v23 = vmul.f32 %v450_v53, %v1792_v58  ;;  %v2567_v58 = vld [vmem:[#allocation8_spill] sm:$0xff]  ;;  %v2569_v6 = vld [vmem:[#allocation10_spill] sm:$0xff]  ;;  %v2573_v47 = vld [vmem:[#allocation35_spill] sm:$0xff] }
  0x99   :  { %v507_v60 = vadd.f32 %v506_v17, %v505_v62  ;;  %v535_v34 = vadd.f32 %v534_v12, %v533_v30  ;;  %v538_v32 = vmul.f32 %v1813_v54, %v1401_v26  ;;  %v484_v46 = vmul.f32 %v1848_v3, %v2563_v19  ;;  %v2572_v17 = vld [vmem:[#allocation16_spill] sm:$0xff]  ;;  %v2575_v30 = vld [vmem:[#allocation42_spill] sm:$0xff] }
  0x9a   :  { %v477_v57 = vadd.f32 %v476_v37, %v475_v45  ;;  %v512_v25 = vmul.f32 %v1836_v40, %v2564_v31  ;;  %v514_v22 = vmul.f32 %v1845_v39, %v2565_v52  ;;  %v540_v53 = vmul.f32 %v1822_v21, %v2566_v35  ;;  %v2571_v45 = vld [vmem:[#allocation27_spill] sm:$0xff] }
  0x9b   :  { %v509_v10 = vadd.f32 %v508_v20, %v507_v60  ;;  %v537_v42 = vadd.f32 %v536_v13, %v535_v34  ;;  %v563_v0 = vmul.f32 %v1801_v38, %v2567_v58  ;;  %v564_v43 = vmul.f32 %v1804_v9, %v2568_v2  ;;  %v2574_v20 = vld [vmem:[#allocation13_spill] sm:$0xff] }
  0x9c   :  { %v479_v50 = vadd.f32 %v478_v5, %v477_v57  ;;  %v566_v37 = vmul.f32 %v1807_v16, %v2569_v6  ;;  %v486_v8 = vmul.f32 %v1851_v4, %v2570_v63  ;;  %v488_v5 = vmul.f32 %v1858_v49, %v2571_v45  ;;  %v2580_v58 = vld [vmem:[#allocation29_spill] sm:$0xff] }
  0x9d   :  { %v511_v26 = vadd.f32 %v510_v18, %v509_v10  ;;  %v539_v59 = vadd.f32 %v538_v32, %v537_v42  ;;  %v490_v55 = vmul.f32 %v1871_v29, %v2573_v47  ;;  %v565_v62 = vadd.f32 %v564_v43, %v563_v0  ;;  %v2577_v18 = vld [vmem:[#allocation24_spill] sm:$0xff]  ;;  %v2578_v10 = vld [vmem:[#allocation17_spill] sm:$0xff]  ;;  %v2581_v0 = vld [vmem:[#allocation23_spill] sm:$0xff] }
  0x9e   :  { %v481_v48 = vadd.f32 %v480_v7, %v479_v50  ;;  %v542_v7 = vmul.f32 %v1827_v41, %v2572_v17  ;;  %v568_v12 = vmul.f32 %v1810_v33, %v2574_v20  ;;  %v1916_v13 = vmul.f32 %v1874_v24, %v2575_v30  ;;  %v2576_v50 = vld [vmem:[#allocation22_spill] sm:$0xff]  ;;  %v2583_v2 = vld [vmem:[#allocation25_spill] sm:$0xff] }
  0x9f   :  { %v513_v57 = vadd.f32 %v512_v25, %v511_v26  ;;  %v541_v60 = vadd.f32 %v540_v53, %v539_v59  ;;  %v544_v34 = vmul.f32 %v1836_v40, %v2577_v18  ;;  %v567_v19 = vadd.f32 %v566_v37, %v565_v62  ;;  %v2579_v25 = vld [vmem:[#allocation47_spill] sm:$0xff]  ;;  %v2584_v37 = vld [vmem:[#allocation30_spill] sm:$0xff]  ;;  %v2587_v62 = vld [vmem:[#allocation20_spill] sm:$0xff] }
  0xa0   :  { %v483_v1 = vadd.f32 %v482_v14, %v481_v48  ;;  %v516_v14 = vmul.f32 %v1848_v3, %v2576_v50  ;;  %v570_v31 = vmul.f32 %v1813_v54, %v2578_v10  ;;  %v1926_v52 = vmul.f32 %v1883_v15, %v2579_v25  ;;  %v2586_v59 = vld [vmem:[#allocation19_spill] sm:$0xff]  ;;  %v2589_v18 = vld [vmem:[#allocation26_spill] sm:$0xff] }
  0xa1   :  { %v515_v48 = vadd.f32 %v514_v22, %v513_v57  ;;  %v1930_v42 = vmul.f32 %v1886_v23, %v1551_v51  ;;  %v543_v35 = vadd.f32 %v542_v7, %v541_v60  ;;  %v546_v53 = vmul.f32 %v1845_v39, %v2580_v58  ;;  %v2582_v22 = vld [vmem:[#allocation37_spill] sm:$0xff]  ;;  %v2585_v51 = vld [vmem:[#allocation18_spill] sm:$0xff]  ;;  %v2591_v25 = vld [vmem:[#allocation43_spill] sm:$0xff] }
  0xa2   :  { %v485_v32 = vadd.f32 %v484_v46, %v483_v1  ;;  %v518_v46 = vmul.f32 %v1851_v4, %v2581_v0  ;;  %v548_v1 = vmul.f32 %v1848_v3, %v2582_v22  ;;  %v569_v26 = vadd.f32 %v568_v12, %v567_v19  ;;  %v2588_v12 = vld [vmem:[#allocation28_spill] sm:$0xff]  ;;  %v2595_v22 = vld [vmem:[#allocation31_spill] sm:$0xff] }
  0xa3   :  { %v572_v43 = vmul.f32 %v1822_v21, %v2583_v2  ;;  %v545_v6 = vadd.f32 %v544_v34, %v543_v35  ;;  %v574_v63 = vmul.f32 %v1827_v41, %v2584_v37  ;;  %v595_v45 = vmul.f32 %v1801_v38, %v2585_v51  ;;  %v2590_v19 = vld [vmem:[#allocation36_spill] sm:$0xff] }
  0xa4   :  { %v596_v17 = vmul.f32 %v1804_v9, %v2586_v59  ;;  %v487_v7 = vadd.f32 %v486_v8, %v485_v32  ;;  %v517_v47 = vadd.f32 %v516_v14, %v515_v48  ;;  %v571_v57 = vadd.f32 %v570_v31, %v569_v26  ;;  %v2592_v14 = vld [vmem:[#allocation39_spill] sm:$0xff]  ;;  %v2593_v48 = vld [vmem:[#allocation38_spill] sm:$0xff]  ;;  %v2594_v58 = vld [vmem:[#allocation44_spill] sm:$0xff] }
  0xa5   :  { %v598_v20 = vmul.f32 %v1807_v16, %v2587_v62  ;;  %v520_v30 = vmul.f32 %v1858_v49, %v2588_v12  ;;  %v547_v50 = vadd.f32 %v546_v53, %v545_v6  ;;  %v600_v34 = vmul.f32 %v1810_v33, %v2589_v18 }
  0xa6   :  { %v597_v60 = vadd.f32 %v596_v17, %v595_v45  ;;  %v522_v10 = vmul.f32 %v1871_v29, %v2590_v19  ;;  %v524_v35 = vmul.f32 %v1874_v24, %v2591_v25  ;;  %v573_v8 = vadd.f32 %v572_v43, %v571_v57  ;;  %v2596_v45 = vld [vmem:[#allocation48_spill] sm:$0xff] }
  0xa7   :  { %v576_v32 = vmul.f32 %v1836_v40, %v2592_v14  ;;  %v550_v31 = vmul.f32 %v1851_v4, %v2593_v48  ;;  %v578_v53 = vmul.f32 %v1845_v39, %v2594_v58  ;;  %v602_v26 = vmul.f32 %v1813_v54, %v2595_v22  ;;  %v2597_v57 = vld [vmem:[#allocation40_spill] sm:$0xff] }
  0xa8   :  { %v599_v0 = vadd.f32 %v598_v20, %v597_v60  ;;  %v489_v2 = vadd.f32 %v488_v5, %v487_v7  ;;  %v519_v6 = vadd.f32 %v518_v46, %v517_v47  ;;  %v549_v37 = vadd.f32 %v548_v1, %v547_v50  ;;  %v2598_v20 = vld [vmem:[#allocation52_spill] sm:$0xff]  ;;  %v2599_v60 = vld [vmem:[#allocation53_spill] sm:$0xff]  ;;  %v2600_v1 = vld [vmem:[#allocation54_spill] sm:$0xff] }
  0xa9   :  { %v575_v51 = vadd.f32 %v574_v63, %v573_v8  ;;  %v1966_v43 = vmul.f32 %v1883_v15, %v2596_v45  ;;  %v1970_v59 = vmul.f32 %v1886_v23, %v1553_v44  ;;  %v604_v62 = vmul.f32 %v1822_v21, %v2597_v57  ;;  %v2601_v7 = vld [vmem:[#allocation58_spill] sm:$0xff]  ;;  %v2605_v22 = vld [vmem:[#allocation32_spill] sm:$0xff]  ;;  %v2606_v45 = vld [vmem:[#allocation33_spill] sm:$0xff] }
  0xaa   :  { %v601_v17 = vadd.f32 %v600_v34, %v599_v0  ;;  %v552_v12 = vmul.f32 %v1858_v49, %v2598_v20  ;;  %v554_v5 = vmul.f32 %v1871_v29, %v2599_v60  ;;  %v580_v63 = vmul.f32 %v1848_v3, %v2600_v1  ;;  %v2602_v50 = vld [vmem:[#allocation62_spill] sm:$0xff]  ;;  %v2603_v34 = vld [vmem:[#allocation45_spill] sm:$0xff]  ;;  %v2607_v20 = vld [vmem:[#allocation59_spill] sm:$0xff] }
  0xab   :  { %v577_v46 = vadd.f32 %v576_v32, %v575_v51  ;;  %v556_v47 = vmul.f32 %v1874_v24, %v2601_v7  ;;  %v1984_v44 = vmul.f32 %v1883_v15, %v2602_v50  ;;  %v606_v19 = vmul.f32 %v1827_v41, %v2603_v34  ;;  %v2604_v32 = vld [vmem:[#allocation55_spill] sm:$0xff] }
  0xac   :  { %v603_v18 = vadd.f32 %v602_v26, %v601_v17  ;;  %v491_v25 = vadd.f32 %v490_v55, %v489_v2  ;;  %v521_v8 = vadd.f32 %v520_v30, %v519_v6  ;;  %v551_v14 = vadd.f32 %v550_v31, %v549_v37  ;;  %v2608_v30 = vld [vmem:[#allocation34_spill] sm:$0xff]  ;;  %v2609_v2 = vld [vmem:[#allocation60_spill] sm:$0xff]  ;;  %v2611_v7 = vld [vmem:[#allocation63_spill] sm:$0xff] }
  0xad   :  { %v579_v48 = vadd.f32 %v578_v53, %v577_v46  ;;  %v608_v0 = vmul.f32 %v1836_v40, %v2604_v32  ;;  %v627_v51 = vmul.f32 %v1801_v38, %v2605_v22  ;;  %v628_v57 = vmul.f32 %v1804_v9, %v2606_v45 }
  0xae   :  { %v605_v58 = vadd.f32 %v604_v62, %v603_v18  ;;  %v1996_v26 = vmul.f32 %v1886_v23, %v1602_v36  ;;  %v582_v55 = vmul.f32 %v1851_v4, %v2607_v20  ;;  %v630_v31 = vmul.f32 %v1807_v16, %v2608_v30  ;;  %v2610_v62 = vld [vmem:[#allocation41_spill] sm:$0xff]  ;;  %v2612_v18 = vld [vmem:[#allocation64_spill] sm:$0xff] }
  0xaf   :  { %v581_v17 = vadd.f32 %v580_v63, %v579_v48  ;;  %v610_v6 = vmul.f32 %v1845_v39, %v2609_v2  ;;  %v629_v37 = vadd.f32 %v628_v57, %v627_v51  ;;  %v632_v60 = vmul.f32 %v1810_v33, %v2610_v62  ;;  %v2616_v51 = vld [vmem:[#allocation56_spill] sm:$0xff]  ;;  %v2619_v2 = vld [vmem:[#allocation50_spill] sm:$0xff] }
  0xb0   :  { %v607_v53 = vadd.f32 %v606_v19, %v605_v58  ;;  %v493_v46 = vadd.f32 %v1916_v13, %v491_v25  ;;  %v523_v1 = vadd.f32 %v522_v10, %v521_v8  ;;  %v553_v36 = vadd.f32 %v552_v12, %v551_v14  ;;  %v2613_v19 = vld [vmem:[#allocation46_spill] sm:$0xff]  ;;  %v2614_v10 = vld [vmem:[#allocation75_spill] sm:$0xff]  ;;  %v2615_v8 = vld [vmem:[#allocation72_spill] sm:$0xff] }
  0xb1   :  { %v584_v63 = vmul.f32 %v1858_v49, %v2611_v7  ;;  %v612_v34 = vmul.f32 %v1848_v3, %v2612_v18  ;;  %v631_v48 = vadd.f32 %v630_v31, %v629_v37  ;;  %v634_v58 = vmul.f32 %v1813_v54, %v2613_v19  ;;  %v2618_v31 = vld [vmem:[#allocation49_spill] sm:$0xff]  ;;  %v2620_v62 = vld [vmem:[#allocation76_spill] sm:$0xff]  ;;  %v2621_v7 = vld [vmem:[#allocation66_spill] sm:$0xff] }
  0xb2   :  { %v609_v50 = vadd.f32 %v608_v0, %v607_v53  ;;  %v583_v32 = vadd.f32 %v582_v55, %v581_v17  ;;  %v586_v22 = vmul.f32 %v1871_v29, %v1581_v56  ;;  %v588_v13 = vmul.f32 %v1874_v24, %v1604_v61  ;;  %v2617_v55 = vld [vmem:[#allocation61_spill] sm:$0xff]  ;;  %v2624_v19 = vld [vmem:[#allocation78_spill] sm:$0xff] }
  0xb3   :  { %v590_v12 = vmul.f32 %v1883_v15, %v2614_v10  ;;  %v614_v14 = vmul.f32 %v1851_v4, %v2615_v8  ;;  %v633_v0 = vadd.f32 %v632_v60, %v631_v48  ;;  %v636_v45 = vmul.f32 %v1822_v21, %v2616_v51  ;;  %v2625_v10 = vld [vmem:[#allocation73_spill] sm:$0xff] }
  0xb4   :  { %v611_v25 = vadd.f32 %v610_v6, %v609_v50  ;;  %v495_v57 = vadd.f32 %v1926_v52, %v493_v46  ;;  %v525_v17 = vadd.f32 %v524_v35, %v523_v1  ;;  %v555_v20 = vadd.f32 %v554_v5, %v553_v36  ;;  %v2622_v35 = vld [vmem:[#allocation51_spill] sm:$0xff]  ;;  %v2623_v50 = vld [vmem:[#allocation57_spill] sm:$0xff] }
  0xb5   :  { %v638_v56 = vmul.f32 %v1827_v41, %v2617_v55  ;;  %v635_v61 = vadd.f32 %v634_v58, %v633_v0  ;;  %v659_v53 = vmul.f32 %v1801_v38, %v2618_v31  ;;  %v660_v6 = vmul.f32 %v1804_v9, %v2619_v2 }
  0xb6   :  { %v613_v30 = vadd.f32 %v612_v34, %v611_v25  ;;  %v585_v37 = vadd.f32 %v584_v63, %v583_v32  ;;  %v616_v60 = vmul.f32 %v1858_v49, %v2620_v62  ;;  %v640_v52 = vmul.f32 %v1836_v40, %v2621_v7  ;;  %v2633_v7 = vld [vmem:[#allocation74_spill] sm:$0xff] }
  0xb7   :  { %v662_v5 = vmul.f32 %v1807_v16, %v2622_v35  ;;  %v637_v1 = vadd.f32 %v636_v45, %v635_v61  ;;  %v661_v36 = vadd.f32 %v660_v6, %v659_v53  ;;  %v664_v18 = vmul.f32 %v1810_v33, %v2623_v50  ;;  %v2630_v53 = vld [vmem:[#allocation80_spill] sm:$0xff]  ;;  %v2631_v6 = vld [vmem:[#allocation67_spill] sm:$0xff] }
  0xb8   :  { %v615_v46 = vadd.f32 %v614_v14, %v613_v30  ;;  %v2039_v34 = vadd.f32 %v1930_v42, %v495_v57  ;;  %v557_v48 = vadd.f32 %v556_v47, %v555_v20  ;;  %v592_v63 = vmul.f32 %v1886_v23, %v1658_v11  ;;  %v2626_v14 = vld [vmem:[#allocation65_spill] sm:$0xff]  ;;  %v2628_v57 = vld [vmem:[#allocation79_spill] sm:$0xff] }
  0xb9   :  { %v618_v58 = vmul.f32 %v1871_v29, %v2624_v19  ;;  %v639_v32 = vadd.f32 %v638_v56, %v637_v1  ;;  %v642_v25 = vmul.f32 %v1845_v39, %v2625_v10  ;;  %v663_v8 = vadd.f32 %v662_v5, %v661_v36  ;;  %v2627_v42 = vld [vmem:[#allocation85_spill] sm:$0xff]  ;;  %v2636_v36 = vld [vmem:[#allocation71_spill] sm:$0xff] }
  0xba   :  { %v666_v0 = vmul.f32 %v1813_v54, %v2626_v14  ;;  %v527_v51 = vadd.f32 %v1966_v43, %v525_v17  ;;  %v587_v45 = vadd.f32 %v586_v22, %v585_v37  ;;  %v620_v47 = vmul.f32 %v1874_v24, %v2627_v42  ;;  %v2629_v56 = vld [vmem:[#allocation69_spill] sm:$0xff]  ;;  %v2632_v22 = vld [vmem:[#allocation68_spill] sm:$0xff] }
  0xbb   :  { %v644_v11 = vmul.f32 %v1848_v3, %v2628_v57  ;;  %v617_v20 = vadd.f32 %v616_v60, %v615_v46  ;;  %v641_v55 = vadd.f32 %v640_v52, %v639_v32  ;;  %v665_v30 = vadd.f32 %v664_v18, %v663_v8  ;;  %v2634_v52 = vld [vmem:[#allocation70_spill] sm:$0xff]  ;;  %v2638_v10 = vld [vmem:[#allocation77_spill] sm:$0xff]  ;;  %v2641_v57 = vld [vmem:[#allocation83_spill] sm:$0xff] }
  0xbc   :  { %v668_v61 = vmul.f32 %v1822_v21, %v2629_v56  ;;  %v559_v31 = vadd.f32 %v1984_v44, %v557_v48  ;;  %v646_v2 = vmul.f32 %v1851_v4, %v2630_v53  ;;  %v691_v43 = vmul.f32 %v1801_v38, %v2631_v6  ;;  %v2635_v46 = vld [vmem:[#allocation86_spill] sm:$0xff]  ;;  %v2639_v14 = vld [vmem:[#allocation89_spill] sm:$0xff] }
  0xbd   :  { %v692_v17 = vmul.f32 %v1804_v9, %v2632_v22  ;;  %v643_v37 = vadd.f32 %v642_v25, %v641_v55  ;;  %v667_v62 = vadd.f32 %v666_v0, %v665_v30  ;;  %v670_v60 = vmul.f32 %v1827_v41, %v2633_v7  ;;  %v2637_v9 = vld [vmem:[#allocation81_spill] sm:$0xff]  ;;  %v2640_v0 = vld [vmem:[#allocation82_spill] sm:$0xff] }
  0xbe   :  { %v694_v35 = vmul.f32 %v1807_v16, %v2634_v52  ;;  %v589_v5 = vadd.f32 %v588_v13, %v587_v45  ;;  %v648_v44 = vmul.f32 %v1858_v49, %v2635_v46  ;;  %v696_v50 = vmul.f32 %v1810_v33, %v2636_v36  ;;  %v2643_v56 = vld [vmem:[#allocation93_spill] sm:$0xff] }
  0xbf   :  { %v693_v1 = vadd.f32 %v692_v17, %v691_v43  ;;  %v619_v38 = vadd.f32 %v618_v58, %v617_v20  ;;  %v645_v18 = vadd.f32 %v644_v11, %v643_v37  ;;  %v669_v48 = vadd.f32 %v668_v61, %v667_v62  ;;  %v2645_v43 = vld [vmem:[#allocation90_spill] sm:$0xff]  ;;  %v2647_v62 = vld [vmem:[#allocation88_spill] sm:$0xff] }
  0xc0   :  { %v672_v19 = vmul.f32 %v1836_v40, %v2637_v9  ;;  %v2074_v32 = vadd.f32 %v1970_v59, %v527_v51  ;;  %v622_v16 = vmul.f32 %v1883_v15, %v1674_v27  ;;  %v698_v25 = vmul.f32 %v1813_v54, %v2638_v10  ;;  %v2642_v54 = vld [vmem:[#allocation87_spill] sm:$0xff] }
  0xc1   :  { %v695_v13 = vadd.f32 %v694_v35, %v693_v1  ;;  %v647_v8 = vadd.f32 %v646_v2, %v645_v18  ;;  %v650_v33 = vmul.f32 %v1871_v29, %v2639_v14  ;;  %v671_v58 = vadd.f32 %v670_v60, %v669_v48  ;;  %v2644_v2 = vld [vmem:[#allocation84_spill] sm:$0xff]  ;;  %v2648_v35 = vld [vmem:[#allocation94_spill] sm:$0xff]  ;;  %v2651_v9 = vld [vmem:[#allocation95_spill] sm:$0xff] }
  0xc2   :  { %v674_v45 = vmul.f32 %v1845_v39, %v2640_v0  ;;  %v2085_v42 = vadd.f32 %v1996_v26, %v559_v31  ;;  %v591_v59 = vadd.f32 %v590_v12, %v589_v5  ;;  %v700_v27 = vmul.f32 %v1822_v21, %v2641_v57  ;;  %v2649_v1 = vld [vmem:[#allocation92_spill] sm:$0xff]  ;;  %v2653_v10 = vld [vmem:[#allocation99_spill] sm:$0xff]  ;;  %v2654_v14 = vld [vmem:[#allocation97_spill] sm:$0xff] }
  0xc3   :  { %v697_v51 = vadd.f32 %v696_v50, %v695_v13  ;;  %v621_v11 = vadd.f32 %v620_v47, %v619_v38  ;;  %v649_v20 = vadd.f32 %v648_v44, %v647_v8  ;;  %v673_v55 = vadd.f32 %v672_v19, %v671_v58  ;;  %v2646_v47 = vld [vmem:[#allocation91_spill] sm:$0xff]  ;;  %v2650_v18 = vld [vmem:[#allocation96_spill] sm:$0xff]  ;;  %v2652_v19 = vld [vmem:[#allocation98_spill] sm:$0xff] }
  0xc4   :  { %v676_v30 = vmul.f32 %v1848_v3, %v2642_v54  ;;  %v652_v61 = vmul.f32 %v1874_v24, %v2643_v56  ;;  %v702_v6 = vmul.f32 %v1827_v41, %v2644_v2  ;;  %v723_v26 = vmax.f32 %v2039_v34, %v2074_v32  ;;  %v2659_v2 = vld [vmem:[#allocation104_spill] sm:$0xff] }
  0xc5   :  { %v699_v53 = vadd.f32 %v698_v25, %v697_v51  ;;  %v651_v12 = vadd.f32 %v650_v33, %v649_v20  ;;  %v675_v31 = vadd.f32 %v674_v45, %v673_v55  ;;  %v678_v21 = vmul.f32 %v1851_v4, %v2645_v43  ;;  %v2655_v45 = vld [vmem:[#allocation101_spill] sm:$0xff] }
  0xc6   :  { %v624_v22 = vmul.f32 %v1886_v23, %v2646_v47  ;;  %v654_v17 = vmul.f32 %v1883_v15, %v1715_v28  ;;  %v704_v7 = vmul.f32 %v1836_v40, %v2647_v62  ;;  %v593_v60 = vadd.f32 %v592_v63, %v591_v59  ;;  %v2661_v47 = vld [vmem:[#allocation106_spill] sm:$0xff] }
  0xc7   :  { %v701_v37 = vadd.f32 %v700_v27, %v699_v53  ;;  %v623_v41 = vadd.f32 %v622_v16, %v621_v11  ;;  %v677_v52 = vadd.f32 %v676_v30, %v675_v31  ;;  %v680_v5 = vmul.f32 %v1858_v49, %v2648_v35  ;;  %v2657_v11 = vld [vmem:[#allocation103_spill] sm:$0xff]  ;;  %v2658_v30 = vld [vmem:[#allocation102_spill] sm:$0xff]  ;;  %v2660_v31 = vld [vmem:[#allocation105_spill] sm:$0xff] }
  0xc8   :  { %v653_v46 = vadd.f32 %v652_v61, %v651_v12  ;;  %v706_v36 = vmul.f32 %v1845_v39, %v2649_v1  ;;  %v724_v50 = vmax.f32 %v723_v26, %v2085_v42  ;;  %v682_v28 = vmul.f32 %v1871_v29, %v2650_v18 }
  0xc9   :  { %v703_v44 = vadd.f32 %v702_v6, %v701_v37  ;;  %v679_v38 = vadd.f32 %v678_v21, %v677_v52  ;;  %v708_v40 = vmul.f32 %v1848_v3, %v2651_v9  ;;  %v625_v63 = vadd.f32 %v624_v22, %v623_v41  ;;  %v2656_v3 = vld [vmem:[#allocation100_spill] sm:$0xff] }
  0xca   :  { %v656_v16 = vmul.f32 %v1886_v23, %v2652_v19  ;;  %v684_v25 = vmul.f32 %v1874_v24, %v2653_v10  ;;  %v655_v8 = vadd.f32 %v654_v17, %v653_v46  ;;  %v710_v33 = vmul.f32 %v1851_v4, %v2654_v14 }
  0xcb   :  { %v705_v48 = vadd.f32 %v704_v7, %v703_v44  ;;  %v681_v13 = vadd.f32 %v680_v5, %v679_v38  ;;  %v725_v58 = vmax.f32 %v724_v50, %v593_v60  ;;  %v686_v59 = vmul.f32 %v1883_v15, %v2655_v45 }
  0xcc   :  { %v712_v57 = vmul.f32 %v1858_v49, %v2656_v3  ;;  %v688_v20 = vmul.f32 %v1886_v23, %v2657_v11  ;;  %v657_v55 = vadd.f32 %v656_v16, %v655_v8  ;;  %v714_v56 = vmul.f32 %v1871_v29, %v2658_v30  ;;  %v1153_v30 = vld [vmem:[#allocation2 + $0x1] sm:$0x1] }
  0xcd   :  { %v707_v39 = vadd.f32 %v706_v36, %v705_v48  ;;  %v683_v0 = vadd.f32 %v682_v28, %v681_v13  ;;  %v726_v61 = vmax.f32 %v725_v58, %v625_v63  ;;  %v716_v6 = vmul.f32 %v1874_v24, %v2659_v2 }
  0xce   :  { %v718_v49 = vmul.f32 %v1883_v15, %v2660_v31  ;;  %v720_v22 = vmul.f32 %v1886_v23, %v2661_v47 }
  0xcf   :  { %v709_v51 = vadd.f32 %v708_v40, %v707_v39  ;;  %v685_v27 = vadd.f32 %v684_v25, %v683_v0  ;;  %v727_v43 = vmax.f32 %v726_v61, %v657_v55  ;;  %v1154_v61 = vld [vmem:[#allocation2 + $0x2] sm:$0x1] }
  0xd1   :  { %v711_v54 = vadd.f32 %v710_v33, %v709_v51  ;;  %v687_v4 = vadd.f32 %v686_v59, %v685_v27 }
  0xd3   :  { %v713_v53 = vadd.f32 %v712_v57, %v711_v54  ;;  %v689_v26 = vadd.f32 %v688_v20, %v687_v4 }
  0xd5   :  { %v715_v12 = vadd.f32 %v714_v56, %v713_v53  ;;  %v728_v37 = vmax.f32 %v727_v43, %v689_v26  ;;  %v1155_v53 = vld [vmem:[#allocation2 + $0x3] sm:$0x1] }
  0xd7   :  { %v717_v21 = vadd.f32 %v716_v6, %v715_v12  ;;  %v1156_v6 = vld [vmem:[#allocation2 + $0x4] sm:$0x1]  ;;  %v1157_v12 = vld [vmem:[#allocation2 + $0x5] sm:$0x1] }
  0xd9   :  { %v719_v17 = vadd.f32 %v718_v49, %v717_v21  ;;  %v1158_v49 = vld [vmem:[#allocation2 + $0x6] sm:$0x1]  ;;  %v1159_v21 = vld [vmem:[#allocation2 + $0x7] sm:$0x1] }
  0xdb   :  { %v721_v62 = vadd.f32 %v720_v22, %v719_v17  ;;  %v1160_v22 = vld [vmem:[#allocation2 + $0x10] sm:$0x1] }
  0xdd   :  { %v729_v29 = vmax.f32 %v728_v37, %v721_v62  ;;  %v1161_v37 = vld [vmem:[#allocation2 + $0x11] sm:$0x1] }
  0xdf   :  { %v730_v7 = vsub.f32 %v2039_v34, %v729_v29  ;;  %v733_v41 = vsub.f32 %v2074_v32, %v729_v29  ;;  %v736_v24 = vsub.f32 %v2085_v42, %v729_v29  ;;  %v739_v52 = vsub.f32 %v593_v60, %v729_v29 }
  0xe0   :  { %v742_v35 = vsub.f32 %v625_v63, %v729_v29  ;;  %v745_v1 = vsub.f32 %v657_v55, %v729_v29  ;;  %v748_v36 = vsub.f32 %v689_v26, %v729_v29  ;;  %v751_v38 = vsub.f32 %v721_v62, %v729_v29  ;;  %v1152_v55 = vld [vmem:[#allocation2] sm:$0x1]  ;;  %v1162_v29 = vld [vmem:[#allocation2 + $0x12] sm:$0x1] }
  0xe1   :  { %v731_v5 = vmul.f32 1.442695, %v730_v7  ;;  %v734_v46 = vmul.f32 1.442695, %v733_v41  ;;  %v737_v15 = vmul.f32 1.442695, %v736_v24 }
  0xe2   :  { %v740_v44 = vmul.f32 1.442695, %v739_v52  ;;  %v743_v23 = vmul.f32 1.442695, %v742_v35  ;;  %v746_v50 = vmul.f32 1.442695, %v745_v1 }
  0xe3   :  { %1130 = vpow2.f32 %v731_v5  ;;  %v749_v34 = vmul.f32 1.442695, %v748_v36  ;;  %v752_v42 = vmul.f32 1.442695, %v751_v38  ;;  %v1163_v41 = vld [vmem:[#allocation2 + $0x8] sm:$0x1] }
  0xe4   :  { %1132 = vpow2.f32 %v734_v46  ;;  %v1164_v52 = vld [vmem:[#allocation2 + $0x9] sm:$0x1]  ;;  %v1165_v5 = vld [vmem:[#allocation2 + $0x13] sm:$0x1]  ;;  %v1167_v1 = vld [vmem:[#allocation2 + $0xa] sm:$0x1] }
  0xe5   :  { %1134 = vpow2.f32 %v737_v15  ;;  %v1166_v15 = vld [vmem:[#allocation2 + $0x14] sm:$0x1]  ;;  %v1168_v36 = vld [vmem:[#allocation2 + $0x15] sm:$0x1]  ;;  %v1169_v38 = vld [vmem:[#allocation2 + $0x16] sm:$0x1] }
  0xe6   :  { %1136 = vpow2.f32 %v740_v44 }
  0xe7   :  { %1138 = vpow2.f32 %v743_v23 }
  0xe8   :  { %1140 = vpow2.f32 %v746_v50 }
  0xe9   :  { %v1131_v32 = vpop.eup %1130  ;;  %1142 = vpow2.f32 %v749_v34 }
  0xea   :  { %v1133_v18 = vpop.eup %1132  ;;  %1144 = vpow2.f32 %v752_v42  ;;  %v1171_v42 = vld [vmem:[#allocation2 + $0xb] sm:$0x1] }
  0xeb   :  { %v1135_v60 = vpop.eup %1134  ;;  %v754_v28 = vadd.f32 %v1133_v18, %v1131_v32 }
  0xec   :  { %v1137_v48 = vpop.eup %1136 }
  0xed   :  { %v755_v9 = vadd.f32 %v1135_v60, %v754_v28  ;;  %v1139_v40 = vpop.eup %1138  ;;  %v1172_v28 = vld [vmem:[#allocation2 + $0xc] sm:$0x1] }
  0xee   :  { %v1141_v19 = vpop.eup %1140 }
  0xef   :  { %v756_v63 = vadd.f32 %v1137_v48, %v755_v9  ;;  %v1143_v13 = vpop.eup %1142  ;;  %v1173_v9 = vld [vmem:[#allocation2 + $0xd] sm:$0x1] }
  0xf0   :  { %v1145_v25 = vpop.eup %1144 }
  0xf1   :  { %v757_v16 = vadd.f32 %v1139_v40, %v756_v63  ;;  %v1174_v63 = vld [vmem:[#allocation2 + $0xe] sm:$0x1] }
  0xf3   :  { %v758_v10 = vadd.f32 %v1141_v19, %v757_v16  ;;  %v1175_v16 = vld [vmem:[#allocation2 + $0xf] sm:$0x1] }
  0xf5   :  { %v759_v8 = vadd.f32 %v1143_v13, %v758_v10 }
  0xf7   :  { %v760_v39 = vadd.f32 %v1145_v25, %v759_v8 }
  0xf9   :  { %1146 = vrcp.f32 %v760_v39 }
  0xff   :  { %v1147_v14 = vpop.eup %1146 }
 0x100   :  { %v762_v33 = vmul.f32 %v1147_v14, %v760_v39 }
 0x102   :  { %v763_v58 = vsub.f32 2.0, %v762_v33  ;;  %v1176_v33 = vld [vmem:[#allocation2 + $0x18] sm:$0x1] }
 0x104   :  { %v764_v0 = vmul.f32 %v1147_v14, %v763_v58 }
 0x106   :  { %v765_v45 = vmul.f32 %v1131_v32, %v764_v0  ;;  %v2137_v59 = vmul.f32 %v1133_v18, %v764_v0  ;;  %v2139_v51 = vmul.f32 %v1135_v60, %v764_v0  ;;  %v2141_v3 = vmul.f32 %v1137_v48, %v764_v0  ;;  %v1170_v32 = vld [vmem:[#allocation2 + $0x17] sm:$0x1] }
 0x107   :  { %v2143_v57 = vmul.f32 %v1139_v40, %v764_v0  ;;  %v2145_v27 = vmul.f32 %v1141_v19, %v764_v0  ;;  %v2147_v11 = vmul.f32 %v1143_v13, %v764_v0  ;;  %v2149_v20 = vmul.f32 %v1145_v25, %v764_v0  ;;  %v1177_v0 = vld [vmem:[#allocation2 + $0x19] sm:$0x1] }
 0x108   :  { %v773_v54 = vmul.f32 %v1152_v55, %v765_v45  ;;  %v774_v56 = vmul.f32 %v1153_v30, %v765_v45  ;;  %v775_v4 = vmul.f32 %v1154_v61, %v765_v45  ;;  %v776_v2 = vmul.f32 %v1155_v53, %v765_v45 }
 0x109   :  { %v777_v26 = vmul.f32 %v1156_v6, %v765_v45  ;;  %v778_v31 = vmul.f32 %v1157_v12, %v765_v45  ;;  %v779_v43 = vmul.f32 %v1158_v49, %v765_v45  ;;  %v780_v47 = vmul.f32 %v1159_v21, %v765_v45  ;;  %v1178_v6 = vld [vmem:[#allocation2 + $0x1a] sm:$0x1]  ;;  %v1179_v49 = vld [vmem:[#allocation2 + $0x1b] sm:$0x1] }
 0x10a   :  { %v789_v17 = vmul.f32 %v1160_v22, %v2137_v59  ;;  %v791_v62 = vmul.f32 %v1161_v37, %v2137_v59  ;;  %v793_v7 = vmul.f32 %v1162_v29, %v2137_v59  ;;  %v781_v24 = vmul.f32 %v1163_v41, %v765_v45  ;;  %v1183_v22 = vld [vmem:[#allocation2 + $0x1f] sm:$0x1] }
 0x10b   :  { %v782_v35 = vmul.f32 %v1164_v52, %v765_v45  ;;  %v795_v46 = vmul.f32 %v1165_v5, %v2137_v59  ;;  %v797_v44 = vmul.f32 %v1166_v15, %v2137_v59  ;;  %v783_v23 = vmul.f32 %v1167_v1, %v765_v45  ;;  %v1187_v52 = vld [vmem:[#allocation2 + $0x23] sm:$0x1]  ;;  %v1189_v1 = vld [vmem:[#allocation2 + $0x25] sm:$0x1] }
 0x10c   :  { %v799_v50 = vmul.f32 %v1168_v36, %v2137_v59  ;;  %v801_v34 = vmul.f32 %v1169_v38, %v2137_v59  ;;  %v803_v18 = vmul.f32 %v1170_v32, %v2137_v59  ;;  %v784_v60 = vmul.f32 %v1171_v42, %v765_v45  ;;  %v1190_v36 = vld [vmem:[#allocation2 + $0x26] sm:$0x1]  ;;  %v1191_v38 = vld [vmem:[#allocation2 + $0x27] sm:$0x1] }
 0x10d   :  { %v785_v48 = vmul.f32 %v1172_v28, %v765_v45  ;;  %v786_v40 = vmul.f32 %v1173_v9, %v765_v45  ;;  %v787_v19 = vmul.f32 %v1174_v63, %v765_v45  ;;  %v788_v13 = vmul.f32 %v1175_v16, %v765_v45 }
 0x10e   :  { %v790_v10 = vadd.f32 %v789_v17, %v773_v54  ;;  %v792_v25 = vadd.f32 %v791_v62, %v774_v56  ;;  %v794_v8 = vadd.f32 %v793_v7, %v775_v4  ;;  %v796_v39 = vadd.f32 %v795_v46, %v776_v2  ;;  %v1180_v54 = vld [vmem:[#allocation2 + $0x1c] sm:$0x1]  ;;  %v1181_v4 = vld [vmem:[#allocation2 + $0x1d] sm:$0x1]  ;;  %v1185_v17 = vld [vmem:[#allocation2 + $0x21] sm:$0x1] }
 0x10f   :  { %v798_v14 = vadd.f32 %v797_v44, %v777_v26  ;;  %v805_v58 = vmul.f32 %v1176_v33, %v2137_v59  ;;  %v807_v55 = vmul.f32 %v1177_v0, %v2137_v59  ;;  %v800_v30 = vadd.f32 %v799_v50, %v778_v31  ;;  %v1182_v26 = vld [vmem:[#allocation2 + $0x1e] sm:$0x1]  ;;  %v1186_v62 = vld [vmem:[#allocation2 + $0x22] sm:$0x1]  ;;  %v1188_v46 = vld [vmem:[#allocation2 + $0x24] sm:$0x1] }
 0x110   :  { %v802_v61 = vadd.f32 %v801_v34, %v779_v43  ;;  %v804_v53 = vadd.f32 %v803_v18, %v780_v47  ;;  %v809_v12 = vmul.f32 %v1178_v6, %v2137_v59  ;;  %v811_v45 = vmul.f32 %v1179_v49, %v2137_v59  ;;  %v1184_v43 = vld [vmem:[#allocation2 + $0x20] sm:$0x1]  ;;  %v1193_v0 = vld [vmem:[#allocation2 + $0x29] sm:$0x1] }
 0x111   :  { %v813_v56 = vmul.f32 %v1180_v54, %v2137_v59  ;;  %v815_v2 = vmul.f32 %v1181_v4, %v2137_v59  ;;  %v817_v21 = vmul.f32 %v1182_v26, %v2137_v59  ;;  %v819_v31 = vmul.f32 %v1183_v22, %v2137_v59  ;;  %v1194_v54 = vld [vmem:[#allocation2 + $0x2a] sm:$0x1]  ;;  %v1202_v4 = vld [vmem:[#allocation2 + $0x32] sm:$0x1]  ;;  %v1203_v22 = vld [vmem:[#allocation2 + $0x33] sm:$0x1] }
 0x112   :  { %v821_v47 = vmul.f32 %v1184_v43, %v2139_v51  ;;  %v823_v37 = vmul.f32 %v1185_v17, %v2139_v51  ;;  %v825_v29 = vmul.f32 %v1186_v62, %v2139_v51  ;;  %v806_v7 = vadd.f32 %v805_v58, %v781_v24  ;;  %v1204_v43 = vld [vmem:[#allocation2 + $0x34] sm:$0x1]  ;;  %v1206_v62 = vld [vmem:[#allocation2 + $0x36] sm:$0x1] }
 0x113   :  { %v808_v41 = vadd.f32 %v807_v55, %v782_v35  ;;  %v827_v5 = vmul.f32 %v1187_v52, %v2139_v51  ;;  %v829_v15 = vmul.f32 %v1188_v46, %v2139_v51  ;;  %v810_v44 = vadd.f32 %v809_v12, %v783_v23  ;;  %v1192_v23 = vld [vmem:[#allocation2 + $0x28] sm:$0x1]  ;;  %v1207_v52 = vld [vmem:[#allocation2 + $0x37] sm:$0x1] }
 0x114   :  { %v831_v59 = vmul.f32 %v1189_v1, %v2139_v51  ;;  %v833_v50 = vmul.f32 %v1190_v36, %v2139_v51  ;;  %v835_v34 = vmul.f32 %v1191_v38, %v2139_v51  ;;  %v812_v32 = vadd.f32 %v811_v45, %v784_v60  ;;  %v1201_v45 = vld [vmem:[#allocation2 + $0x31] sm:$0x1] }
 0x115   :  { %v814_v18 = vadd.f32 %v813_v56, %v785_v48  ;;  %v816_v24 = vadd.f32 %v815_v2, %v786_v40  ;;  %v818_v35 = vadd.f32 %v817_v21, %v787_v19  ;;  %v820_v42 = vadd.f32 %v819_v31, %v788_v13  ;;  %v1195_v48 = vld [vmem:[#allocation2 + $0x2b] sm:$0x1]  ;;  %v1196_v19 = vld [vmem:[#allocation2 + $0x2c] sm:$0x1] }
 0x116   :  { %v822_v28 = vadd.f32 %v821_v47, %v790_v10  ;;  %v824_v9 = vadd.f32 %v823_v37, %v792_v25  ;;  %v826_v63 = vadd.f32 %v825_v29, %v794_v8  ;;  %v828_v16 = vadd.f32 %v827_v5, %v796_v39  ;;  %v1197_v10 = vld [vmem:[#allocation2 + $0x2d] sm:$0x1]  ;;  %v1198_v8 = vld [vmem:[#allocation2 + $0x2e] sm:$0x1]  ;;  %v1205_v37 = vld [vmem:[#allocation2 + $0x35] sm:$0x1] }
 0x117   :  { %v830_v33 = vadd.f32 %v829_v15, %v798_v14  ;;  %v837_v58 = vmul.f32 %v1192_v23, %v2139_v51  ;;  %v839_v55 = vmul.f32 %v1193_v0, %v2139_v51  ;;  %v832_v6 = vadd.f32 %v831_v59, %v800_v30  ;;  %v1199_v14 = vld [vmem:[#allocation2 + $0x2f] sm:$0x1] }
 0x118   :  { %v834_v12 = vadd.f32 %v833_v50, %v802_v61  ;;  %v836_v49 = vadd.f32 %v835_v34, %v804_v53  ;;  %v841_v60 = vmul.f32 %v1194_v54, %v2139_v51  ;;  %v843_v40 = vmul.f32 %v1195_v48, %v2139_v51  ;;  %v1200_v61 = vld [vmem:[#allocation2 + $0x30] sm:$0x1]  ;;  %v1210_v48 = vld [vmem:[#allocation2 + $0x3a] sm:$0x1] }
 0x119   :  { %v845_v13 = vmul.f32 %v1196_v19, %v2139_v51  ;;  %v847_v25 = vmul.f32 %v1197_v10, %v2139_v51  ;;  %v849_v39 = vmul.f32 %v1198_v8, %v2139_v51  ;;  %v851_v30 = vmul.f32 %v1199_v14, %v2139_v51 }
 0x11a   :  { %v853_v53 = vmul.f32 %v1200_v61, %v2141_v3  ;;  %v855_v56 = vmul.f32 %v1201_v45, %v2141_v3  ;;  %v857_v2 = vmul.f32 %v1202_v4, %v2141_v3  ;;  %v838_v26 = vadd.f32 %v837_v58, %v806_v7  ;;  %v1209_v58 = vld [vmem:[#allocation2 + $0x39] sm:$0x1]  ;;  %v1221_v45 = vld [vmem:[#allocation2 + $0x45] sm:$0x1] }
 0x11b   :  { %v840_v21 = vadd.f32 %v839_v55, %v808_v41  ;;  %v859_v31 = vmul.f32 %v1203_v22, %v2141_v3  ;;  %v861_v47 = vmul.f32 %v1204_v43, %v2141_v3  ;;  %v842_v17 = vadd.f32 %v841_v60, %v810_v44  ;;  %v1208_v44 = vld [vmem:[#allocation2 + $0x38] sm:$0x1] }
 0x11c   :  { %v863_v51 = vmul.f32 %v1205_v37, %v2141_v3  ;;  %v865_v29 = vmul.f32 %v1206_v62, %v2141_v3  ;;  %v867_v5 = vmul.f32 %v1207_v52, %v2141_v3  ;;  %v844_v46 = vadd.f32 %v843_v40, %v812_v32  ;;  %v1217_v40 = vld [vmem:[#allocation2 + $0x41] sm:$0x1]  ;;  %v1224_v52 = vld [vmem:[#allocation2 + $0x50] sm:$0x1] }
 0x11d   :  { %v846_v15 = vadd.f32 %v845_v13, %v814_v18  ;;  %v848_v7 = vadd.f32 %v847_v25, %v816_v24  ;;  %v850_v41 = vadd.f32 %v849_v39, %v818_v35  ;;  %v852_v1 = vadd.f32 %v851_v30, %v820_v42  ;;  %v1211_v18 = vld [vmem:[#allocation2 + $0x3b] sm:$0x1]  ;;  %v1212_v35 = vld [vmem:[#allocation2 + $0x3c] sm:$0x1]  ;;  %v1218_v13 = vld [vmem:[#allocation2 + $0x42] sm:$0x1] }
 0x11e   :  { %v854_v59 = vadd.f32 %v853_v53, %v822_v28  ;;  %v856_v36 = vadd.f32 %v855_v56, %v824_v9  ;;  %v858_v50 = vadd.f32 %v857_v2, %v826_v63  ;;  %v860_v38 = vadd.f32 %v859_v31, %v828_v16  ;;  %v1213_v28 = vld [vmem:[#allocation2 + $0x3d] sm:$0x1]  ;;  %v1214_v63 = vld [vmem:[#allocation2 + $0x3e] sm:$0x1]  ;;  %v1219_v39 = vld [vmem:[#allocation2 + $0x43] sm:$0x1] }
 0x11f   :  { %v862_v34 = vadd.f32 %v861_v47, %v830_v33  ;;  %v869_v23 = vmul.f32 %v1208_v44, %v2141_v3  ;;  %v871_v0 = vmul.f32 %v1209_v58, %v2141_v3  ;;  %v864_v55 = vadd.f32 %v863_v51, %v832_v6  ;;  %v1215_v33 = vld [vmem:[#allocation2 + $0x3f] sm:$0x1]  ;;  %v1220_v30 = vld [vmem:[#allocation2 + $0x44] sm:$0x1]  ;;  %v1222_v56 = vld [vmem:[#allocation2 + $0x46] sm:$0x1] }
 0x120   :  { %v866_v54 = vadd.f32 %v865_v29, %v834_v12  ;;  %v868_v60 = vadd.f32 %v867_v5, %v836_v49  ;;  %v873_v32 = vmul.f32 %v1210_v48, %v2141_v3  ;;  %v875_v24 = vmul.f32 %v1211_v18, %v2141_v3  ;;  %v1216_v12 = vld [vmem:[#allocation2 + $0x40] sm:$0x1]  ;;  %v1223_v2 = vld [vmem:[#allocation2 + $0x47] sm:$0x1]  ;;  %v1225_v44 = vld [vmem:[#allocation2 + $0x51] sm:$0x1] }
 0x121   :  { %v877_v42 = vmul.f32 %v1212_v35, %v2141_v3  ;;  %v879_v9 = vmul.f32 %v1213_v28, %v2141_v3  ;;  %v881_v16 = vmul.f32 %v1214_v63, %v2141_v3  ;;  %v883_v6 = vmul.f32 %v1215_v33, %v2141_v3  ;;  %v1227_v58 = vld [vmem:[#allocation2 + $0x48] sm:$0x1]  ;;  %v1233_v18 = vld [vmem:[#allocation2 + $0x53] sm:$0x1]  ;;  %v1234_v35 = vld [vmem:[#allocation2 + $0x54] sm:$0x1] }
 0x122   :  { %v885_v49 = vmul.f32 %v1216_v12, %v2143_v57  ;;  %v887_v19 = vmul.f32 %v1217_v40, %v2143_v57  ;;  %v889_v10 = vmul.f32 %v1218_v13, %v2143_v57  ;;  %v870_v25 = vadd.f32 %v869_v23, %v838_v26  ;;  %v1235_v63 = vld [vmem:[#allocation2 + $0x60] sm:$0x1]  ;;  %v1236_v33 = vld [vmem:[#allocation2 + $0x61] sm:$0x1]  ;;  %v1237_v12 = vld [vmem:[#allocation2 + $0x4e] sm:$0x1] }
 0x123   :  { %v872_v8 = vadd.f32 %v871_v0, %v840_v21  ;;  %v891_v14 = vmul.f32 %v1219_v39, %v2143_v57  ;;  %v893_v61 = vmul.f32 %v1220_v30, %v2143_v57  ;;  %v874_v53 = vadd.f32 %v873_v32, %v842_v17  ;;  %v1230_v0 = vld [vmem:[#allocation2 + $0x4b] sm:$0x1]  ;;  %v1238_v40 = vld [vmem:[#allocation2 + $0x4f] sm:$0x1] }
 0x124   :  { %v895_v3 = vmul.f32 %v1221_v45, %v2143_v57  ;;  %v897_v4 = vmul.f32 %v1222_v56, %v2143_v57  ;;  %v899_v22 = vmul.f32 %v1223_v2, %v2143_v57  ;;  %v876_v31 = vadd.f32 %v875_v24, %v844_v46  ;;  %v1240_v56 = vld [vmem:[#allocation2 + $0x55] sm:$0x1]  ;;  %v1241_v2 = vld [vmem:[#allocation2 + $0x56] sm:$0x1] }
 0x125   :  { %v2207_v43 = vadd.f32 %v877_v42, %v846_v15  ;;  %v2209_v26 = vadd.f32 %v879_v9, %v848_v7  ;;  %v2211_v21 = vadd.f32 %v881_v16, %v850_v41  ;;  %v2213_v47 = vadd.f32 %v883_v6, %v852_v1  ;;  %v1226_v41 = vld [vmem:[#allocation2 + $0x52] sm:$0x1] }
 0x126   :  { %v886_v37 = vadd.f32 %v885_v49, %v854_v59  ;;  %v888_v17 = vadd.f32 %v887_v19, %v856_v36  ;;  %v890_v51 = vadd.f32 %v889_v10, %v858_v50  ;;  %v892_v62 = vadd.f32 %v891_v14, %v860_v38  ;;  %v1228_v36 = vld [vmem:[#allocation2 + $0x49] sm:$0x1]  ;;  %v1229_v38 = vld [vmem:[#allocation2 + $0x4a] sm:$0x1]  ;;  %v1239_v10 = vld [vmem:[#allocation2 + $0x62] sm:$0x1] }
 0x127   :  { %v894_v29 = vadd.f32 %v893_v61, %v862_v34  ;;  %v917_v5 = vmul.f32 %v1224_v52, %v2145_v27  ;;  %v919_v23 = vmul.f32 %v1225_v44, %v2145_v27  ;;  %v896_v46 = vadd.f32 %v895_v3, %v864_v55  ;;  %v1231_v55 = vld [vmem:[#allocation2 + $0x4c] sm:$0x1] }
 0x128   :  { %v2217_v15 = vadd.f32 %v897_v4, %v866_v54  ;;  %v2219_v7 = vadd.f32 %v899_v22, %v868_v60  ;;  %v921_v1 = vmul.f32 %v1226_v41, %v2145_v27  ;;  %v901_v59 = vmul.f32 %v1227_v58, %v2143_v57  ;;  %v1232_v60 = vld [vmem:[#allocation2 + $0x4d] sm:$0x1] }
 0x129   :  { %v903_v50 = vmul.f32 %v1228_v36, %v2143_v57  ;;  %v905_v34 = vmul.f32 %v1229_v38, %v2143_v57  ;;  %v907_v48 = vmul.f32 %v1230_v0, %v2143_v57  ;;  %v909_v54 = vmul.f32 %v1231_v55, %v2143_v57 }
 0x12a   :  { %v911_v32 = vmul.f32 %v1232_v60, %v2143_v57  ;;  %v923_v24 = vmul.f32 %v1233_v18, %v2145_v27  ;;  %v925_v42 = vmul.f32 %v1234_v35, %v2145_v27  ;;  %v918_v28 = vadd.f32 %v917_v5, %v886_v37  ;;  %v1242_v37 = vld [vmem:[#allocation2 + $0x63] sm:$0x1]  ;;  %v1244_v5 = vld [vmem:[#allocation2 + $0x70] sm:$0x1]  ;;  %v1252_v35 = vld [vmem:[#allocation2 + $0x74] sm:$0x1] }
 0x12b   :  { %v920_v9 = vadd.f32 %v919_v23, %v888_v17  ;;  %v949_v16 = vmul.f32 %v1235_v63, %v2147_v11  ;;  %v951_v6 = vmul.f32 %v1236_v33, %v2147_v11  ;;  %v913_v49 = vmul.f32 %v1237_v12, %v2143_v57  ;;  %v1246_v23 = vld [vmem:[#allocation2 + $0x72] sm:$0x1] }
 0x12c   :  { %v915_v19 = vmul.f32 %v1238_v40, %v2143_v57  ;;  %v922_v13 = vadd.f32 %v921_v1, %v890_v51  ;;  %v953_v39 = vmul.f32 %v1239_v10, %v2147_v11  ;;  %v902_v14 = vadd.f32 %v901_v59, %v870_v25  ;;  %v1243_v25 = vld [vmem:[#allocation2 + $0x64] sm:$0x1]  ;;  %v1247_v59 = vld [vmem:[#allocation2 + $0x57] sm:$0x1] }
 0x12d   :  { %v2235_v30 = vadd.f32 %v903_v50, %v872_v8  ;;  %v2237_v61 = vadd.f32 %v905_v34, %v874_v53  ;;  %v2239_v45 = vadd.f32 %v907_v48, %v876_v31  ;;  %v924_v3 = vadd.f32 %v923_v24, %v892_v62  ;;  %v1245_v62 = vld [vmem:[#allocation2 + $0x71] sm:$0x1]  ;;  %v1248_v34 = vld [vmem:[#allocation2 + $0x65] sm:$0x1]  ;;  %v1249_v48 = vld [vmem:[#allocation2 + $0x73] sm:$0x1] }
 0x12e   :  { %v927_v4 = vmul.f32 %v1240_v56, %v2145_v27  ;;  %v929_v22 = vmul.f32 %v1241_v2, %v2145_v27  ;;  %v955_v57 = vmul.f32 %v1242_v37, %v2147_v11  ;;  %v926_v17 = vadd.f32 %v925_v42, %v894_v29 }
 0x12f   :  { %v950_v51 = vadd.f32 %v949_v16, %v918_v28  ;;  %v952_v52 = vadd.f32 %v951_v6, %v920_v9  ;;  %v957_v8 = vmul.f32 %v1243_v25, %v2147_v11  ;;  %v954_v53 = vadd.f32 %v953_v39, %v922_v13  ;;  %v1253_v9 = vld [vmem:[#allocation2 + $0x59] sm:$0x1]  ;;  %v1254_v16 = vld [vmem:[#allocation2 + $0x67] sm:$0x1]  ;;  %v1255_v6 = vld [vmem:[#allocation2 + $0x5a] sm:$0x1] }
 0x130   :  { %v981_v31 = vmul.f32 %v1244_v5, %v2149_v20  ;;  %v983_v44 = vmul.f32 %v1245_v62, %v2149_v20  ;;  %v985_v41 = vmul.f32 %v1246_v23, %v2149_v20  ;;  %v2249_v1 = vadd.f32 %v909_v54, %v2207_v43  ;;  %v1250_v54 = vld [vmem:[#allocation2 + $0x58] sm:$0x1]  ;;  %v1256_v13 = vld [vmem:[#allocation2 + $0x75] sm:$0x1]  ;;  %v1262_v23 = vld [vmem:[#allocation2 + $0x5c] sm:$0x1] }
 0x131   :  { %v2252_v29 = vadd.f32 %v911_v32, %v2209_v26  ;;  %v2255_v58 = vadd.f32 %v913_v49, %v2211_v21  ;;  %v931_v36 = vmul.f32 %v1247_v59, %v2145_v27  ;;  %v928_v50 = vadd.f32 %v927_v4, %v896_v46  ;;  %v1251_v32 = vld [vmem:[#allocation2 + $0x66] sm:$0x1]  ;;  %v1263_v59 = vld [vmem:[#allocation2 + $0x6a] sm:$0x1] }
 0x132   :  { %v956_v38 = vadd.f32 %v955_v57, %v924_v3  ;;  %v959_v0 = vmul.f32 %v1248_v34, %v2147_v11  ;;  %v987_v55 = vmul.f32 %v1249_v48, %v2149_v20  ;;  %v930_v43 = vadd.f32 %v929_v22, %v2217_v15  ;;  %v1258_v3 = vld [vmem:[#allocation2 + $0x76] sm:$0x1]  ;;  %v1259_v57 = vld [vmem:[#allocation2 + $0x5b] sm:$0x1] }
 0x133   :  { %v933_v26 = vmul.f32 %v1250_v54, %v2145_v27  ;;  %v958_v60 = vadd.f32 %v957_v8, %v926_v17  ;;  %v961_v21 = vmul.f32 %v1251_v32, %v2147_v11  ;;  %v2263_v18 = vadd.f32 %v981_v31, %v950_v51 }
 0x134   :  { %v2265_v24 = vadd.f32 %v983_v44, %v952_v52  ;;  %v2267_v46 = vadd.f32 %v985_v41, %v954_v53  ;;  %v989_v42 = vmul.f32 %v1252_v35, %v2149_v20  ;;  %v2271_v28 = vadd.f32 %v915_v19, %v2213_v47  ;;  %v1257_v19 = vld [vmem:[#allocation2 + $0x68] sm:$0x1]  ;;  %v1260_v52 = vld [vmem:[#allocation2 + $0x69] sm:$0x1]  ;;  %v1261_v53 = vld [vmem:[#allocation2 + $0x77] sm:$0x1] }
 0x135   :  { %v932_v15 = vadd.f32 %v931_v36, %v2219_v7  ;;  %v935_v63 = vmul.f32 %v1253_v9, %v2145_v27  ;;  %v963_v33 = vmul.f32 %v1254_v16, %v2147_v11  ;;  %v937_v12 = vmul.f32 %v1255_v6, %v2145_v27 }
 0x136   :  { %v960_v49 = vadd.f32 %v959_v0, %v928_v50  ;;  %v2277_v40 = vadd.f32 %v987_v55, %v956_v38  ;;  %v991_v10 = vmul.f32 %v1256_v13, %v2149_v20  ;;  %v934_v39 = vadd.f32 %v933_v26, %v902_v14  ;;  %v1264_v38 = vld [vmem:[#allocation2 + $0x78] sm:$0x1]  ;;  %v1266_v26 = vld [vmem:[#allocation2 + $0x6b] sm:$0x1] }
 0x137   :  { %v962_v47 = vadd.f32 %v961_v21, %v930_v43  ;;  %v965_v7 = vmul.f32 %v1257_v19, %v2147_v11  ;;  %v993_v56 = vmul.f32 %v1258_v3, %v2149_v20  ;;  %v2282_v4 = vadd.f32 %v989_v42, %v958_v60  ;;  %v1265_v43 = vld [vmem:[#allocation2 + $0x5d] sm:$0x1]  ;;  %v1267_v21 = vld [vmem:[#allocation2 + $0x79] sm:$0x1]  ;;  %v1271_v19 = vld [vmem:[#allocation2 + $0x5f] sm:$0x1] }
 0x138   :  { %v1013_v2 = vmul.f32 %v2263_v18, %v2263_v18  ;;  %v1014_v22 = vmul.f32 %v2265_v24, %v2265_v24  ;;  %v1016_v37 = vmul.f32 %v2267_v46, %v2267_v46  ;;  %v936_v14 = vadd.f32 %v935_v63, %v2235_v30  ;;  %v1268_v63 = vld [vmem:[#allocation2 + $0x5e] sm:$0x1]  ;;  %v1272_v3 = vld [vmem:[#allocation2 + $0x6d] sm:$0x1] }
 0x139   :  { %v939_v17 = vmul.f32 %v1259_v57, %v2145_v27  ;;  %v964_v51 = vadd.f32 %v963_v33, %v932_v15  ;;  %v967_v25 = vmul.f32 %v1260_v52, %v2147_v11  ;;  %v2293_v8 = vadd.f32 %v991_v10, %v960_v49  ;;  %v1269_v33 = vld [vmem:[#allocation2 + $0x6c] sm:$0x1]  ;;  %v1270_v49 = vld [vmem:[#allocation2 + $0x7a] sm:$0x1] }
 0x13a   :  { %v995_v5 = vmul.f32 %v1261_v53, %v2149_v20  ;;  %v1015_v31 = vadd.f32 %v1014_v22, %v1013_v2  ;;  %v1018_v62 = vmul.f32 %v2277_v40, %v2277_v40  ;;  %v938_v44 = vadd.f32 %v937_v12, %v2237_v61  ;;  %v1273_v22 = vld [vmem:[#allocation2 + $0x7b] sm:$0x1] }
 0x13b   :  { %v941_v30 = vmul.f32 %v1262_v23, %v2145_v27  ;;  %v966_v41 = vadd.f32 %v965_v7, %v934_v39  ;;  %v969_v36 = vmul.f32 %v1263_v59, %v2147_v11  ;;  %v2301_v50 = vadd.f32 %v993_v56, %v962_v47  ;;  %v1276_v23 = vld [vmem:[#allocation2 + $0x6f] sm:$0x1] }
 0x13c   :  { %v997_v34 = vmul.f32 %v1264_v38, %v2149_v20  ;;  %v1017_v0 = vadd.f32 %v1016_v37, %v1015_v31  ;;  %v1020_v48 = vmul.f32 %v2282_v4, %v2282_v4  ;;  %v940_v55 = vadd.f32 %v939_v17, %v2239_v45 }
 0x13d   :  { %v943_v61 = vmul.f32 %v1265_v43, %v2145_v27  ;;  %v968_v54 = vadd.f32 %v967_v25, %v936_v14  ;;  %v971_v60 = vmul.f32 %v1266_v26, %v2147_v11  ;;  %v2309_v32 = vadd.f32 %v995_v5, %v964_v51  ;;  %v1275_v25 = vld [vmem:[#allocation2 + $0x7c] sm:$0x1] }
 0x13e   :  { %v999_v35 = vmul.f32 %v1267_v21, %v2149_v20  ;;  %v1019_v42 = vadd.f32 %v1018_v62, %v1017_v0  ;;  %v1022_v15 = vmul.f32 %v2293_v8, %v2293_v8  ;;  %v942_v9 = vadd.f32 %v941_v30, %v2249_v1 }
 0x13f   :  { %v945_v45 = vmul.f32 %v1268_v63, %v2145_v27  ;;  %v970_v16 = vadd.f32 %v969_v36, %v938_v44  ;;  %v973_v6 = vmul.f32 %v1269_v33, %v2147_v11  ;;  %v2317_v12 = vadd.f32 %v997_v34, %v966_v41  ;;  %v1277_v41 = vld [vmem:[#allocation2 + $0x7d] sm:$0x1] }
 0x140   :  { %v1001_v13 = vmul.f32 %v1270_v49, %v2149_v20  ;;  %v1021_v10 = vadd.f32 %v1020_v48, %v1019_v42  ;;  %v1024_v39 = vmul.f32 %v2301_v50, %v2301_v50  ;;  %v944_v47 = vadd.f32 %v943_v61, %v2252_v29  ;;  %v1274_v29 = vld [vmem:[#allocation2 + $0x6e] sm:$0x1]  ;;  %v1278_v48 = vld [vmem:[#allocation2 + $0x7e] sm:$0x1] }
 0x141   :  { %v947_v1 = vmul.f32 %v1271_v19, %v2145_v27  ;;  %v972_v7 = vadd.f32 %v971_v60, %v940_v55  ;;  %v975_v56 = vmul.f32 %v1272_v3, %v2147_v11  ;;  %v2325_v2 = vadd.f32 %v999_v35, %v968_v54 }
 0x142   :  { %v1003_v37 = vmul.f32 %v1273_v22, %v2149_v20  ;;  %v1023_v14 = vadd.f32 %v1022_v15, %v1021_v10  ;;  %v1026_v57 = vmul.f32 %v2309_v32, %v2309_v32  ;;  %v946_v17 = vadd.f32 %v945_v45, %v2255_v58 }
 0x143   :  { %v974_v51 = vadd.f32 %v973_v6, %v942_v9  ;;  %v977_v52 = vmul.f32 %v1274_v29, %v2147_v11  ;;  %v2332_v27 = vadd.f32 %v1001_v13, %v970_v16  ;;  %v1005_v53 = vmul.f32 %v1275_v25, %v2149_v20 }
 0x144   :  { %v1025_v5 = vadd.f32 %v1024_v39, %v1023_v14  ;;  %v1028_v31 = vmul.f32 %v2317_v12, %v2317_v12  ;;  %v948_v62 = vadd.f32 %v947_v1, %v2271_v28  ;;  %v976_v44 = vadd.f32 %v975_v56, %v944_v47 }
 0x145   :  { %v979_v30 = vmul.f32 %v1276_v23, %v2147_v11  ;;  %v1004_v58 = vadd.f32 %v1003_v37, %v972_v7  ;;  %v1007_v59 = vmul.f32 %v1277_v41, %v2149_v20  ;;  %v1030_v38 = vmul.f32 %v2325_v2, %v2325_v2  ;;  %v1279_v11 = vld [vmem:[#allocation2 + $0x7f] sm:$0x1] }
 0x146   :  { %v1027_v36 = vadd.f32 %v1026_v57, %v1025_v5  ;;  %v978_v34 = vadd.f32 %v977_v52, %v946_v17  ;;  %v1006_v0 = vadd.f32 %v1005_v53, %v974_v51  ;;  %v1009_v55 = vmul.f32 %v1278_v48, %v2149_v20 }
 0x147   :  { %v1032_v28 = vmul.f32 %v2332_v27, %v2332_v27  ;;  %v980_v61 = vadd.f32 %v979_v30, %v948_v62  ;;  %v1008_v54 = vadd.f32 %v1007_v59, %v976_v44  ;;  %v1011_v26 = vmul.f32 %v1279_v11, %v2149_v20 }
 0x148   :  { %v1029_v43 = vadd.f32 %v1028_v31, %v1027_v36  ;;  %v1034_v21 = vmul.f32 %v1004_v58, %v1004_v58  ;;  %v1010_v35 = vadd.f32 %v1009_v55, %v978_v34  ;;  %v1036_v15 = vmul.f32 %v1006_v0, %v1006_v0 }
 0x149   :  { %v1012_v9 = vadd.f32 %v1011_v26, %v980_v61  ;;  %v1038_v45 = vmul.f32 %v1008_v54, %v1008_v54 }
 0x14a   :  { %v1031_v60 = vadd.f32 %v1030_v38, %v1029_v43  ;;  %v1040_v33 = vmul.f32 %v1010_v35, %v1010_v35 }
 0x14b   :  { %v1042_v49 = vmul.f32 %v1012_v9, %v1012_v9 }
 0x14c   :  { %v1033_v42 = vadd.f32 %v1032_v28, %v1031_v60 }
 0x14e   :  { %v1035_v63 = vadd.f32 %v1034_v21, %v1033_v42 }
 0x150   :  { %v1037_v16 = vadd.f32 %v1036_v15, %v1035_v63 }
 0x152   :  { %v1039_v6 = vadd.f32 %v1038_v45, %v1037_v16 }
 0x154   :  { %v1041_v13 = vadd.f32 %v1040_v33, %v1039_v6 }
 0x156   :  { %v1043_v10 = vadd.f32 %v1042_v49, %v1041_v13 }
 0x158   :  { %v1044_v39 = vadd.f32 1.0, %v1043_v10  ;;  %v1050_v47 = vadd.f32 1e-08, %v1043_v10 }
 0x15a   :  { %1148 = vrcp.f32 %v1044_v39 }
 0x15b   :  { %1150 = vrcp.f32 %v1050_v47 }
 0x160   :  { %v1149_v19 = vpop.eup %1148 }
 0x161   :  { %v1151_v20 = vpop.eup %1150  ;;  %v1046_v1 = vmul.f32 %v1149_v19, %v1044_v39 }
 0x162   :  { %v1052_v7 = vmul.f32 %v1151_v20, %v1050_v47 }
 0x163   :  { %v1047_v3 = vsub.f32 2.0, %v1046_v1 }
 0x164   :  { %v1053_v56 = vsub.f32 2.0, %v1052_v7 }
 0x165   :  { %v1048_v22 = vmul.f32 %v1149_v19, %v1047_v3 }
 0x166   :  { %v1054_v37 = vmul.f32 %v1151_v20, %v1053_v56 }
 0x167   :  { %v1049_v14 = vmul.f32 %v1048_v22, %v1043_v10 }
 0x169   :  { %v1055_v57 = vmul.f32 %v1054_v37, %v1049_v14 }
 0x16b   :  { %v1056_v17 = vmul.f32 %v1055_v57, %v2263_v18  ;;  %v1057_v51 = vmul.f32 %v1055_v57, %v2265_v24  ;;  %v1058_v29 = vmul.f32 %v1055_v57, %v2267_v46  ;;  %v1059_v52 = vmul.f32 %v1055_v57, %v2277_v40 }
 0x16c   :  { %v1060_v25 = vmul.f32 %v1055_v57, %v2282_v4  ;;  %v1061_v53 = vmul.f32 %v1055_v57, %v2293_v8  ;;  %v1062_v5 = vmul.f32 %v1055_v57, %v2301_v50  ;;  %v1063_v31 = vmul.f32 %v1055_v57, %v2309_v32 }
 0x16d   :  { %1072 = vst [vmem:[#allocation5] sm:$0x1] %v1056_v17  ;;  %v1064_v18 = vmul.f32 %v1055_v57, %v2317_v12  ;;  %v1065_v24 = vmul.f32 %v1055_v57, %v2325_v2  ;;  %v1066_v46 = vmul.f32 %v1055_v57, %v2332_v27  ;;  %v1067_v40 = vmul.f32 %v1055_v57, %v1004_v58 }
 0x16e   :  { %1074 = vst [vmem:[#allocation5 + $0x1] sm:$0x1] %v1057_v51  ;;  %v1068_v4 = vmul.f32 %v1055_v57, %v1006_v0  ;;  %v1069_v8 = vmul.f32 %v1055_v57, %v1008_v54  ;;  %v1070_v50 = vmul.f32 %v1055_v57, %v1010_v35  ;;  %v1071_v32 = vmul.f32 %v1055_v57, %v1012_v9 }
 0x16f   :  { %1076 = vst [vmem:[#allocation5 + $0x2] sm:$0x1] %v1058_v29 }
 0x170   :  { %1078 = vst [vmem:[#allocation5 + $0x3] sm:$0x1] %v1059_v52 }
 0x171   :  { %1080 = vst [vmem:[#allocation5 + $0x4] sm:$0x1] %v1060_v25 }
 0x172   :  { %1082 = vst [vmem:[#allocation5 + $0x5] sm:$0x1] %v1061_v53 }
 0x173   :  { %1084 = vst [vmem:[#allocation5 + $0x6] sm:$0x1] %v1062_v5 }
 0x174   :  { %1086 = vst [vmem:[#allocation5 + $0x7] sm:$0x1] %v1063_v31 }
 0x175   :  { %1088 = vst [vmem:[#allocation5 + $0x8] sm:$0x1] %v1064_v18 }
 0x176   :  { %1090 = vst [vmem:[#allocation5 + $0x9] sm:$0x1] %v1065_v24 }
 0x177   :  { %1092 = vst [vmem:[#allocation5 + $0xa] sm:$0x1] %v1066_v46 }
 0x178   :  { %1094 = vst [vmem:[#allocation5 + $0xb] sm:$0x1] %v1067_v40 }
 0x179   :  { %1096 = vst [vmem:[#allocation5 + $0xc] sm:$0x1] %v1068_v4 }
 0x17a   :  { %1098 = vst [vmem:[#allocation5 + $0xd] sm:$0x1] %v1069_v8 }
 0x17b   :  { %1100 = vst [vmem:[#allocation5 + $0xe] sm:$0x1] %v1070_v50 }
 0x17c   :  { %1102 = vst [vmem:[#allocation5 + $0xf] sm:$0x1] %v1071_v32 }
 0x17d   :  { %1115 = dma.vmem_to_hbm [thread:$0]  %s1108_s13, 256, %s1110_s16, [#allocation4], %s1333_s11, %s1333_s11, %s1334_s12  }
 0x17e   :  { %1330 = dma.done.wait [#allocation4], 256  }
 0x17f   :  { %1331 = vsyncadd [#allocation4], 4294967040 }
 0x180   :  { %1120 = vsyncpa [#allocation3], 1 }
 0x181   :  { %1121 = vsyncpa [#allocation4], 1 }

</bundles_post_ra>
